<compile_context>
chip_gen: v6e
topology: v6e:2x2x1
jax: 0.10.0
libtpu: 0.0.40
codegen_flags: <defaults>
</compile_context>

<pallas_src>
import jax
import jax.numpy as jnp
import numpy as np
from jax import lax
from jax.experimental import pallas as pl
from jax.experimental.pallas import tpu as pltpu

EPS = 1e-5
LANE = 128


def _round_up(x, m):
    return (x + m - 1) // m * m


# ----------------------------------------------------------------------------
# Fused flat-grid conv kernel factory.
#   mode = "plain"    : conv(x)                                  [conv1]
#   mode = "affine"   : conv(mask * relu(a*x + c))               [conv2: fused BN1+ReLU]
#   mode = "residual" : conv(mask * (a*x + c + Wc@z))            [up: fused BN2+identity+residual]
# Optional fused output ReLU and fused per-program BatchNorm partial statistics.
# ----------------------------------------------------------------------------
def _make_conv_kernel(offsets, mode, out_relu, want_stats):
    n_taps = len(offsets)

    def kernel(*refs):
        it = iter(refs)
        xc_ref = next(it)                      # (1, C, s_tile)   main input, tile j
        xn_ref = next(it)                      # (1, C, s_tile)   main input, tile j+1 (halo)
        if mode == "residual":
            zc_ref = next(it)                  # (1, Cz, s_tile)  identity-path input, tile j
            zn_ref = next(it)                  # (1, Cz, s_tile)  identity-path input, tile j+1
        w_ref = next(it)                       # (rows, K) bf16   fused conv weights
        b_ref = next(it)                       # (rows, 1) f32
        if mode != "plain":
            a_ref = next(it)                   # (C, 1) f32       per-channel scale
            c_ref = next(it)                   # (C, 1) f32       per-channel shift
            mc_ref = next(it)                  # (1, s_tile)      valid-input mask, tile j
            mn_ref = next(it)                  # (1, s_tile)      valid-input mask, tile j+1
        if mode == "residual":
            wc_ref = next(it)                  # (C, Cz) bf16     1x1x1 conv weights
        if want_stats:
            om_ref = next(it)                  # (1, s_tile)      valid-output mask
        y_ref = next(it)                       # (1, rows, s_tile)
        if want_stats:
            sum_ref = next(it)                 # (1, 1, rows, 1)
            ssq_ref = next(it)                 # (1, 1, rows, 1)
        xcol_ref = next(it)                    # (K, s_tile) f32  im2col scratch
        if mode != "plain":
            tc_ref = next(it)                  # (C, s_tile) f32  transformed tile j
            tn_ref = next(it)                  # (C, halo)   f32  transformed halo of tile j+1

        c_main = xc_ref.shape[1]
        s_tile = xc_ref.shape[2]
        halo = tn_ref.shape[1] if mode != "plain" else s_tile

        # ---- fused input transform (previous-stage BN / act / residual) ------
        if mode == "affine":
            tc_ref[...] = (jnp.maximum(a_ref[...] * xc_ref[0] + c_ref[...], 0.0)
                           * mc_ref[...])
            tn_ref[...] = (jnp.maximum(a_ref[...] * xn_ref[0, :, :halo] + c_ref[...], 0.0)
                           * mn_ref[:, :halo])
        elif mode == "residual":
            id_c = jnp.dot(wc_ref[...], zc_ref[0],
                           preferred_element_type=jnp.float32)
            id_n = jnp.dot(wc_ref[...], zn_ref[0, :, :halo],
                           preferred_element_type=jnp.float32)
            tc_ref[...] = (a_ref[...] * xc_ref[0] + c_ref[...] + id_c) * mc_ref[...]
            tn_ref[...] = ((a_ref[...] * xn_ref[0, :, :halo] + c_ref[...] + id_n)
                           * mn_ref[:, :halo])

        # ---- im2col: one (<=2 piece) strided copy per tap ---------------------
        for t in range(n_taps):
            off = offsets[t]
            r0 = t * c_main
            if mode == "plain":
                if off == 0:
                    xcol_ref[r0:r0 + c_main, :] = xc_ref[0].astype(jnp.float32)
                elif off < s_tile:
                    xcol_ref[r0:r0 + c_main, :s_tile - off] = (
                        xc_ref[0, :, off:].astype(jnp.float32))
                    xcol_ref[r0:r0 + c_main, s_tile - off:] = (
                        xn_ref[0, :, :off].astype(jnp.float32))
                else:  # off == s_tile
                    xcol_ref[r0:r0 + c_main, :] = xn_ref[0].astype(jnp.float32)
            else:
                if off == 0:
                    xcol_ref[r0:r0 + c_main, :] = tc_ref[...]
                elif off < s_tile:
                    xcol_ref[r0:r0 + c_main, :s_tile - off] = tc_ref[:, off:]
                    xcol_ref[r0:r0 + c_main, s_tile - off:] = tn_ref[:, :off]
                else:  # off == s_tile (only possible when halo == s_tile)
                    xcol_ref[r0:r0 + c_main, :] = tn_ref[...]

        # ---- single MXU matmul over the whole K = k^3 * C contraction --------
        acc = jnp.dot(w_ref[...], xcol_ref[...].astype(jnp.bfloat16),
                      preferred_element_type=jnp.float32)
        acc = acc + b_ref[...]
        if out_relu:
            acc = jnp.maximum(acc, 0.0)
        y_ref[0] = acc.astype(y_ref.dtype)

        # ---- fused one-pass BatchNorm partial statistics (per program) -------
        if want_stats:
            masked = acc * om_ref[...]
            sum_ref[0, 0] = jnp.sum(masked, axis=-1, keepdims=True)
            ssq_ref[0, 0] = jnp.sum(masked * acc, axis=-1, keepdims=True)

    return kernel


# ----------------------------------------------------------------------------
# Wrapper for one fused conv stage.
# ----------------------------------------------------------------------------
def _flat_conv(x_main, w_mat, bias, *, offsets, s_tile, n_tiles, halo,
               affine=None, in_mask=None, x_aux=None, w_aux=None,
               out_relu=False, out_mask=None):
    N, C, L = x_main.shape
    rows, K = w_mat.shape
    assert K == len(offsets) * C
    assert L == n_tiles * s_tile
    assert halo <= s_tile
    want_stats = out_mask is not None
    mode = "plain" if affine is None else ("residual" if x_aux is not None else "affine")
    last = n_tiles - 1

    def cur_map(n, j):
        return (n, 0, j)

    def nxt_map(n, j):
        return (n, 0, jnp.minimum(j + 1, last))

    def rep_map(n, j):
        return (0, 0)

    inputs = [x_main, x_main]
    in_specs = [pl.BlockSpec((1, C, s_tile), cur_map),
                pl.BlockSpec((1, C, s_tile), nxt_map)]
    if mode == "residual":
        Cz = x_aux.shape[1]
        inputs += [x_aux, x_aux]
        in_specs += [pl.BlockSpec((1, Cz, s_tile), cur_map),
                     pl.BlockSpec((1, Cz, s_tile), nxt_map)]
    inputs += [w_mat, bias.reshape(rows, 1).astype(jnp.float32)]
    in_specs += [pl.BlockSpec((rows, K), rep_map),
                 pl.BlockSpec((rows, 1), rep_map)]
    if mode != "plain":
        a_vec, c_vec = affine
        inputs += [a_vec.reshape(C, 1).astype(jnp.float32),
                   c_vec.reshape(C, 1).astype(jnp.float32),
                   in_mask, in_mask]
        in_specs += [pl.BlockSpec((C, 1), rep_map),
                     pl.BlockSpec((C, 1), rep_map),
                     pl.BlockSpec((1, s_tile), lambda n, j: (0, j)),
                     pl.BlockSpec((1, s_tile), lambda n, j: (0, jnp.minimum(j + 1, last)))]
    if mode == "residual":
        inputs += [w_aux]
        in_specs += [pl.BlockSpec((C, x_aux.shape[1]), rep_map)]
    if want_stats:
        inputs += [out_mask]
        in_specs += [pl.BlockSpec((1, s_tile), lambda n, j: (0, j))]

    out_shape = [jax.ShapeDtypeStruct((N, rows, L), jnp.float32)]
    out_specs = [pl.BlockSpec((1, rows, s_tile), lambda n, j: (n, 0, j))]
    if want_stats:
        stat_shape = jax.ShapeDtypeStruct((N, n_tiles, rows, 1), jnp.float32)
        stat_spec = pl.BlockSpec((1, 1, rows, 1), lambda n, j: (n, j, 0, 0))
        out_shape += [stat_shape, stat_shape]
        out_specs += [stat_spec, stat_spec]

    scratch = [pltpu.VMEM((K, s_tile), jnp.float32)]
    if mode != "plain":
        scratch += [pltpu.VMEM((C, s_tile), jnp.float32),
                    pltpu.VMEM((C, halo), jnp.float32)]

    kernel = _make_conv_kernel(offsets, mode, out_relu, want_stats)

    return pl.pallas_call(
        kernel,
        grid=(N, n_tiles),
        in_specs=in_specs,
        out_specs=tuple(out_specs) if want_stats else out_specs[0],
        out_shape=tuple(out_shape) if want_stats else out_shape[0],
        scratch_shapes=scratch,
        compiler_params=pltpu.CompilerParams(
            # no output block is revisited -> both axes shard across cores
            dimension_semantics=("parallel", "parallel"),
            vmem_limit_bytes=48 * 1024 * 1024),
    )(*inputs)


# ----------------------------------------------------------------------------
# Weight / BN helpers (wrapper-side, O(C^2 k^3) math).
# ----------------------------------------------------------------------------
def _conv_weight_mat(w, c_in_p, c_out_p):
    """(Cout, Cin, k, k, k) -> (c_out_p, k^3*c_in_p) bf16, tap-major columns."""
    Cout, Cin, k = w.shape[0], w.shape[1], w.shape[2]
    wp = jnp.pad(w.astype(jnp.float32),
                 ((0, c_out_p - Cout), (0, c_in_p - Cin), (0, 0), (0, 0), (0, 0)))
    return wp.transpose(0, 2, 3, 4, 1).reshape(c_out_p, k ** 3 * c_in_p).astype(jnp.bfloat16)


def _up_weight_mat(wt, c_in_p, c_out_p):
    """ConvTranspose3d(k=4, stride=2, pad=1) weights -> polyphase matrix.

    wt: (Cin_t, Cout_t, 4, 4, 4) (PyTorch ConvTranspose layout).  Returns
    (8*c_out_p, 27*c_in_p) bf16: 8 output parity phases, each a weighted sum over
    the 3x3x3 neighbourhood of the zero-padded residual tensor.
    """
    Ci, Co, ku = wt.shape[0], wt.shape[1], wt.shape[2]
    assert ku == 4  # TODO(synk): polyphase table only derived for size_filter == 3.
    g = np.zeros((2, 3, ku), np.float32)
    g[0, 0, 3] = 1.0   # even outputs 2m: R[m+0] gets wt[3]
    g[0, 1, 1] = 1.0   # even outputs 2m: R[m+1] gets wt[1]
    g[1, 1, 2] = 1.0   # odd  outputs 2m+1: R[m+1] gets wt[2]
    g[1, 2, 0] = 1.0   # odd  outputs 2m+1: R[m+2] gets wt[0]
    g = jnp.asarray(g)
    m = jnp.einsum("adu,bev,cfw,iouvw->abcodefi", g, g, g, wt.astype(jnp.float32))
    m = jnp.pad(m, ((0, 0), (0, 0), (0, 0), (0, c_out_p - Co),
                    (0, 0), (0, 0), (0, 0), (0, c_in_p - Ci)))
    return m.reshape(8 * c_out_p, 27 * c_in_p).astype(jnp.bfloat16)


def _bn_scale_shift(psum, pssq, count, gamma, beta):
    # TODO(synk): one-pass E[x^2]-E[x]^2 variance can lose precision for very
    # large counts; a Chan/Welford partial merge would be more robust at scale.
    ssum = jnp.sum(psum, axis=(0, 1))[:, 0]
    ssq = jnp.sum(pssq, axis=(0, 1))[:, 0]
    mean = ssum / count
    var = ssq / count - mean * mean
    a = gamma * lax.rsqrt(var + EPS)
    b = beta - mean * a
    return a, b


# ----------------------------------------------------------------------------
# Full Res_Block_Up_3D forward.
# ----------------------------------------------------------------------------
def res_block_up_3d_forward(x, p, *, s_tile_req=1024):
    N, Cin, D, H, W = x.shape
    Cout = p["w1"].shape[0]
    k = p["w1"].shape[2]
    assert k % 2 == 1
    pad = k // 2
    # TODO(synk): size_stride != 1 and fn_act != ReLU are not implemented (the
    # residual structure of the reference module requires stride 1 anyway).
    Dp, Hp, Wp = D + 2 * pad, H + 2 * pad, W + 2 * pad
    Do, Ho, Wo = Dp - k + 1, Hp - k + 1, Wp - k + 1        # == D, H, W for pad=k//2

    Cin_p = _round_up(Cin, 8)
    Cout_p = _round_up(Cout, 8)

    # shared flat geometry: conv1, conv2 and the fused residual+up stage all act
    # on the same (Dp, Hp, Wp) padded grid.
    s_flat = Dp * Hp * Wp
    offsets = tuple(kd * Hp * Wp + kh * Wp + kw
                    for kd in range(k) for kh in range(k) for kw in range(k))
    max_off = max(offsets)
    s_tile = max(_round_up(min(s_tile_req, _round_up(s_flat, LANE)), LANE),
                 _round_up(max_off, LANE))
    n_tiles = pl.cdiv(s_flat, s_tile)
    L = n_tiles * s_tile
    halo = _round_up(max_off, LANE)
    shift = Hp * Wp + Wp + 1           # flat offset of a (+1,+1,+1) grid shift

    def pad_c(v, c_p):
        return jnp.pad(v.astype(jnp.float32), (0, c_p - v.shape[0]))

    # ---- flatten x once (bf16): data at grid coords [pad, pad+D) per dim -----
    xp = jnp.pad(x.astype(jnp.float32),
                 ((0, 0), (0, Cin_p - Cin), (pad, pad), (pad, pad), (pad, pad)))
    x_flat = jnp.pad(xp.reshape(N, Cin_p, s_flat),
                     ((0, 0), (0, 0), (0, L - s_flat))).astype(jnp.bfloat16)

    # ---- shared valid masks ----------------------------------------------------
    dd = jnp.arange(Dp)[:, None, None]
    hh = jnp.arange(Hp)[None, :, None]
    ww = jnp.arange(Wp)[None, None, :]
    in_valid = ((dd >= pad) & (dd < pad + D) & (hh >= pad) & (hh < pad + H)
                & (ww >= pad) & (ww < pad + W))
    out_valid = (dd < Do) & (hh < Ho) & (ww < Wo)

    def flat_mask(m):
        return jnp.pad(m.reshape(1, s_flat).astype(jnp.float32),
                       ((0, 0), (0, L - s_flat)))

    in_mask = flat_mask(in_valid)
    out_mask = flat_mask(out_valid)

    def _shift_right(y):
        # conv output-grid -> next stage's padded-input grid: one flat pad+slice
        return jnp.pad(y, ((0, 0), (0, 0), (shift, 0)))[:, :, :L]

    count = jnp.float32(N * Do * Ho * Wo)

    # ---- stage 1: conv1 + fused BN1 batch statistics ----------------------------
    w1_mat = _conv_weight_mat(p["w1"], Cin_p, Cout_p)
    y1, s1, q1 = _flat_conv(
        x_flat, w1_mat, pad_c(p["b1"], Cout_p),
        offsets=offsets, s_tile=s_tile, n_tiles=n_tiles, halo=halo,
        out_mask=out_mask)
    a1, c1 = _bn_scale_shift(s1, q1, count, pad_c(p["g1"], Cout_p),
                             pad_c(p["be1"], Cout_p))

    # ---- stage 2: [BN1+ReLU fused into the input] conv2 + BN2 statistics --------
    w2_mat = _conv_weight_mat(p["w2"], Cout_p, Cout_p)
    y2, s2, q2 = _flat_conv(
        _shift_right(y1), w2_mat, pad_c(p["b2"], Cout_p),
        offsets=offsets, s_tile=s_tile, n_tiles=n_tiles, halo=halo,
        affine=(a1, c1), in_mask=in_mask, out_mask=out_mask)
    a2, c2 = _bn_scale_shift(s2, q2, count, pad_c(p["g2"], Cout_p),
                             pad_c(p["be2"], Cout_p))

    # ---- stage 3: fused BN2-apply + 1x1x1 identity conv + residual add
    #               + polyphase ConvTranspose3d(k+1, stride 2, pad 1) + ReLU ------
    wup_mat = _up_weight_mat(p["wt"], Cout_p, Cout_p)
    bup = jnp.tile(pad_c(p["bt"], Cout_p), 8)
    wc_mat = jnp.pad(p["wc"].astype(jnp.float32).reshape(Cout, Cin),
                     ((0, Cout_p - Cout), (0, Cin_p - Cin))).astype(jnp.bfloat16)
    c2_res = c2 + pad_c(p["bc"], Cout_p)      # fold the 1x1 conv bias into BN2 shift
    y3 = _flat_conv(
        _shift_right(y2), wup_mat, bup,
        offsets=offsets, s_tile=s_tile, n_tiles=n_tiles, halo=halo,
        affine=(a2, c2_res), in_mask=in_mask,
        x_aux=x_flat, w_aux=wc_mat, out_relu=True)

    # ---- interleave the 8 parity phases into the (2D, 2H, 2W) output ------------
    yv = y3[:, :, :s_flat].reshape(N, 8, Cout_p, Dp, Hp, Wp)[:, :, :Cout, :Do, :Ho, :Wo]
    yv = yv.reshape(N, 2, 2, 2, Cout, Do, Ho, Wo)
    out = yv.transpose(0, 4, 5, 1, 6, 2, 7, 3).reshape(N, Cout, 2 * Do, 2 * Ho, 2 * Wo)
    return out


# ----------------------------------------------------------------------------
# Pure-JAX reference (f32) for validation.
# ----------------------------------------------------------------------------
def _reference(x, p):
    k = p["w1"].shape[2]
    pad = k // 2

    def conv(z, w, b, padding):
        y = lax.conv_general_dilated(
            z, w, window_strides=(1, 1, 1), padding=[(padding, padding)] * 3,
            dimension_numbers=("NCDHW", "OIDHW", "NCDHW"))
        return y + b[None, :, None, None, None]

    def bn(y, g, be):
        m = jnp.mean(y, axis=(0, 2, 3, 4), keepdims=True)
        v = jnp.mean(jnp.square(y - m), axis=(0, 2, 3, 4), keepdims=True)
        return (g[None, :, None, None, None] * (y - m) / jnp.sqrt(v + EPS)
                + be[None, :, None, None, None])

    out = conv(x, p["w1"], p["b1"], pad)
    out = jax.nn.relu(bn(out, p["g1"], p["be1"]))
    out = conv(out, p["w2"], p["b2"], pad)
    out = bn(out, p["g2"], p["be2"])
    ident = conv(x, p["wc"], p["bc"], 0)
    out = out + ident
    ku = p["wt"].shape[2]
    w_eq = jnp.flip(p["wt"], axis=(2, 3, 4)).transpose(1, 0, 2, 3, 4)
    y = lax.conv_general_dilated(
        out, w_eq, window_strides=(1, 1, 1), padding=[(ku - 2, ku - 2)] * 3,
        lhs_dilation=(2, 2, 2),
        dimension_numbers=("NCDHW", "OIDHW", "NCDHW"))
    y = y + p["bt"][None, :, None, None, None]
    return jax.nn.relu(y)


if __name__ == "__main__":
    N, Cin, Cout, D = 2, 4, 8, 6
    k = 3

    key = jax.random.PRNGKey(0)
    ks = jax.random.split(key, 13)
    x = jax.random.normal(ks[0], (N, Cin, D, D, D), jnp.float32)
    p = {
        "w1": 0.1 * jax.random.normal(ks[1], (Cout, Cin, k, k, k), jnp.float32),
        "b1": 0.1 * jax.random.normal(ks[2], (Cout,), jnp.float32),
        "g1": 1.0 + 0.1 * jax.random.normal(ks[3], (Cout,), jnp.float32),
        "be1": 0.1 * jax.random.normal(ks[4], (Cout,), jnp.float32),
        "w2": 0.1 * jax.random.normal(ks[5], (Cout, Cout, k, k, k), jnp.float32),
        "b2": 0.1 * jax.random.normal(ks[6], (Cout,), jnp.float32),
        "g2": 1.0 + 0.1 * jax.random.normal(ks[7], (Cout,), jnp.float32),
        "be2": 0.1 * jax.random.normal(ks[8], (Cout,), jnp.float32),
        "wc": 0.1 * jax.random.normal(ks[9], (Cout, Cin, 1, 1, 1), jnp.float32),
        "bc": 0.1 * jax.random.normal(ks[10], (Cout,), jnp.float32),
        "wt": 0.1 * jax.random.normal(ks[11], (Cout, Cout, k + 1, k + 1, k + 1),
                                      jnp.float32),
        "bt": 0.1 * jax.random.normal(ks[12], (Cout,), jnp.float32),
    }

    fwd = jax.jit(res_block_up_3d_forward, static_argnames=("s_tile_req",))
    # small tile request so the demo exercises the multi-tile halo path
    out = jax.block_until_ready(fwd(x, p, s_tile_req=256))

    ref = _reference(x, p)
    assert out.shape == (N, Cout, 2 * D, 2 * D, 2 * D), out.shape
    max_err = float(jnp.max(jnp.abs(out - ref)))
    # bf16 MXU operands (f32 accumulation) vs the all-f32 reference
    assert jnp.allclose(out, ref, atol=5e-2, rtol=5e-2), f"mismatch, max_err={max_err}"

    print("KERNEL_OK")
</pallas_src>

<mosaic_0001>
module attributes {stable_mosaic.version = 11 : i64} {
  func.func @kernel(%arg0: i32, %arg1: i32, %arg2: memref<1x8x256xbf16, #tpu.memory_space<vmem>>, %arg3: memref<1x8x256xbf16, #tpu.memory_space<vmem>>, %arg4: memref<8x216xbf16, #tpu.memory_space<vmem>>, %arg5: memref<8x1xf32, #tpu.memory_space<vmem>>, %arg6: memref<1x256xf32, #tpu.memory_space<vmem>>, %arg7: memref<1x8x256xf32, #tpu.memory_space<vmem>>, %arg8: memref<1x1x8x1xf32, #tpu.memory_space<vmem>>, %arg9: memref<1x1x8x1xf32, #tpu.memory_space<vmem>>, %arg10: memref<216x256xf32, #tpu.memory_space<vmem>>) attributes {dimension_semantics = [#tpu.dimension_semantics<parallel>, #tpu.dimension_semantics<parallel>], iteration_bounds = array<i64: 2, 2>, scalar_prefetch = 0 : i64, scratch_operands = 1 : i64, tpu.core_type = #tpu.core_type<tc>, window_params = [{transform_indices = @transform_0, window_bounds = array<i64: 1, 8, 256>}, {transform_indices = @transform_1, window_bounds = array<i64: 1, 8, 256>}, {pipeline_mode = #tpu.pipeline_mode<synchronous>, transform_indices = @transform_2, window_bounds = array<i64: 8, 216>}, {pipeline_mode = #tpu.pipeline_mode<synchronous>, transform_indices = @transform_3, window_bounds = array<i64: 8, 1>}, {transform_indices = @transform_4, window_bounds = array<i64: 1, 256>}, {transform_indices = @transform_5, window_bounds = array<i64: 1, 8, 256>}, {transform_indices = @transform_6, window_bounds = array<i64: 1, 1, 8, 1>}, {transform_indices = @transform_7, window_bounds = array<i64: 1, 1, 8, 1>}]} {
    %c0 = arith.constant 0 : index
    %c0_0 = arith.constant 0 : index
    %c0_1 = arith.constant 0 : index
    %0 = vector.load %arg2[%c0, %c0_0, %c0_1] : memref<1x8x256xbf16, #tpu.memory_space<vmem>>, vector<1x8x256xbf16>
    %1 = vector.shape_cast %0 : vector<1x8x256xbf16> to vector<8x256xbf16>
    %2 = arith.extf %1 : vector<8x256xbf16> to vector<8x256xf32>
    %c0_2 = arith.constant 0 : index
    %c0_3 = arith.constant 0 : index
    %3 = vector.load %arg10[%c0_2, %c0_3] : memref<216x256xf32, #tpu.memory_space<vmem>>, vector<8x256xf32>
    tpu.vector_store %arg10[%c0_2, %c0_3], %2 {strides = array<i32>} : memref<216x256xf32, #tpu.memory_space<vmem>>, vector<8x256xf32>,
    %c0_4 = arith.constant 0 : index
    %c0_5 = arith.constant 0 : index
    %c1 = arith.constant 1 : index
    %4 = vector.load %arg2[%c0_4, %c0_5, %c1] : memref<1x8x256xbf16, #tpu.memory_space<vmem>>, vector<1x8x255xbf16>
    %5 = vector.shape_cast %4 : vector<1x8x255xbf16> to vector<8x255xbf16>
    %6 = arith.extf %5 : vector<8x255xbf16> to vector<8x255xf32>
    %c8 = arith.constant 8 : index
    %c0_6 = arith.constant 0 : index
    %7 = vector.load %arg10[%c8, %c0_6] : memref<216x256xf32, #tpu.memory_space<vmem>>, vector<8x255xf32>
    tpu.vector_store %arg10[%c8, %c0_6], %6 {strides = array<i32>} : memref<216x256xf32, #tpu.memory_space<vmem>>, vector<8x255xf32>,
    %c0_7 = arith.constant 0 : index
    %c0_8 = arith.constant 0 : index
    %c0_9 = arith.constant 0 : index
    %8 = vector.load %arg3[%c0_7, %c0_8, %c0_9] : memref<1x8x256xbf16, #tpu.memory_space<vmem>>, vector<1x8x1xbf16>
    %9 = vector.shape_cast %8 : vector<1x8x1xbf16> to vector<8x1xbf16>
    %10 = arith.extf %9 : vector<8x1xbf16> to vector<8x1xf32>
    %c8_10 = arith.constant 8 : index
    %c255 = arith.constant 255 : index
    %11 = vector.load %arg10[%c8_10, %c255] : memref<216x256xf32, #tpu.memory_space<vmem>>, vector<8x1xf32>
    tpu.vector_store %arg10[%c8_10, %c255], %10 {strides = array<i32>} : memref<216x256xf32, #tpu.memory_space<vmem>>, vector<8x1xf32>,
    %c0_11 = arith.constant 0 : index
    %c0_12 = arith.constant 0 : index
    %c2 = arith.constant 2 : index
    %12 = vector.load %arg2[%c0_11, %c0_12, %c2] : memref<1x8x256xbf16, #tpu.memory_space<vmem>>, vector<1x8x254xbf16>
    %13 = vector.shape_cast %12 : vector<1x8x254xbf16> to vector<8x254xbf16>
    %14 = arith.extf %13 : vector<8x254xbf16> to vector<8x254xf32>
    %c16 = arith.constant 16 : index
    %c0_13 = arith.constant 0 : index
    %15 = vector.load %arg10[%c16, %c0_13] : memref<216x256xf32, #tpu.memory_space<vmem>>, vector<8x254xf32>
    tpu.vector_store %arg10[%c16, %c0_13], %14 {strides = array<i32>} : memref<216x256xf32, #tpu.memory_space<vmem>>, vector<8x254xf32>,
    %c0_14 = arith.constant 0 : index
    %c0_15 = arith.constant 0 : index
    %c0_16 = arith.constant 0 : index
    %16 = vector.load %arg3[%c0_14, %c0_15, %c0_16] : memref<1x8x256xbf16, #tpu.memory_space<vmem>>, vector<1x8x2xbf16>
    %17 = vector.shape_cast %16 : vector<1x8x2xbf16> to vector<8x2xbf16>
    %18 = arith.extf %17 : vector<8x2xbf16> to vector<8x2xf32>
    %c16_17 = arith.constant 16 : index
    %c254 = arith.constant 254 : index
    %19 = vector.load %arg10[%c16_17, %c254] : memref<216x256xf32, #tpu.memory_space<vmem>>, vector<8x2xf32>
    tpu.vector_store %arg10[%c16_17, %c254], %18 {strides = array<i32>} : memref<216x256xf32, #tpu.memory_space<vmem>>, vector<8x2xf32>,
    %c0_18 = arith.constant 0 : index
    %c0_19 = arith.constant 0 : index
    %c8_20 = arith.constant 8 : index
    %20 = vector.load %arg2[%c0_18, %c0_19, %c8_20] : memref<1x8x256xbf16, #tpu.memory_space<vmem>>, vector<1x8x248xbf16>
    %21 = vector.shape_cast %20 : vector<1x8x248xbf16> to vector<8x248xbf16>
    %22 = arith.extf %21 : vector<8x248xbf16> to vector<8x248xf32>
    %c24 = arith.constant 24 : index
    %c0_21 = arith.constant 0 : index
    %23 = vector.load %arg10[%c24, %c0_21] : memref<216x256xf32, #tpu.memory_space<vmem>>, vector<8x248xf32>
    tpu.vector_store %arg10[%c24, %c0_21], %22 {strides = array<i32>} : memref<216x256xf32, #tpu.memory_space<vmem>>, vector<8x248xf32>,
    %c0_22 = arith.constant 0 : index
    %c0_23 = arith.constant 0 : index
    %c0_24 = arith.constant 0 : index
    %24 = vector.load %arg3[%c0_22, %c0_23, %c0_24] : memref<1x8x256xbf16, #tpu.memory_space<vmem>>, vector<1x8x8xbf16>
    %25 = vector.shape_cast %24 : vector<1x8x8xbf16> to vector<8x8xbf16>
    %26 = arith.extf %25 : vector<8x8xbf16> to vector<8x8xf32>
    %c24_25 = arith.constant 24 : index
    %c248 = arith.constant 248 : index
    %27 = vector.load %arg10[%c24_25, %c248] : memref<216x256xf32, #tpu.memory_space<vmem>>, vector<8x8xf32>
    tpu.vector_store %arg10[%c24_25, %c248], %26 {strides = array<i32>} : memref<216x256xf32, #tpu.memory_space<vmem>>, vector<8x8xf32>,
    %c0_26 = arith.constant 0 : index
    %c0_27 = arith.constant 0 : index
    %c9 = arith.constant 9 : index
    %28 = vector.load %arg2[%c0_26, %c0_27, %c9] : memref<1x8x256xbf16, #tpu.memory_space<vmem>>, vector<1x8x247xbf16>
    %29 = vector.shape_cast %28 : vector<1x8x247xbf16> to vector<8x247xbf16>
    %30 = arith.extf %29 : vector<8x247xbf16> to vector<8x247xf32>
    %c32 = arith.constant 32 : index
    %c0_28 = arith.constant 0 : index
    %31 = vector.load %arg10[%c32, %c0_28] : memref<216x256xf32, #tpu.memory_space<vmem>>, vector<8x247xf32>
    tpu.vector_store %arg10[%c32, %c0_28], %30 {strides = array<i32>} : memref<216x256xf32, #tpu.memory_space<vmem>>, vector<8x247xf32>,
    %c0_29 = arith.constant 0 : index
    %c0_30 = arith.constant 0 : index
    %c0_31 = arith.constant 0 : index
    %32 = vector.load %arg3[%c0_29, %c0_30, %c0_31] : memref<1x8x256xbf16, #tpu.memory_space<vmem>>, vector<1x8x9xbf16>
    %33 = vector.shape_cast %32 : vector<1x8x9xbf16> to vector<8x9xbf16>
    %34 = arith.extf %33 : vector<8x9xbf16> to vector<8x9xf32>
    %c32_32 = arith.constant 32 : index
    %c247 = arith.constant 247 : index
    %35 = vector.load %arg10[%c32_32, %c247] : memref<216x256xf32, #tpu.memory_space<vmem>>, vector<8x9xf32>
    tpu.vector_store %arg10[%c32_32, %c247], %34 {strides = array<i32>} : memref<216x256xf32, #tpu.memory_space<vmem>>, vector<8x9xf32>,
    %c0_33 = arith.constant 0 : index
    %c0_34 = arith.constant 0 : index
    %c10 = arith.constant 10 : index
    %36 = vector.load %arg2[%c0_33, %c0_34, %c10] : memref<1x8x256xbf16, #tpu.memory_space<vmem>>, vector<1x8x246xbf16>
    %37 = vector.shape_cast %36 : vector<1x8x246xbf16> to vector<8x246xbf16>
    %38 = arith.extf %37 : vector<8x246xbf16> to vector<8x246xf32>
    %c40 = arith.constant 40 : index
    %c0_35 = arith.constant 0 : index
    %39 = vector.load %arg10[%c40, %c0_35] : memref<216x256xf32, #tpu.memory_space<vmem>>, vector<8x246xf32>
    tpu.vector_store %arg10[%c40, %c0_35], %38 {strides = array<i32>} : memref<216x256xf32, #tpu.memory_space<vmem>>, vector<8x246xf32>,
    %c0_36 = arith.constant 0 : index
    %c0_37 = arith.constant 0 : index
    %c0_38 = arith.constant 0 : index
    %40 = vector.load %arg3[%c0_36, %c0_37, %c0_38] : memref<1x8x256xbf16, #tpu.memory_space<vmem>>, vector<1x8x10xbf16>
    %41 = vector.shape_cast %40 : vector<1x8x10xbf16> to vector<8x10xbf16>
    %42 = arith.extf %41 : vector<8x10xbf16> to vector<8x10xf32>
    %c40_39 = arith.constant 40 : index
    %c246 = arith.constant 246 : index
    %43 = vector.load %arg10[%c40_39, %c246] : memref<216x256xf32, #tpu.memory_space<vmem>>, vector<8x10xf32>
    tpu.vector_store %arg10[%c40_39, %c246], %42 {strides = array<i32>} : memref<216x256xf32, #tpu.memory_space<vmem>>, vector<8x10xf32>,
    %c0_40 = arith.constant 0 : index
    %c0_41 = arith.constant 0 : index
    %c16_42 = arith.constant 16 : index
    %44 = vector.load %arg2[%c0_40, %c0_41, %c16_42] : memref<1x8x256xbf16, #tpu.memory_space<vmem>>, vector<1x8x240xbf16>
    %45 = vector.shape_cast %44 : vector<1x8x240xbf16> to vector<8x240xbf16>
    %46 = arith.extf %45 : vector<8x240xbf16> to vector<8x240xf32>
    %c48 = arith.constant 48 : index
    %c0_43 = arith.constant 0 : index
    %47 = vector.load %arg10[%c48, %c0_43] : memref<216x256xf32, #tpu.memory_space<vmem>>, vector<8x240xf32>
    tpu.vector_store %arg10[%c48, %c0_43], %46 {strides = array<i32>} : memref<216x256xf32, #tpu.memory_space<vmem>>, vector<8x240xf32>,
    %c0_44 = arith.constant 0 : index
    %c0_45 = arith.constant 0 : index
    %c0_46 = arith.constant 0 : index
    %48 = vector.load %arg3[%c0_44, %c0_45, %c0_46] : memref<1x8x256xbf16, #tpu.memory_space<vmem>>, vector<1x8x16xbf16>
    %49 = vector.shape_cast %48 : vector<1x8x16xbf16> to vector<8x16xbf16>
    %50 = arith.extf %49 : vector<8x16xbf16> to vector<8x16xf32>
    %c48_47 = arith.constant 48 : index
    %c240 = arith.constant 240 : index
    %51 = vector.load %arg10[%c48_47, %c240] : memref<216x256xf32, #tpu.memory_space<vmem>>, vector<8x16xf32>
    tpu.vector_store %arg10[%c48_47, %c240], %50 {strides = array<i32>} : memref<216x256xf32, #tpu.memory_space<vmem>>, vector<8x16xf32>,
    %c0_48 = arith.constant 0 : index
    %c0_49 = arith.constant 0 : index
    %c17 = arith.constant 17 : index
    %52 = vector.load %arg2[%c0_48, %c0_49, %c17] : memref<1x8x256xbf16, #tpu.memory_space<vmem>>, vector<1x8x239xbf16>
    %53 = vector.shape_cast %52 : vector<1x8x239xbf16> to vector<8x239xbf16>
    %54 = arith.extf %53 : vector<8x239xbf16> to vector<8x239xf32>
    %c56 = arith.constant 56 : index
    %c0_50 = arith.constant 0 : index
    %55 = vector.load %arg10[%c56, %c0_50] : memref<216x256xf32, #tpu.memory_space<vmem>>, vector<8x239xf32>
    tpu.vector_store %arg10[%c56, %c0_50], %54 {strides = array<i32>} : memref<216x256xf32, #tpu.memory_space<vmem>>, vector<8x239xf32>,
    %c0_51 = arith.constant 0 : index
    %c0_52 = arith.constant 0 : index
    %c0_53 = arith.constant 0 : index
    %56 = vector.load %arg3[%c0_51, %c0_52, %c0_53] : memref<1x8x256xbf16, #tpu.memory_space<vmem>>, vector<1x8x17xbf16>
    %57 = vector.shape_cast %56 : vector<1x8x17xbf16> to vector<8x17xbf16>
    %58 = arith.extf %57 : vector<8x17xbf16> to vector<8x17xf32>
    %c56_54 = arith.constant 56 : index
    %c239 = arith.constant 239 : index
    %59 = vector.load %arg10[%c56_54, %c239] : memref<216x256xf32, #tpu.memory_space<vmem>>, vector<8x17xf32>
    tpu.vector_store %arg10[%c56_54, %c239], %58 {strides = array<i32>} : memref<216x256xf32, #tpu.memory_space<vmem>>, vector<8x17xf32>,
    %c0_55 = arith.constant 0 : index
    %c0_56 = arith.constant 0 : index
    %c18 = arith.constant 18 : index
    %60 = vector.load %arg2[%c0_55, %c0_56, %c18] : memref<1x8x256xbf16, #tpu.memory_space<vmem>>, vector<1x8x238xbf16>
    %61 = vector.shape_cast %60 : vector<1x8x238xbf16> to vector<8x238xbf16>
    %62 = arith.extf %61 : vector<8x238xbf16> to vector<8x238xf32>
    %c64 = arith.constant 64 : index
    %c0_57 = arith.constant 0 : index
    %63 = vector.load %arg10[%c64, %c0_57] : memref<216x256xf32, #tpu.memory_space<vmem>>, vector<8x238xf32>
    tpu.vector_store %arg10[%c64, %c0_57], %62 {strides = array<i32>} : memref<216x256xf32, #tpu.memory_space<vmem>>, vector<8x238xf32>,
    %c0_58 = arith.constant 0 : index
    %c0_59 = arith.constant 0 : index
    %c0_60 = arith.constant 0 : index
    %64 = vector.load %arg3[%c0_58, %c0_59, %c0_60] : memref<1x8x256xbf16, #tpu.memory_space<vmem>>, vector<1x8x18xbf16>
    %65 = vector.shape_cast %64 : vector<1x8x18xbf16> to vector<8x18xbf16>
    %66 = arith.extf %65 : vector<8x18xbf16> to vector<8x18xf32>
    %c64_61 = arith.constant 64 : index
    %c238 = arith.constant 238 : index
    %67 = vector.load %arg10[%c64_61, %c238] : memref<216x256xf32, #tpu.memory_space<vmem>>, vector<8x18xf32>
    tpu.vector_store %arg10[%c64_61, %c238], %66 {strides = array<i32>} : memref<216x256xf32, #tpu.memory_space<vmem>>, vector<8x18xf32>,
    %c0_62 = arith.constant 0 : index
    %c0_63 = arith.constant 0 : index
    %c64_64 = arith.constant 64 : index
    %68 = vector.load %arg2[%c0_62, %c0_63, %c64_64] : memref<1x8x256xbf16, #tpu.memory_space<vmem>>, vector<1x8x192xbf16>
    %69 = vector.shape_cast %68 : vector<1x8x192xbf16> to vector<8x192xbf16>
    %70 = arith.extf %69 : vector<8x192xbf16> to vector<8x192xf32>
    %c72 = arith.constant 72 : index
    %c0_65 = arith.constant 0 : index
    %71 = vector.load %arg10[%c72, %c0_65] : memref<216x256xf32, #tpu.memory_space<vmem>>, vector<8x192xf32>
    tpu.vector_store %arg10[%c72, %c0_65], %70 {strides = array<i32>} : memref<216x256xf32, #tpu.memory_space<vmem>>, vector<8x192xf32>,
    %c0_66 = arith.constant 0 : index
    %c0_67 = arith.constant 0 : index
    %c0_68 = arith.constant 0 : index
    %72 = vector.load %arg3[%c0_66, %c0_67, %c0_68] : memref<1x8x256xbf16, #tpu.memory_space<vmem>>, vector<1x8x64xbf16>
    %73 = vector.shape_cast %72 : vector<1x8x64xbf16> to vector<8x64xbf16>
    %74 = arith.extf %73 : vector<8x64xbf16> to vector<8x64xf32>
    %c72_69 = arith.constant 72 : index
    %c192 = arith.constant 192 : index
    %75 = vector.load %arg10[%c72_69, %c192] : memref<216x256xf32, #tpu.memory_space<vmem>>, vector<8x64xf32>
    tpu.vector_store %arg10[%c72_69, %c192], %74 {strides = array<i32>} : memref<216x256xf32, #tpu.memory_space<vmem>>, vector<8x64xf32>,
    %c0_70 = arith.constant 0 : index
    %c0_71 = arith.constant 0 : index
    %c65 = arith.constant 65 : index
    %76 = vector.load %arg2[%c0_70, %c0_71, %c65] : memref<1x8x256xbf16, #tpu.memory_space<vmem>>, vector<1x8x191xbf16>
    %77 = vector.shape_cast %76 : vector<1x8x191xbf16> to vector<8x191xbf16>
    %78 = arith.extf %77 : vector<8x191xbf16> to vector<8x191xf32>
    %c80 = arith.constant 80 : index
    %c0_72 = arith.constant 0 : index
    %79 = vector.load %arg10[%c80, %c0_72] : memref<216x256xf32, #tpu.memory_space<vmem>>, vector<8x191xf32>
    tpu.vector_store %arg10[%c80, %c0_72], %78 {strides = array<i32>} : memref<216x256xf32, #tpu.memory_space<vmem>>, vector<8x191xf32>,
    %c0_73 = arith.constant 0 : index
    %c0_74 = arith.constant 0 : index
    %c0_75 = arith.constant 0 : index
    %80 = vector.load %arg3[%c0_73, %c0_74, %c0_75] : memref<1x8x256xbf16, #tpu.memory_space<vmem>>, vector<1x8x65xbf16>
    %81 = vector.shape_cast %80 : vector<1x8x65xbf16> to vector<8x65xbf16>
    %82 = arith.extf %81 : vector<8x65xbf16> to vector<8x65xf32>
    %c80_76 = arith.constant 80 : index
    %c191 = arith.constant 191 : index
    %83 = vector.load %arg10[%c80_76, %c191] : memref<216x256xf32, #tpu.memory_space<vmem>>, vector<8x65xf32>
    tpu.vector_store %arg10[%c80_76, %c191], %82 {strides = array<i32>} : memref<216x256xf32, #tpu.memory_space<vmem>>, vector<8x65xf32>,
    %c0_77 = arith.constant 0 : index
    %c0_78 = arith.constant 0 : index
    %c66 = arith.constant 66 : index
    %84 = vector.load %arg2[%c0_77, %c0_78, %c66] : memref<1x8x256xbf16, #tpu.memory_space<vmem>>, vector<1x8x190xbf16>
    %85 = vector.shape_cast %84 : vector<1x8x190xbf16> to vector<8x190xbf16>
    %86 = arith.extf %85 : vector<8x190xbf16> to vector<8x190xf32>
    %c88 = arith.constant 88 : index
    %c0_79 = arith.constant 0 : index
    %87 = vector.load %arg10[%c88, %c0_79] : memref<216x256xf32, #tpu.memory_space<vmem>>, vector<8x190xf32>
    tpu.vector_store %arg10[%c88, %c0_79], %86 {strides = array<i32>} : memref<216x256xf32, #tpu.memory_space<vmem>>, vector<8x190xf32>,
    %c0_80 = arith.constant 0 : index
    %c0_81 = arith.constant 0 : index
    %c0_82 = arith.constant 0 : index
    %88 = vector.load %arg3[%c0_80, %c0_81, %c0_82] : memref<1x8x256xbf16, #tpu.memory_space<vmem>>, vector<1x8x66xbf16>
    %89 = vector.shape_cast %88 : vector<1x8x66xbf16> to vector<8x66xbf16>
    %90 = arith.extf %89 : vector<8x66xbf16> to vector<8x66xf32>
    %c88_83 = arith.constant 88 : index
    %c190 = arith.constant 190 : index
    %91 = vector.load %arg10[%c88_83, %c190] : memref<216x256xf32, #tpu.memory_space<vmem>>, vector<8x66xf32>
    tpu.vector_store %arg10[%c88_83, %c190], %90 {strides = array<i32>} : memref<216x256xf32, #tpu.memory_space<vmem>>, vector<8x66xf32>,
    %c0_84 = arith.constant 0 : index
    %c0_85 = arith.constant 0 : index
    %c72_86 = arith.constant 72 : index
    %92 = vector.load %arg2[%c0_84, %c0_85, %c72_86] : memref<1x8x256xbf16, #tpu.memory_space<vmem>>, vector<1x8x184xbf16>
    %93 = vector.shape_cast %92 : vector<1x8x184xbf16> to vector<8x184xbf16>
    %94 = arith.extf %93 : vector<8x184xbf16> to vector<8x184xf32>
    %c96 = arith.constant 96 : index
    %c0_87 = arith.constant 0 : index
    %95 = vector.load %arg10[%c96, %c0_87] : memref<216x256xf32, #tpu.memory_space<vmem>>, vector<8x184xf32>
    tpu.vector_store %arg10[%c96, %c0_87], %94 {strides = array<i32>} : memref<216x256xf32, #tpu.memory_space<vmem>>, vector<8x184xf32>,
    %c0_88 = arith.constant 0 : index
    %c0_89 = arith.constant 0 : index
    %c0_90 = arith.constant 0 : index
    %96 = vector.load %arg3[%c0_88, %c0_89, %c0_90] : memref<1x8x256xbf16, #tpu.memory_space<vmem>>, vector<1x8x72xbf16>
    %97 = vector.shape_cast %96 : vector<1x8x72xbf16> to vector<8x72xbf16>
    %98 = arith.extf %97 : vector<8x72xbf16> to vector<8x72xf32>
    %c96_91 = arith.constant 96 : index
    %c184 = arith.constant 184 : index
    %99 = vector.load %arg10[%c96_91, %c184] : memref<216x256xf32, #tpu.memory_space<vmem>>, vector<8x72xf32>
    tpu.vector_store %arg10[%c96_91, %c184], %98 {strides = array<i32>} : memref<216x256xf32, #tpu.memory_space<vmem>>, vector<8x72xf32>,
    %c0_92 = arith.constant 0 : index
    %c0_93 = arith.constant 0 : index
    %c73 = arith.constant 73 : index
    %100 = vector.load %arg2[%c0_92, %c0_93, %c73] : memref<1x8x256xbf16, #tpu.memory_space<vmem>>, vector<1x8x183xbf16>
    %101 = vector.shape_cast %100 : vector<1x8x183xbf16> to vector<8x183xbf16>
    %102 = arith.extf %101 : vector<8x183xbf16> to vector<8x183xf32>
    %c104 = arith.constant 104 : index
    %c0_94 = arith.constant 0 : index
    %103 = vector.load %arg10[%c104, %c0_94] : memref<216x256xf32, #tpu.memory_space<vmem>>, vector<8x183xf32>
    tpu.vector_store %arg10[%c104, %c0_94], %102 {strides = array<i32>} : memref<216x256xf32, #tpu.memory_space<vmem>>, vector<8x183xf32>,
    %c0_95 = arith.constant 0 : index
    %c0_96 = arith.constant 0 : index
    %c0_97 = arith.constant 0 : index
    %104 = vector.load %arg3[%c0_95, %c0_96, %c0_97] : memref<1x8x256xbf16, #tpu.memory_space<vmem>>, vector<1x8x73xbf16>
    %105 = vector.shape_cast %104 : vector<1x8x73xbf16> to vector<8x73xbf16>
    %106 = arith.extf %105 : vector<8x73xbf16> to vector<8x73xf32>
    %c104_98 = arith.constant 104 : index
    %c183 = arith.constant 183 : index
    %107 = vector.load %arg10[%c104_98, %c183] : memref<216x256xf32, #tpu.memory_space<vmem>>, vector<8x73xf32>
    tpu.vector_store %arg10[%c104_98, %c183], %106 {strides = array<i32>} : memref<216x256xf32, #tpu.memory_space<vmem>>, vector<8x73xf32>,
    %c0_99 = arith.constant 0 : index
    %c0_100 = arith.constant 0 : index
    %c74 = arith.constant 74 : index
    %108 = vector.load %arg2[%c0_99, %c0_100, %c74] : memref<1x8x256xbf16, #tpu.memory_space<vmem>>, vector<1x8x182xbf16>
    %109 = vector.shape_cast %108 : vector<1x8x182xbf16> to vector<8x182xbf16>
    %110 = arith.extf %109 : vector<8x182xbf16> to vector<8x182xf32>
    %c112 = arith.constant 112 : index
    %c0_101 = arith.constant 0 : index
    %111 = vector.load %arg10[%c112, %c0_101] : memref<216x256xf32, #tpu.memory_space<vmem>>, vector<8x182xf32>
    tpu.vector_store %arg10[%c112, %c0_101], %110 {strides = array<i32>} : memref<216x256xf32, #tpu.memory_space<vmem>>, vector<8x182xf32>,
    %c0_102 = arith.constant 0 : index
    %c0_103 = arith.constant 0 : index
    %c0_104 = arith.constant 0 : index
    %112 = vector.load %arg3[%c0_102, %c0_103, %c0_104] : memref<1x8x256xbf16, #tpu.memory_space<vmem>>, vector<1x8x74xbf16>
    %113 = vector.shape_cast %112 : vector<1x8x74xbf16> to vector<8x74xbf16>
    %114 = arith.extf %113 : vector<8x74xbf16> to vector<8x74xf32>
    %c112_105 = arith.constant 112 : index
    %c182 = arith.constant 182 : index
    %115 = vector.load %arg10[%c112_105, %c182] : memref<216x256xf32, #tpu.memory_space<vmem>>, vector<8x74xf32>
    tpu.vector_store %arg10[%c112_105, %c182], %114 {strides = array<i32>} : memref<216x256xf32, #tpu.memory_space<vmem>>, vector<8x74xf32>,
    %c0_106 = arith.constant 0 : index
    %c0_107 = arith.constant 0 : index
    %c80_108 = arith.constant 80 : index
    %116 = vector.load %arg2[%c0_106, %c0_107, %c80_108] : memref<1x8x256xbf16, #tpu.memory_space<vmem>>, vector<1x8x176xbf16>
    %117 = vector.shape_cast %116 : vector<1x8x176xbf16> to vector<8x176xbf16>
    %118 = arith.extf %117 : vector<8x176xbf16> to vector<8x176xf32>
    %c120 = arith.constant 120 : index
    %c0_109 = arith.constant 0 : index
    %119 = vector.load %arg10[%c120, %c0_109] : memref<216x256xf32, #tpu.memory_space<vmem>>, vector<8x176xf32>
    tpu.vector_store %arg10[%c120, %c0_109], %118 {strides = array<i32>} : memref<216x256xf32, #tpu.memory_space<vmem>>, vector<8x176xf32>,
    %c0_110 = arith.constant 0 : index
    %c0_111 = arith.constant 0 : index
    %c0_112 = arith.constant 0 : index
    %120 = vector.load %arg3[%c0_110, %c0_111, %c0_112] : memref<1x8x256xbf16, #tpu.memory_space<vmem>>, vector<1x8x80xbf16>
    %121 = vector.shape_cast %120 : vector<1x8x80xbf16> to vector<8x80xbf16>
    %122 = arith.extf %121 : vector<8x80xbf16> to vector<8x80xf32>
    %c120_113 = arith.constant 120 : index
    %c176 = arith.constant 176 : index
    %123 = vector.load %arg10[%c120_113, %c176] : memref<216x256xf32, #tpu.memory_space<vmem>>, vector<8x80xf32>
    tpu.vector_store %arg10[%c120_113, %c176], %122 {strides = array<i32>} : memref<216x256xf32, #tpu.memory_space<vmem>>, vector<8x80xf32>,
    %c0_114 = arith.constant 0 : index
    %c0_115 = arith.constant 0 : index
    %c81 = arith.constant 81 : index
    %124 = vector.load %arg2[%c0_114, %c0_115, %c81] : memref<1x8x256xbf16, #tpu.memory_space<vmem>>, vector<1x8x175xbf16>
    %125 = vector.shape_cast %124 : vector<1x8x175xbf16> to vector<8x175xbf16>
    %126 = arith.extf %125 : vector<8x175xbf16> to vector<8x175xf32>
    %c128 = arith.constant 128 : index
    %c0_116 = arith.constant 0 : index
    %127 = vector.load %arg10[%c128, %c0_116] : memref<216x256xf32, #tpu.memory_space<vmem>>, vector<8x175xf32>
    tpu.vector_store %arg10[%c128, %c0_116], %126 {strides = array<i32>} : memref<216x256xf32, #tpu.memory_space<vmem>>, vector<8x175xf32>,
    %c0_117 = arith.constant 0 : index
    %c0_118 = arith.constant 0 : index
    %c0_119 = arith.constant 0 : index
    %128 = vector.load %arg3[%c0_117, %c0_118, %c0_119] : memref<1x8x256xbf16, #tpu.memory_space<vmem>>, vector<1x8x81xbf16>
    %129 = vector.shape_cast %128 : vector<1x8x81xbf16> to vector<8x81xbf16>
    %130 = arith.extf %129 : vector<8x81xbf16> to vector<8x81xf32>
    %c128_120 = arith.constant 128 : index
    %c175 = arith.constant 175 : index
    %131 = vector.load %arg10[%c128_120, %c175] : memref<216x256xf32, #tpu.memory_space<vmem>>, vector<8x81xf32>
    tpu.vector_store %arg10[%c128_120, %c175], %130 {strides = array<i32>} : memref<216x256xf32, #tpu.memory_space<vmem>>, vector<8x81xf32>,
    %c0_121 = arith.constant 0 : index
    %c0_122 = arith.constant 0 : index
    %c82 = arith.constant 82 : index
    %132 = vector.load %arg2[%c0_121, %c0_122, %c82] : memref<1x8x256xbf16, #tpu.memory_space<vmem>>, vector<1x8x174xbf16>
    %133 = vector.shape_cast %132 : vector<1x8x174xbf16> to vector<8x174xbf16>
    %134 = arith.extf %133 : vector<8x174xbf16> to vector<8x174xf32>
    %c136 = arith.constant 136 : index
    %c0_123 = arith.constant 0 : index
    %135 = vector.load %arg10[%c136, %c0_123] : memref<216x256xf32, #tpu.memory_space<vmem>>, vector<8x174xf32>
    tpu.vector_store %arg10[%c136, %c0_123], %134 {strides = array<i32>} : memref<216x256xf32, #tpu.memory_space<vmem>>, vector<8x174xf32>,
    %c0_124 = arith.constant 0 : index
    %c0_125 = arith.constant 0 : index
    %c0_126 = arith.constant 0 : index
    %136 = vector.load %arg3[%c0_124, %c0_125, %c0_126] : memref<1x8x256xbf16, #tpu.memory_space<vmem>>, vector<1x8x82xbf16>
    %137 = vector.shape_cast %136 : vector<1x8x82xbf16> to vector<8x82xbf16>
    %138 = arith.extf %137 : vector<8x82xbf16> to vector<8x82xf32>
    %c136_127 = arith.constant 136 : index
    %c174 = arith.constant 174 : index
    %139 = vector.load %arg10[%c136_127, %c174] : memref<216x256xf32, #tpu.memory_space<vmem>>, vector<8x82xf32>
    tpu.vector_store %arg10[%c136_127, %c174], %138 {strides = array<i32>} : memref<216x256xf32, #tpu.memory_space<vmem>>, vector<8x82xf32>,
    %c0_128 = arith.constant 0 : index
    %c0_129 = arith.constant 0 : index
    %c128_130 = arith.constant 128 : index
    %140 = vector.load %arg2[%c0_128, %c0_129, %c128_130] : memref<1x8x256xbf16, #tpu.memory_space<vmem>>, vector<1x8x128xbf16>
    %141 = vector.shape_cast %140 : vector<1x8x128xbf16> to vector<8x128xbf16>
    %142 = arith.extf %141 : vector<8x128xbf16> to vector<8x128xf32>
    %c144 = arith.constant 144 : index
    %c0_131 = arith.constant 0 : index
    %143 = vector.load %arg10[%c144, %c0_131] : memref<216x256xf32, #tpu.memory_space<vmem>>, vector<8x128xf32>
    tpu.vector_store %arg10[%c144, %c0_131], %142 {strides = array<i32>} : memref<216x256xf32, #tpu.memory_space<vmem>>, vector<8x128xf32>,
    %c0_132 = arith.constant 0 : index
    %c0_133 = arith.constant 0 : index
    %c0_134 = arith.constant 0 : index
    %144 = vector.load %arg3[%c0_132, %c0_133, %c0_134] : memref<1x8x256xbf16, #tpu.memory_space<vmem>>, vector<1x8x128xbf16>
    %145 = vector.shape_cast %144 : vector<1x8x128xbf16> to vector<8x128xbf16>
    %146 = arith.extf %145 : vector<8x128xbf16> to vector<8x128xf32>
    %c144_135 = arith.constant 144 : index
    %c128_136 = arith.constant 128 : index
    %147 = vector.load %arg10[%c144_135, %c128_136] : memref<216x256xf32, #tpu.memory_space<vmem>>, vector<8x128xf32>
    tpu.vector_store %arg10[%c144_135, %c128_136], %146 {strides = array<i32>} : memref<216x256xf32, #tpu.memory_space<vmem>>, vector<8x128xf32>,
    %c0_137 = arith.constant 0 : index
    %c0_138 = arith.constant 0 : index
    %c129 = arith.constant 129 : index
    %148 = vector.load %arg2[%c0_137, %c0_138, %c129] : memref<1x8x256xbf16, #tpu.memory_space<vmem>>, vector<1x8x127xbf16>
    %149 = vector.shape_cast %148 : vector<1x8x127xbf16> to vector<8x127xbf16>
    %150 = arith.extf %149 : vector<8x127xbf16> to vector<8x127xf32>
    %c152 = arith.constant 152 : index
    %c0_139 = arith.constant 0 : index
    %151 = vector.load %arg10[%c152, %c0_139] : memref<216x256xf32, #tpu.memory_space<vmem>>, vector<8x127xf32>
    tpu.vector_store %arg10[%c152, %c0_139], %150 {strides = array<i32>} : memref<216x256xf32, #tpu.memory_space<vmem>>, vector<8x127xf32>,
    %c0_140 = arith.constant 0 : index
    %c0_141 = arith.constant 0 : index
    %c0_142 = arith.constant 0 : index
    %152 = vector.load %arg3[%c0_140, %c0_141, %c0_142] : memref<1x8x256xbf16, #tpu.memory_space<vmem>>, vector<1x8x129xbf16>
    %153 = vector.shape_cast %152 : vector<1x8x129xbf16> to vector<8x129xbf16>
    %154 = arith.extf %153 : vector<8x129xbf16> to vector<8x129xf32>
    %c152_143 = arith.constant 152 : index
    %c127 = arith.constant 127 : index
    %155 = vector.load %arg10[%c152_143, %c127] : memref<216x256xf32, #tpu.memory_space<vmem>>, vector<8x129xf32>
    tpu.vector_store %arg10[%c152_143, %c127], %154 {strides = array<i32>} : memref<216x256xf32, #tpu.memory_space<vmem>>, vector<8x129xf32>,
    %c0_144 = arith.constant 0 : index
    %c0_145 = arith.constant 0 : index
    %c130 = arith.constant 130 : index
    %156 = vector.load %arg2[%c0_144, %c0_145, %c130] : memref<1x8x256xbf16, #tpu.memory_space<vmem>>, vector<1x8x126xbf16>
    %157 = vector.shape_cast %156 : vector<1x8x126xbf16> to vector<8x126xbf16>
    %158 = arith.extf %157 : vector<8x126xbf16> to vector<8x126xf32>
    %c160 = arith.constant 160 : index
    %c0_146 = arith.constant 0 : index
    %159 = vector.load %arg10[%c160, %c0_146] : memref<216x256xf32, #tpu.memory_space<vmem>>, vector<8x126xf32>
    tpu.vector_store %arg10[%c160, %c0_146], %158 {strides = array<i32>} : memref<216x256xf32, #tpu.memory_space<vmem>>, vector<8x126xf32>,
    %c0_147 = arith.constant 0 : index
    %c0_148 = arith.constant 0 : index
    %c0_149 = arith.constant 0 : index
    %160 = vector.load %arg3[%c0_147, %c0_148, %c0_149] : memref<1x8x256xbf16, #tpu.memory_space<vmem>>, vector<1x8x130xbf16>
    %161 = vector.shape_cast %160 : vector<1x8x130xbf16> to vector<8x130xbf16>
    %162 = arith.extf %161 : vector<8x130xbf16> to vector<8x130xf32>
    %c160_150 = arith.constant 160 : index
    %c126 = arith.constant 126 : index
    %163 = vector.load %arg10[%c160_150, %c126] : memref<216x256xf32, #tpu.memory_space<vmem>>, vector<8x130xf32>
    tpu.vector_store %arg10[%c160_150, %c126], %162 {strides = array<i32>} : memref<216x256xf32, #tpu.memory_space<vmem>>, vector<8x130xf32>,
    %c0_151 = arith.constant 0 : index
    %c0_152 = arith.constant 0 : index
    %c136_153 = arith.constant 136 : index
    %164 = vector.load %arg2[%c0_151, %c0_152, %c136_153] : memref<1x8x256xbf16, #tpu.memory_space<vmem>>, vector<1x8x120xbf16>
    %165 = vector.shape_cast %164 : vector<1x8x120xbf16> to vector<8x120xbf16>
    %166 = arith.extf %165 : vector<8x120xbf16> to vector<8x120xf32>
    %c168 = arith.constant 168 : index
    %c0_154 = arith.constant 0 : index
    %167 = vector.load %arg10[%c168, %c0_154] : memref<216x256xf32, #tpu.memory_space<vmem>>, vector<8x120xf32>
    tpu.vector_store %arg10[%c168, %c0_154], %166 {strides = array<i32>} : memref<216x256xf32, #tpu.memory_space<vmem>>, vector<8x120xf32>,
    %c0_155 = arith.constant 0 : index
    %c0_156 = arith.constant 0 : index
    %c0_157 = arith.constant 0 : index
    %168 = vector.load %arg3[%c0_155, %c0_156, %c0_157] : memref<1x8x256xbf16, #tpu.memory_space<vmem>>, vector<1x8x136xbf16>
    %169 = vector.shape_cast %168 : vector<1x8x136xbf16> to vector<8x136xbf16>
    %170 = arith.extf %169 : vector<8x136xbf16> to vector<8x136xf32>
    %c168_158 = arith.constant 168 : index
    %c120_159 = arith.constant 120 : index
    %171 = vector.load %arg10[%c168_158, %c120_159] : memref<216x256xf32, #tpu.memory_space<vmem>>, vector<8x136xf32>
    tpu.vector_store %arg10[%c168_158, %c120_159], %170 {strides = array<i32>} : memref<216x256xf32, #tpu.memory_space<vmem>>, vector<8x136xf32>,
    %c0_160 = arith.constant 0 : index
    %c0_161 = arith.constant 0 : index
    %c137 = arith.constant 137 : index
    %172 = vector.load %arg2[%c0_160, %c0_161, %c137] : memref<1x8x256xbf16, #tpu.memory_space<vmem>>, vector<1x8x119xbf16>
    %173 = vector.shape_cast %172 : vector<1x8x119xbf16> to vector<8x119xbf16>
    %174 = arith.extf %173 : vector<8x119xbf16> to vector<8x119xf32>
    %c176_162 = arith.constant 176 : index
    %c0_163 = arith.constant 0 : index
    %175 = vector.load %arg10[%c176_162, %c0_163] : memref<216x256xf32, #tpu.memory_space<vmem>>, vector<8x119xf32>
    tpu.vector_store %arg10[%c176_162, %c0_163], %174 {strides = array<i32>} : memref<216x256xf32, #tpu.memory_space<vmem>>, vector<8x119xf32>,
    %c0_164 = arith.constant 0 : index
    %c0_165 = arith.constant 0 : index
    %c0_166 = arith.constant 0 : index
    %176 = vector.load %arg3[%c0_164, %c0_165, %c0_166] : memref<1x8x256xbf16, #tpu.memory_space<vmem>>, vector<1x8x137xbf16>
    %177 = vector.shape_cast %176 : vector<1x8x137xbf16> to vector<8x137xbf16>
    %178 = arith.extf %177 : vector<8x137xbf16> to vector<8x137xf32>
    %c176_167 = arith.constant 176 : index
    %c119 = arith.constant 119 : index
    %179 = vector.load %arg10[%c176_167, %c119] : memref<216x256xf32, #tpu.memory_space<vmem>>, vector<8x137xf32>
    tpu.vector_store %arg10[%c176_167, %c119], %178 {strides = array<i32>} : memref<216x256xf32, #tpu.memory_space<vmem>>, vector<8x137xf32>,
    %c0_168 = arith.constant 0 : index
    %c0_169 = arith.constant 0 : index
    %c138 = arith.constant 138 : index
    %180 = vector.load %arg2[%c0_168, %c0_169, %c138] : memref<1x8x256xbf16, #tpu.memory_space<vmem>>, vector<1x8x118xbf16>
    %181 = vector.shape_cast %180 : vector<1x8x118xbf16> to vector<8x118xbf16>
    %182 = arith.extf %181 : vector<8x118xbf16> to vector<8x118xf32>
    %c184_170 = arith.constant 184 : index
    %c0_171 = arith.constant 0 : index
    %183 = vector.load %arg10[%c184_170, %c0_171] : memref<216x256xf32, #tpu.memory_space<vmem>>, vector<8x118xf32>
    tpu.vector_store %arg10[%c184_170, %c0_171], %182 {strides = array<i32>} : memref<216x256xf32, #tpu.memory_space<vmem>>, vector<8x118xf32>,
    %c0_172 = arith.constant 0 : index
    %c0_173 = arith.constant 0 : index
    %c0_174 = arith.constant 0 : index
    %184 = vector.load %arg3[%c0_172, %c0_173, %c0_174] : memref<1x8x256xbf16, #tpu.memory_space<vmem>>, vector<1x8x138xbf16>
    %185 = vector.shape_cast %184 : vector<1x8x138xbf16> to vector<8x138xbf16>
    %186 = arith.extf %185 : vector<8x138xbf16> to vector<8x138xf32>
    %c184_175 = arith.constant 184 : index
    %c118 = arith.constant 118 : index
    %187 = vector.load %arg10[%c184_175, %c118] : memref<216x256xf32, #tpu.memory_space<vmem>>, vector<8x138xf32>
    tpu.vector_store %arg10[%c184_175, %c118], %186 {strides = array<i32>} : memref<216x256xf32, #tpu.memory_space<vmem>>, vector<8x138xf32>,
    %c0_176 = arith.constant 0 : index
    %c0_177 = arith.constant 0 : index
    %c144_178 = arith.constant 144 : index
    %188 = vector.load %arg2[%c0_176, %c0_177, %c144_178] : memref<1x8x256xbf16, #tpu.memory_space<vmem>>, vector<1x8x112xbf16>
    %189 = vector.shape_cast %188 : vector<1x8x112xbf16> to vector<8x112xbf16>
    %190 = arith.extf %189 : vector<8x112xbf16> to vector<8x112xf32>
    %c192_179 = arith.constant 192 : index
    %c0_180 = arith.constant 0 : index
    %191 = vector.load %arg10[%c192_179, %c0_180] : memref<216x256xf32, #tpu.memory_space<vmem>>, vector<8x112xf32>
    tpu.vector_store %arg10[%c192_179, %c0_180], %190 {strides = array<i32>} : memref<216x256xf32, #tpu.memory_space<vmem>>, vector<8x112xf32>,
    %c0_181 = arith.constant 0 : index
    %c0_182 = arith.constant 0 : index
    %c0_183 = arith.constant 0 : index
    %192 = vector.load %arg3[%c0_181, %c0_182, %c0_183] : memref<1x8x256xbf16, #tpu.memory_space<vmem>>, vector<1x8x144xbf16>
    %193 = vector.shape_cast %192 : vector<1x8x144xbf16> to vector<8x144xbf16>
    %194 = arith.extf %193 : vector<8x144xbf16> to vector<8x144xf32>
    %c192_184 = arith.constant 192 : index
    %c112_185 = arith.constant 112 : index
    %195 = vector.load %arg10[%c192_184, %c112_185] : memref<216x256xf32, #tpu.memory_space<vmem>>, vector<8x144xf32>
    tpu.vector_store %arg10[%c192_184, %c112_185], %194 {strides = array<i32>} : memref<216x256xf32, #tpu.memory_space<vmem>>, vector<8x144xf32>,
    %c0_186 = arith.constant 0 : index
    %c0_187 = arith.constant 0 : index
    %c145 = arith.constant 145 : index
    %196 = vector.load %arg2[%c0_186, %c0_187, %c145] : memref<1x8x256xbf16, #tpu.memory_space<vmem>>, vector<1x8x111xbf16>
    %197 = vector.shape_cast %196 : vector<1x8x111xbf16> to vector<8x111xbf16>
    %198 = arith.extf %197 : vector<8x111xbf16> to vector<8x111xf32>
    %c200 = arith.constant 200 : index
    %c0_188 = arith.constant 0 : index
    %199 = vector.load %arg10[%c200, %c0_188] : memref<216x256xf32, #tpu.memory_space<vmem>>, vector<8x111xf32>
    tpu.vector_store %arg10[%c200, %c0_188], %198 {strides = array<i32>} : memref<216x256xf32, #tpu.memory_space<vmem>>, vector<8x111xf32>,
    %c0_189 = arith.constant 0 : index
    %c0_190 = arith.constant 0 : index
    %c0_191 = arith.constant 0 : index
    %200 = vector.load %arg3[%c0_189, %c0_190, %c0_191] : memref<1x8x256xbf16, #tpu.memory_space<vmem>>, vector<1x8x145xbf16>
    %201 = vector.shape_cast %200 : vector<1x8x145xbf16> to vector<8x145xbf16>
    %202 = arith.extf %201 : vector<8x145xbf16> to vector<8x145xf32>
    %c200_192 = arith.constant 200 : index
    %c111 = arith.constant 111 : index
    %203 = vector.load %arg10[%c200_192, %c111] : memref<216x256xf32, #tpu.memory_space<vmem>>, vector<8x145xf32>
    tpu.vector_store %arg10[%c200_192, %c111], %202 {strides = array<i32>} : memref<216x256xf32, #tpu.memory_space<vmem>>, vector<8x145xf32>,
    %c0_193 = arith.constant 0 : index
    %c0_194 = arith.constant 0 : index
    %c146 = arith.constant 146 : index
    %204 = vector.load %arg2[%c0_193, %c0_194, %c146] : memref<1x8x256xbf16, #tpu.memory_space<vmem>>, vector<1x8x110xbf16>
    %205 = vector.shape_cast %204 : vector<1x8x110xbf16> to vector<8x110xbf16>
    %206 = arith.extf %205 : vector<8x110xbf16> to vector<8x110xf32>
    %c208 = arith.constant 208 : index
    %c0_195 = arith.constant 0 : index
    %207 = vector.load %arg10[%c208, %c0_195] : memref<216x256xf32, #tpu.memory_space<vmem>>, vector<8x110xf32>
    tpu.vector_store %arg10[%c208, %c0_195], %206 {strides = array<i32>} : memref<216x256xf32, #tpu.memory_space<vmem>>, vector<8x110xf32>,
    %c0_196 = arith.constant 0 : index
    %c0_197 = arith.constant 0 : index
    %c0_198 = arith.constant 0 : index
    %208 = vector.load %arg3[%c0_196, %c0_197, %c0_198] : memref<1x8x256xbf16, #tpu.memory_space<vmem>>, vector<1x8x146xbf16>
    %209 = vector.shape_cast %208 : vector<1x8x146xbf16> to vector<8x146xbf16>
    %210 = arith.extf %209 : vector<8x146xbf16> to vector<8x146xf32>
    %c208_199 = arith.constant 208 : index
    %c110 = arith.constant 110 : index
    %211 = vector.load %arg10[%c208_199, %c110] : memref<216x256xf32, #tpu.memory_space<vmem>>, vector<8x146xf32>
    tpu.vector_store %arg10[%c208_199, %c110], %210 {strides = array<i32>} : memref<216x256xf32, #tpu.memory_space<vmem>>, vector<8x146xf32>,
    %c0_200 = arith.constant 0 : index
    %c0_201 = arith.constant 0 : index
    %212 = vector.load %arg4[%c0_200, %c0_201] : memref<8x216xbf16, #tpu.memory_space<vmem>>, vector<8x216xbf16>
    %c0_202 = arith.constant 0 : index
    %c0_203 = arith.constant 0 : index
    %213 = vector.load %arg10[%c0_202, %c0_203] : memref<216x256xf32, #tpu.memory_space<vmem>>, vector<216x256xf32>
    %214 = arith.truncf %213 : vector<216x256xf32> to vector<216x256xbf16>
    %cst = arith.constant dense<0.000000e+00> : vector<8x256xf32>
    %215 = tpu.matmul %212, %214, %cst {dimension_numbers = #tpu.dot_dimension_numbers<[1], [0], [0], [1], [0, 0, 1, 1], [], []>} : vector<8x216xbf16>, vector<216x256xbf16>, vector<8x256xf32> -> vector<8x256xf32>
    %c0_204 = arith.constant 0 : index
    %c0_205 = arith.constant 0 : index
    %216 = vector.load %arg5[%c0_204, %c0_205] : memref<8x1xf32, #tpu.memory_space<vmem>>, vector<8x1xf32>
    %217 = vector.broadcast %216 : vector<8x1xf32> to vector<8x256xf32>
    %218 = arith.addf %215, %217 : vector<8x256xf32>
    %c0_206 = arith.constant 0 : index
    %c0_207 = arith.constant 0 : index
    %c0_208 = arith.constant 0 : index
    %219 = vector.load %arg7[%c0_206, %c0_207, %c0_208] : memref<1x8x256xf32, #tpu.memory_space<vmem>>, vector<1x8x256xf32>
    %220 = vector.shape_cast %219 : vector<1x8x256xf32> to vector<8x256xf32>
    %221 = vector.shape_cast %218 : vector<8x256xf32> to vector<1x8x256xf32>
    tpu.vector_store %arg7[%c0_206, %c0_207, %c0_208], %221 {strides = array<i32>} : memref<1x8x256xf32, #tpu.memory_space<vmem>>, vector<1x8x256xf32>,
    %c0_209 = arith.constant 0 : index
    %c0_210 = arith.constant 0 : index
    %222 = vector.load %arg6[%c0_209, %c0_210] : memref<1x256xf32, #tpu.memory_space<vmem>>, vector<1x256xf32>
    %223 = vector.broadcast %222 : vector<1x256xf32> to vector<8x256xf32>
    %224 = arith.mulf %218, %223 : vector<8x256xf32>
    %cst_211 = arith.constant dense<0.000000e+00> : vector<8xf32>
    %225 = vector.multi_reduction <add>, %224, %cst_211 [1] : vector<8x256xf32> to vector<8xf32>
    %226 = vector.shape_cast %225 : vector<8xf32> to vector<8x1xf32>
    %c0_212 = arith.constant 0 : index
    %c0_213 = arith.constant 0 : index
    %c0_214 = arith.constant 0 : index
    %c0_215 = arith.constant 0 : index
    %227 = vector.load %arg8[%c0_212, %c0_213, %c0_214, %c0_215] : memref<1x1x8x1xf32, #tpu.memory_space<vmem>>, vector<1x1x8x1xf32>
    %228 = vector.shape_cast %227 : vector<1x1x8x1xf32> to vector<8x1xf32>
    %229 = vector.shape_cast %226 : vector<8x1xf32> to vector<1x1x8x1xf32>
    tpu.vector_store %arg8[%c0_212, %c0_213, %c0_214, %c0_215], %229 {strides = array<i32>} : memref<1x1x8x1xf32, #tpu.memory_space<vmem>>, vector<1x1x8x1xf32>,
    %230 = arith.mulf %224, %218 : vector<8x256xf32>
    %cst_216 = arith.constant dense<0.000000e+00> : vector<8xf32>
    %231 = vector.multi_reduction <add>, %230, %cst_216 [1] : vector<8x256xf32> to vector<8xf32>
    %232 = vector.shape_cast %231 : vector<8xf32> to vector<8x1xf32>
    %c0_217 = arith.constant 0 : index
    %c0_218 = arith.constant 0 : index
    %c0_219 = arith.constant 0 : index
    %c0_220 = arith.constant 0 : index
    %233 = vector.load %arg9[%c0_217, %c0_218, %c0_219, %c0_220] : memref<1x1x8x1xf32, #tpu.memory_space<vmem>>, vector<1x1x8x1xf32>
    %234 = vector.shape_cast %233 : vector<1x1x8x1xf32> to vector<8x1xf32>
    %235 = vector.shape_cast %232 : vector<8x1xf32> to vector<1x1x8x1xf32>
    tpu.vector_store %arg9[%c0_217, %c0_218, %c0_219, %c0_220], %235 {strides = array<i32>} : memref<1x1x8x1xf32, #tpu.memory_space<vmem>>, vector<1x1x8x1xf32>,
    return
  }
  func.func @transform_0(%arg0: i32, %arg1: i32) -> (i32, i32, i32) {
    %c0_i32 = arith.constant 0 : i32
    %c0_i32_0 = arith.constant 0 : i32
    return %arg0, %c0_i32, %arg1 : i32, i32, i32
  }
  func.func @transform_1(%arg0: i32, %arg1: i32) -> (i32, i32, i32) {
    %c1_i32 = arith.constant 1 : i32
    %0 = arith.addi %arg1, %c1_i32 : i32
    %c1_i32_0 = arith.constant 1 : i32
    %1 = arith.minsi %0, %c1_i32_0 : i32
    %c0_i32 = arith.constant 0 : i32
    %c0_i32_1 = arith.constant 0 : i32
    return %arg0, %c0_i32, %1 : i32, i32, i32
  }
  func.func @transform_2(%arg0: i32, %arg1: i32) -> (i32, i32) {
    %c0_i32 = arith.constant 0 : i32
    %c0_i32_0 = arith.constant 0 : i32
    %c0_i32_1 = arith.constant 0 : i32
    return %c0_i32, %c0_i32_0 : i32, i32
  }
  func.func @transform_3(%arg0: i32, %arg1: i32) -> (i32, i32) {
    %c0_i32 = arith.constant 0 : i32
    %c0_i32_0 = arith.constant 0 : i32
    %c0_i32_1 = arith.constant 0 : i32
    return %c0_i32, %c0_i32_0 : i32, i32
  }
  func.func @transform_4(%arg0: i32, %arg1: i32) -> (i32, i32) {
    %c0_i32 = arith.constant 0 : i32
    %c0_i32_0 = arith.constant 0 : i32
    return %c0_i32, %arg1 : i32, i32
  }
  func.func @transform_5(%arg0: i32, %arg1: i32) -> (i32, i32, i32) {
    %c0_i32 = arith.constant 0 : i32
    %c0_i32_0 = arith.constant 0 : i32
    return %arg0, %c0_i32, %arg1 : i32, i32, i32
  }
  func.func @transform_6(%arg0: i32, %arg1: i32) -> (i32, i32, i32, i32) {
    %c0_i32 = arith.constant 0 : i32
    %c0_i32_0 = arith.constant 0 : i32
    %c0_i32_1 = arith.constant 0 : i32
    return %arg0, %arg1, %c0_i32, %c0_i32_0 : i32, i32, i32, i32
  }
  func.func @transform_7(%arg0: i32, %arg1: i32) -> (i32, i32, i32, i32) {
    %c0_i32 = arith.constant 0 : i32
    %c0_i32_0 = arith.constant 0 : i32
    %c0_i32_1 = arith.constant 0 : i32
    return %arg0, %arg1, %c0_i32, %c0_i32_0 : i32, i32, i32, i32
  }
}

module attributes {stable_mosaic.version = 11 : i64} {
  func.func @kernel(%arg0: i32, %arg1: i32, %arg2: memref<1x8x256xf32, #tpu.memory_space<vmem>>, %arg3: memref<1x8x256xf32, #tpu.memory_space<vmem>>, %arg4: memref<8x216xbf16, #tpu.memory_space<vmem>>, %arg5: memref<8x1xf32, #tpu.memory_space<vmem>>, %arg6: memref<8x1xf32, #tpu.memory_space<vmem>>, %arg7: memref<8x1xf32, #tpu.memory_space<vmem>>, %arg8: memref<1x256xf32, #tpu.memory_space<vmem>>, %arg9: memref<1x256xf32, #tpu.memory_space<vmem>>, %arg10: memref<1x256xf32, #tpu.memory_space<vmem>>, %arg11: memref<1x8x256xf32, #tpu.memory_space<vmem>>, %arg12: memref<1x1x8x1xf32, #tpu.memory_space<vmem>>, %arg13: memref<1x1x8x1xf32, #tpu.memory_space<vmem>>, %arg14: memref<216x256xf32, #tpu.memory_space<vmem>>, %arg15: memref<8x256xf32, #tpu.memory_space<vmem>>, %arg16: memref<8x256xf32, #tpu.memory_space<vmem>>) attributes {dimension_semantics = [#tpu.dimension_semantics<parallel>, #tpu.dimension_semantics<parallel>], iteration_bounds = array<i64: 2, 2>, scalar_prefetch = 0 : i64, scratch_operands = 3 : i64, tpu.core_type = #tpu.core_type<tc>, window_params = [{transform_indices = @transform_0, window_bounds = array<i64: 1, 8, 256>}, {transform_indices = @transform_1, window_bounds = array<i64: 1, 8, 256>}, {pipeline_mode = #tpu.pipeline_mode<synchronous>, transform_indices = @transform_2, window_bounds = array<i64: 8, 216>}, {pipeline_mode = #tpu.pipeline_mode<synchronous>, transform_indices = @transform_3, window_bounds = array<i64: 8, 1>}, {pipeline_mode = #tpu.pipeline_mode<synchronous>, transform_indices = @transform_4, window_bounds = array<i64: 8, 1>}, {pipeline_mode = #tpu.pipeline_mode<synchronous>, transform_indices = @transform_5, window_bounds = array<i64: 8, 1>}, {transform_indices = @transform_6, window_bounds = array<i64: 1, 256>}, {transform_indices = @transform_7, window_bounds = array<i64: 1, 256>}, {transform_indices = @transform_8, window_bounds = array<i64: 1, 256>}, {transform_indices = @transform_9, window_bounds = array<i64: 1, 8, 256>}, {transform_indices = @transform_10, window_bounds = array<i64: 1, 1, 8, 1>}, {transform_indices = @transform_11, window_bounds = array<i64: 1, 1, 8, 1>}]} {
    %c0 = arith.constant 0 : index
    %c0_0 = arith.constant 0 : index
    %0 = vector.load %arg6[%c0, %c0_0] : memref<8x1xf32, #tpu.memory_space<vmem>>, vector<8x1xf32>
    %c0_1 = arith.constant 0 : index
    %c0_2 = arith.constant 0 : index
    %c0_3 = arith.constant 0 : index
    %1 = vector.load %arg2[%c0_1, %c0_2, %c0_3] : memref<1x8x256xf32, #tpu.memory_space<vmem>>, vector<1x8x256xf32>
    %2 = vector.shape_cast %1 : vector<1x8x256xf32> to vector<8x256xf32>
    %3 = vector.broadcast %0 : vector<8x1xf32> to vector<8x256xf32>
    %4 = arith.mulf %3, %2 : vector<8x256xf32>
    %c0_4 = arith.constant 0 : index
    %c0_5 = arith.constant 0 : index
    %5 = vector.load %arg7[%c0_4, %c0_5] : memref<8x1xf32, #tpu.memory_space<vmem>>, vector<8x1xf32>
    %6 = vector.broadcast %5 : vector<8x1xf32> to vector<8x256xf32>
    %7 = arith.addf %4, %6 : vector<8x256xf32>
    %cst = arith.constant 0.000000e+00 : f32
    %8 = vector.broadcast %cst : f32 to vector<8x256xf32>
    %9 = arith.maximumf %7, %8 : vector<8x256xf32>
    %c0_6 = arith.constant 0 : index
    %c0_7 = arith.constant 0 : index
    %10 = vector.load %arg8[%c0_6, %c0_7] : memref<1x256xf32, #tpu.memory_space<vmem>>, vector<1x256xf32>
    %11 = vector.broadcast %10 : vector<1x256xf32> to vector<8x256xf32>
    %12 = arith.mulf %9, %11 : vector<8x256xf32>
    %c0_8 = arith.constant 0 : index
    %c0_9 = arith.constant 0 : index
    %13 = vector.load %arg15[%c0_8, %c0_9] : memref<8x256xf32, #tpu.memory_space<vmem>>, vector<8x256xf32>
    tpu.vector_store %arg15[%c0_8, %c0_9], %12 {strides = array<i32>} : memref<8x256xf32, #tpu.memory_space<vmem>>, vector<8x256xf32>,
    %c0_10 = arith.constant 0 : index
    %c0_11 = arith.constant 0 : index
    %14 = vector.load %arg6[%c0_10, %c0_11] : memref<8x1xf32, #tpu.memory_space<vmem>>, vector<8x1xf32>
    %c0_12 = arith.constant 0 : index
    %c0_13 = arith.constant 0 : index
    %c0_14 = arith.constant 0 : index
    %15 = vector.load %arg3[%c0_12, %c0_13, %c0_14] : memref<1x8x256xf32, #tpu.memory_space<vmem>>, vector<1x8x256xf32>
    %16 = vector.shape_cast %15 : vector<1x8x256xf32> to vector<8x256xf32>
    %17 = vector.broadcast %14 : vector<8x1xf32> to vector<8x256xf32>
    %18 = arith.mulf %17, %16 : vector<8x256xf32>
    %c0_15 = arith.constant 0 : index
    %c0_16 = arith.constant 0 : index
    %19 = vector.load %arg7[%c0_15, %c0_16] : memref<8x1xf32, #tpu.memory_space<vmem>>, vector<8x1xf32>
    %20 = vector.broadcast %19 : vector<8x1xf32> to vector<8x256xf32>
    %21 = arith.addf %18, %20 : vector<8x256xf32>
    %cst_17 = arith.constant 0.000000e+00 : f32
    %22 = vector.broadcast %cst_17 : f32 to vector<8x256xf32>
    %23 = arith.maximumf %21, %22 : vector<8x256xf32>
    %c0_18 = arith.constant 0 : index
    %c0_19 = arith.constant 0 : index
    %24 = vector.load %arg9[%c0_18, %c0_19] : memref<1x256xf32, #tpu.memory_space<vmem>>, vector<1x256xf32>
    %25 = vector.broadcast %24 : vector<1x256xf32> to vector<8x256xf32>
    %26 = arith.mulf %23, %25 : vector<8x256xf32>
    %c0_20 = arith.constant 0 : index
    %c0_21 = arith.constant 0 : index
    %27 = vector.load %arg16[%c0_20, %c0_21] : memref<8x256xf32, #tpu.memory_space<vmem>>, vector<8x256xf32>
    tpu.vector_store %arg16[%c0_20, %c0_21], %26 {strides = array<i32>} : memref<8x256xf32, #tpu.memory_space<vmem>>, vector<8x256xf32>,
    %c0_22 = arith.constant 0 : index
    %c0_23 = arith.constant 0 : index
    %28 = vector.load %arg15[%c0_22, %c0_23] : memref<8x256xf32, #tpu.memory_space<vmem>>, vector<8x256xf32>
    %c0_24 = arith.constant 0 : index
    %c0_25 = arith.constant 0 : index
    %29 = vector.load %arg14[%c0_24, %c0_25] : memref<216x256xf32, #tpu.memory_space<vmem>>, vector<8x256xf32>
    tpu.vector_store %arg14[%c0_24, %c0_25], %28 {strides = array<i32>} : memref<216x256xf32, #tpu.memory_space<vmem>>, vector<8x256xf32>,
    %c0_26 = arith.constant 0 : index
    %c1 = arith.constant 1 : index
    %30 = vector.load %arg15[%c0_26, %c1] : memref<8x256xf32, #tpu.memory_space<vmem>>, vector<8x255xf32>
    %c8 = arith.constant 8 : index
    %c0_27 = arith.constant 0 : index
    %31 = vector.load %arg14[%c8, %c0_27] : memref<216x256xf32, #tpu.memory_space<vmem>>, vector<8x255xf32>
    tpu.vector_store %arg14[%c8, %c0_27], %30 {strides = array<i32>} : memref<216x256xf32, #tpu.memory_space<vmem>>, vector<8x255xf32>,
    %c0_28 = arith.constant 0 : index
    %c0_29 = arith.constant 0 : index
    %32 = vector.load %arg16[%c0_28, %c0_29] : memref<8x256xf32, #tpu.memory_space<vmem>>, vector<8x1xf32>
    %c8_30 = arith.constant 8 : index
    %c255 = arith.constant 255 : index
    %33 = vector.load %arg14[%c8_30, %c255] : memref<216x256xf32, #tpu.memory_space<vmem>>, vector<8x1xf32>
    tpu.vector_store %arg14[%c8_30, %c255], %32 {strides = array<i32>} : memref<216x256xf32, #tpu.memory_space<vmem>>, vector<8x1xf32>,
    %c0_31 = arith.constant 0 : index
    %c2 = arith.constant 2 : index
    %34 = vector.load %arg15[%c0_31, %c2] : memref<8x256xf32, #tpu.memory_space<vmem>>, vector<8x254xf32>
    %c16 = arith.constant 16 : index
    %c0_32 = arith.constant 0 : index
    %35 = vector.load %arg14[%c16, %c0_32] : memref<216x256xf32, #tpu.memory_space<vmem>>, vector<8x254xf32>
    tpu.vector_store %arg14[%c16, %c0_32], %34 {strides = array<i32>} : memref<216x256xf32, #tpu.memory_space<vmem>>, vector<8x254xf32>,
    %c0_33 = arith.constant 0 : index
    %c0_34 = arith.constant 0 : index
    %36 = vector.load %arg16[%c0_33, %c0_34] : memref<8x256xf32, #tpu.memory_space<vmem>>, vector<8x2xf32>
    %c16_35 = arith.constant 16 : index
    %c254 = arith.constant 254 : index
    %37 = vector.load %arg14[%c16_35, %c254] : memref<216x256xf32, #tpu.memory_space<vmem>>, vector<8x2xf32>
    tpu.vector_store %arg14[%c16_35, %c254], %36 {strides = array<i32>} : memref<216x256xf32, #tpu.memory_space<vmem>>, vector<8x2xf32>,
    %c0_36 = arith.constant 0 : index
    %c8_37 = arith.constant 8 : index
    %38 = vector.load %arg15[%c0_36, %c8_37] : memref<8x256xf32, #tpu.memory_space<vmem>>, vector<8x248xf32>
    %c24 = arith.constant 24 : index
    %c0_38 = arith.constant 0 : index
    %39 = vector.load %arg14[%c24, %c0_38] : memref<216x256xf32, #tpu.memory_space<vmem>>, vector<8x248xf32>
    tpu.vector_store %arg14[%c24, %c0_38], %38 {strides = array<i32>} : memref<216x256xf32, #tpu.memory_space<vmem>>, vector<8x248xf32>,
    %c0_39 = arith.constant 0 : index
    %c0_40 = arith.constant 0 : index
    %40 = vector.load %arg16[%c0_39, %c0_40] : memref<8x256xf32, #tpu.memory_space<vmem>>, vector<8x8xf32>
    %c24_41 = arith.constant 24 : index
    %c248 = arith.constant 248 : index
    %41 = vector.load %arg14[%c24_41, %c248] : memref<216x256xf32, #tpu.memory_space<vmem>>, vector<8x8xf32>
    tpu.vector_store %arg14[%c24_41, %c248], %40 {strides = array<i32>} : memref<216x256xf32, #tpu.memory_space<vmem>>, vector<8x8xf32>,
    %c0_42 = arith.constant 0 : index
    %c9 = arith.constant 9 : index
    %42 = vector.load %arg15[%c0_42, %c9] : memref<8x256xf32, #tpu.memory_space<vmem>>, vector<8x247xf32>
    %c32 = arith.constant 32 : index
    %c0_43 = arith.constant 0 : index
    %43 = vector.load %arg14[%c32, %c0_43] : memref<216x256xf32, #tpu.memory_space<vmem>>, vector<8x247xf32>
    tpu.vector_store %arg14[%c32, %c0_43], %42 {strides = array<i32>} : memref<216x256xf32, #tpu.memory_space<vmem>>, vector<8x247xf32>,
    %c0_44 = arith.constant 0 : index
    %c0_45 = arith.constant 0 : index
    %44 = vector.load %arg16[%c0_44, %c0_45] : memref<8x256xf32, #tpu.memory_space<vmem>>, vector<8x9xf32>
    %c32_46 = arith.constant 32 : index
    %c247 = arith.constant 247 : index
    %45 = vector.load %arg14[%c32_46, %c247] : memref<216x256xf32, #tpu.memory_space<vmem>>, vector<8x9xf32>
    tpu.vector_store %arg14[%c32_46, %c247], %44 {strides = array<i32>} : memref<216x256xf32, #tpu.memory_space<vmem>>, vector<8x9xf32>,
    %c0_47 = arith.constant 0 : index
    %c10 = arith.constant 10 : index
    %46 = vector.load %arg15[%c0_47, %c10] : memref<8x256xf32, #tpu.memory_space<vmem>>, vector<8x246xf32>
    %c40 = arith.constant 40 : index
    %c0_48 = arith.constant 0 : index
    %47 = vector.load %arg14[%c40, %c0_48] : memref<216x256xf32, #tpu.memory_space<vmem>>, vector<8x246xf32>
    tpu.vector_store %arg14[%c40, %c0_48], %46 {strides = array<i32>} : memref<216x256xf32, #tpu.memory_space<vmem>>, vector<8x246xf32>,
    %c0_49 = arith.constant 0 : index
    %c0_50 = arith.constant 0 : index
    %48 = vector.load %arg16[%c0_49, %c0_50] : memref<8x256xf32, #tpu.memory_space<vmem>>, vector<8x10xf32>
    %c40_51 = arith.constant 40 : index
    %c246 = arith.constant 246 : index
    %49 = vector.load %arg14[%c40_51, %c246] : memref<216x256xf32, #tpu.memory_space<vmem>>, vector<8x10xf32>
    tpu.vector_store %arg14[%c40_51, %c246], %48 {strides = array<i32>} : memref<216x256xf32, #tpu.memory_space<vmem>>, vector<8x10xf32>,
    %c0_52 = arith.constant 0 : index
    %c16_53 = arith.constant 16 : index
    %50 = vector.load %arg15[%c0_52, %c16_53] : memref<8x256xf32, #tpu.memory_space<vmem>>, vector<8x240xf32>
    %c48 = arith.constant 48 : index
    %c0_54 = arith.constant 0 : index
    %51 = vector.load %arg14[%c48, %c0_54] : memref<216x256xf32, #tpu.memory_space<vmem>>, vector<8x240xf32>
    tpu.vector_store %arg14[%c48, %c0_54], %50 {strides = array<i32>} : memref<216x256xf32, #tpu.memory_space<vmem>>, vector<8x240xf32>,
    %c0_55 = arith.constant 0 : index
    %c0_56 = arith.constant 0 : index
    %52 = vector.load %arg16[%c0_55, %c0_56] : memref<8x256xf32, #tpu.memory_space<vmem>>, vector<8x16xf32>
    %c48_57 = arith.constant 48 : index
    %c240 = arith.constant 240 : index
    %53 = vector.load %arg14[%c48_57, %c240] : memref<216x256xf32, #tpu.memory_space<vmem>>, vector<8x16xf32>
    tpu.vector_store %arg14[%c48_57, %c240], %52 {strides = array<i32>} : memref<216x256xf32, #tpu.memory_space<vmem>>, vector<8x16xf32>,
    %c0_58 = arith.constant 0 : index
    %c17 = arith.constant 17 : index
    %54 = vector.load %arg15[%c0_58, %c17] : memref<8x256xf32, #tpu.memory_space<vmem>>, vector<8x239xf32>
    %c56 = arith.constant 56 : index
    %c0_59 = arith.constant 0 : index
    %55 = vector.load %arg14[%c56, %c0_59] : memref<216x256xf32, #tpu.memory_space<vmem>>, vector<8x239xf32>
    tpu.vector_store %arg14[%c56, %c0_59], %54 {strides = array<i32>} : memref<216x256xf32, #tpu.memory_space<vmem>>, vector<8x239xf32>,
    %c0_60 = arith.constant 0 : index
    %c0_61 = arith.constant 0 : index
    %56 = vector.load %arg16[%c0_60, %c0_61] : memref<8x256xf32, #tpu.memory_space<vmem>>, vector<8x17xf32>
    %c56_62 = arith.constant 56 : index
    %c239 = arith.constant 239 : index
    %57 = vector.load %arg14[%c56_62, %c239] : memref<216x256xf32, #tpu.memory_space<vmem>>, vector<8x17xf32>
    tpu.vector_store %arg14[%c56_62, %c239], %56 {strides = array<i32>} : memref<216x256xf32, #tpu.memory_space<vmem>>, vector<8x17xf32>,
    %c0_63 = arith.constant 0 : index
    %c18 = arith.constant 18 : index
    %58 = vector.load %arg15[%c0_63, %c18] : memref<8x256xf32, #tpu.memory_space<vmem>>, vector<8x238xf32>
    %c64 = arith.constant 64 : index
    %c0_64 = arith.constant 0 : index
    %59 = vector.load %arg14[%c64, %c0_64] : memref<216x256xf32, #tpu.memory_space<vmem>>, vector<8x238xf32>
    tpu.vector_store %arg14[%c64, %c0_64], %58 {strides = array<i32>} : memref<216x256xf32, #tpu.memory_space<vmem>>, vector<8x238xf32>,
    %c0_65 = arith.constant 0 : index
    %c0_66 = arith.constant 0 : index
    %60 = vector.load %arg16[%c0_65, %c0_66] : memref<8x256xf32, #tpu.memory_space<vmem>>, vector<8x18xf32>
    %c64_67 = arith.constant 64 : index
    %c238 = arith.constant 238 : index
    %61 = vector.load %arg14[%c64_67, %c238] : memref<216x256xf32, #tpu.memory_space<vmem>>, vector<8x18xf32>
    tpu.vector_store %arg14[%c64_67, %c238], %60 {strides = array<i32>} : memref<216x256xf32, #tpu.memory_space<vmem>>, vector<8x18xf32>,
    %c0_68 = arith.constant 0 : index
    %c64_69 = arith.constant 64 : index
    %62 = vector.load %arg15[%c0_68, %c64_69] : memref<8x256xf32, #tpu.memory_space<vmem>>, vector<8x192xf32>
    %c72 = arith.constant 72 : index
    %c0_70 = arith.constant 0 : index
    %63 = vector.load %arg14[%c72, %c0_70] : memref<216x256xf32, #tpu.memory_space<vmem>>, vector<8x192xf32>
    tpu.vector_store %arg14[%c72, %c0_70], %62 {strides = array<i32>} : memref<216x256xf32, #tpu.memory_space<vmem>>, vector<8x192xf32>,
    %c0_71 = arith.constant 0 : index
    %c0_72 = arith.constant 0 : index
    %64 = vector.load %arg16[%c0_71, %c0_72] : memref<8x256xf32, #tpu.memory_space<vmem>>, vector<8x64xf32>
    %c72_73 = arith.constant 72 : index
    %c192 = arith.constant 192 : index
    %65 = vector.load %arg14[%c72_73, %c192] : memref<216x256xf32, #tpu.memory_space<vmem>>, vector<8x64xf32>
    tpu.vector_store %arg14[%c72_73, %c192], %64 {strides = array<i32>} : memref<216x256xf32, #tpu.memory_space<vmem>>, vector<8x64xf32>,
    %c0_74 = arith.constant 0 : index
    %c65 = arith.constant 65 : index
    %66 = vector.load %arg15[%c0_74, %c65] : memref<8x256xf32, #tpu.memory_space<vmem>>, vector<8x191xf32>
    %c80 = arith.constant 80 : index
    %c0_75 = arith.constant 0 : index
    %67 = vector.load %arg14[%c80, %c0_75] : memref<216x256xf32, #tpu.memory_space<vmem>>, vector<8x191xf32>
    tpu.vector_store %arg14[%c80, %c0_75], %66 {strides = array<i32>} : memref<216x256xf32, #tpu.memory_space<vmem>>, vector<8x191xf32>,
    %c0_76 = arith.constant 0 : index
    %c0_77 = arith.constant 0 : index
    %68 = vector.load %arg16[%c0_76, %c0_77] : memref<8x256xf32, #tpu.memory_space<vmem>>, vector<8x65xf32>
    %c80_78 = arith.constant 80 : index
    %c191 = arith.constant 191 : index
    %69 = vector.load %arg14[%c80_78, %c191] : memref<216x256xf32, #tpu.memory_space<vmem>>, vector<8x65xf32>
    tpu.vector_store %arg14[%c80_78, %c191], %68 {strides = array<i32>} : memref<216x256xf32, #tpu.memory_space<vmem>>, vector<8x65xf32>,
    %c0_79 = arith.constant 0 : index
    %c66 = arith.constant 66 : index
    %70 = vector.load %arg15[%c0_79, %c66] : memref<8x256xf32, #tpu.memory_space<vmem>>, vector<8x190xf32>
    %c88 = arith.constant 88 : index
    %c0_80 = arith.constant 0 : index
    %71 = vector.load %arg14[%c88, %c0_80] : memref<216x256xf32, #tpu.memory_space<vmem>>, vector<8x190xf32>
    tpu.vector_store %arg14[%c88, %c0_80], %70 {strides = array<i32>} : memref<216x256xf32, #tpu.memory_space<vmem>>, vector<8x190xf32>,
    %c0_81 = arith.constant 0 : index
    %c0_82 = arith.constant 0 : index
    %72 = vector.load %arg16[%c0_81, %c0_82] : memref<8x256xf32, #tpu.memory_space<vmem>>, vector<8x66xf32>
    %c88_83 = arith.constant 88 : index
    %c190 = arith.constant 190 : index
    %73 = vector.load %arg14[%c88_83, %c190] : memref<216x256xf32, #tpu.memory_space<vmem>>, vector<8x66xf32>
    tpu.vector_store %arg14[%c88_83, %c190], %72 {strides = array<i32>} : memref<216x256xf32, #tpu.memory_space<vmem>>, vector<8x66xf32>,
    %c0_84 = arith.constant 0 : index
    %c72_85 = arith.constant 72 : index
    %74 = vector.load %arg15[%c0_84, %c72_85] : memref<8x256xf32, #tpu.memory_space<vmem>>, vector<8x184xf32>
    %c96 = arith.constant 96 : index
    %c0_86 = arith.constant 0 : index
    %75 = vector.load %arg14[%c96, %c0_86] : memref<216x256xf32, #tpu.memory_space<vmem>>, vector<8x184xf32>
    tpu.vector_store %arg14[%c96, %c0_86], %74 {strides = array<i32>} : memref<216x256xf32, #tpu.memory_space<vmem>>, vector<8x184xf32>,
    %c0_87 = arith.constant 0 : index
    %c0_88 = arith.constant 0 : index
    %76 = vector.load %arg16[%c0_87, %c0_88] : memref<8x256xf32, #tpu.memory_space<vmem>>, vector<8x72xf32>
    %c96_89 = arith.constant 96 : index
    %c184 = arith.constant 184 : index
    %77 = vector.load %arg14[%c96_89, %c184] : memref<216x256xf32, #tpu.memory_space<vmem>>, vector<8x72xf32>
    tpu.vector_store %arg14[%c96_89, %c184], %76 {strides = array<i32>} : memref<216x256xf32, #tpu.memory_space<vmem>>, vector<8x72xf32>,
    %c0_90 = arith.constant 0 : index
    %c73 = arith.constant 73 : index
    %78 = vector.load %arg15[%c0_90, %c73] : memref<8x256xf32, #tpu.memory_space<vmem>>, vector<8x183xf32>
    %c104 = arith.constant 104 : index
    %c0_91 = arith.constant 0 : index
    %79 = vector.load %arg14[%c104, %c0_91] : memref<216x256xf32, #tpu.memory_space<vmem>>, vector<8x183xf32>
    tpu.vector_store %arg14[%c104, %c0_91], %78 {strides = array<i32>} : memref<216x256xf32, #tpu.memory_space<vmem>>, vector<8x183xf32>,
    %c0_92 = arith.constant 0 : index
    %c0_93 = arith.constant 0 : index
    %80 = vector.load %arg16[%c0_92, %c0_93] : memref<8x256xf32, #tpu.memory_space<vmem>>, vector<8x73xf32>
    %c104_94 = arith.constant 104 : index
    %c183 = arith.constant 183 : index
    %81 = vector.load %arg14[%c104_94, %c183] : memref<216x256xf32, #tpu.memory_space<vmem>>, vector<8x73xf32>
    tpu.vector_store %arg14[%c104_94, %c183], %80 {strides = array<i32>} : memref<216x256xf32, #tpu.memory_space<vmem>>, vector<8x73xf32>,
    %c0_95 = arith.constant 0 : index
    %c74 = arith.constant 74 : index
    %82 = vector.load %arg15[%c0_95, %c74] : memref<8x256xf32, #tpu.memory_space<vmem>>, vector<8x182xf32>
    %c112 = arith.constant 112 : index
    %c0_96 = arith.constant 0 : index
    %83 = vector.load %arg14[%c112, %c0_96] : memref<216x256xf32, #tpu.memory_space<vmem>>, vector<8x182xf32>
    tpu.vector_store %arg14[%c112, %c0_96], %82 {strides = array<i32>} : memref<216x256xf32, #tpu.memory_space<vmem>>, vector<8x182xf32>,
    %c0_97 = arith.constant 0 : index
    %c0_98 = arith.constant 0 : index
    %84 = vector.load %arg16[%c0_97, %c0_98] : memref<8x256xf32, #tpu.memory_space<vmem>>, vector<8x74xf32>
    %c112_99 = arith.constant 112 : index
    %c182 = arith.constant 182 : index
    %85 = vector.load %arg14[%c112_99, %c182] : memref<216x256xf32, #tpu.memory_space<vmem>>, vector<8x74xf32>
    tpu.vector_store %arg14[%c112_99, %c182], %84 {strides = array<i32>} : memref<216x256xf32, #tpu.memory_space<vmem>>, vector<8x74xf32>,
    %c0_100 = arith.constant 0 : index
    %c80_101 = arith.constant 80 : index
    %86 = vector.load %arg15[%c0_100, %c80_101] : memref<8x256xf32, #tpu.memory_space<vmem>>, vector<8x176xf32>
    %c120 = arith.constant 120 : index
    %c0_102 = arith.constant 0 : index
    %87 = vector.load %arg14[%c120, %c0_102] : memref<216x256xf32, #tpu.memory_space<vmem>>, vector<8x176xf32>
    tpu.vector_store %arg14[%c120, %c0_102], %86 {strides = array<i32>} : memref<216x256xf32, #tpu.memory_space<vmem>>, vector<8x176xf32>,
    %c0_103 = arith.constant 0 : index
    %c0_104 = arith.constant 0 : index
    %88 = vector.load %arg16[%c0_103, %c0_104] : memref<8x256xf32, #tpu.memory_space<vmem>>, vector<8x80xf32>
    %c120_105 = arith.constant 120 : index
    %c176 = arith.constant 176 : index
    %89 = vector.load %arg14[%c120_105, %c176] : memref<216x256xf32, #tpu.memory_space<vmem>>, vector<8x80xf32>
    tpu.vector_store %arg14[%c120_105, %c176], %88 {strides = array<i32>} : memref<216x256xf32, #tpu.memory_space<vmem>>, vector<8x80xf32>,
    %c0_106 = arith.constant 0 : index
    %c81 = arith.constant 81 : index
    %90 = vector.load %arg15[%c0_106, %c81] : memref<8x256xf32, #tpu.memory_space<vmem>>, vector<8x175xf32>
    %c128 = arith.constant 128 : index
    %c0_107 = arith.constant 0 : index
    %91 = vector.load %arg14[%c128, %c0_107] : memref<216x256xf32, #tpu.memory_space<vmem>>, vector<8x175xf32>
    tpu.vector_store %arg14[%c128, %c0_107], %90 {strides = array<i32>} : memref<216x256xf32, #tpu.memory_space<vmem>>, vector<8x175xf32>,
    %c0_108 = arith.constant 0 : index
    %c0_109 = arith.constant 0 : index
    %92 = vector.load %arg16[%c0_108, %c0_109] : memref<8x256xf32, #tpu.memory_space<vmem>>, vector<8x81xf32>
    %c128_110 = arith.constant 128 : index
    %c175 = arith.constant 175 : index
    %93 = vector.load %arg14[%c128_110, %c175] : memref<216x256xf32, #tpu.memory_space<vmem>>, vector<8x81xf32>
    tpu.vector_store %arg14[%c128_110, %c175], %92 {strides = array<i32>} : memref<216x256xf32, #tpu.memory_space<vmem>>, vector<8x81xf32>,
    %c0_111 = arith.constant 0 : index
    %c82 = arith.constant 82 : index
    %94 = vector.load %arg15[%c0_111, %c82] : memref<8x256xf32, #tpu.memory_space<vmem>>, vector<8x174xf32>
    %c136 = arith.constant 136 : index
    %c0_112 = arith.constant 0 : index
    %95 = vector.load %arg14[%c136, %c0_112] : memref<216x256xf32, #tpu.memory_space<vmem>>, vector<8x174xf32>
    tpu.vector_store %arg14[%c136, %c0_112], %94 {strides = array<i32>} : memref<216x256xf32, #tpu.memory_space<vmem>>, vector<8x174xf32>,
    %c0_113 = arith.constant 0 : index
    %c0_114 = arith.constant 0 : index
    %96 = vector.load %arg16[%c0_113, %c0_114] : memref<8x256xf32, #tpu.memory_space<vmem>>, vector<8x82xf32>
    %c136_115 = arith.constant 136 : index
    %c174 = arith.constant 174 : index
    %97 = vector.load %arg14[%c136_115, %c174] : memref<216x256xf32, #tpu.memory_space<vmem>>, vector<8x82xf32>
    tpu.vector_store %arg14[%c136_115, %c174], %96 {strides = array<i32>} : memref<216x256xf32, #tpu.memory_space<vmem>>, vector<8x82xf32>,
    %c0_116 = arith.constant 0 : index
    %c128_117 = arith.constant 128 : index
    %98 = vector.load %arg15[%c0_116, %c128_117] : memref<8x256xf32, #tpu.memory_space<vmem>>, vector<8x128xf32>
    %c144 = arith.constant 144 : index
    %c0_118 = arith.constant 0 : index
    %99 = vector.load %arg14[%c144, %c0_118] : memref<216x256xf32, #tpu.memory_space<vmem>>, vector<8x128xf32>
    tpu.vector_store %arg14[%c144, %c0_118], %98 {strides = array<i32>} : memref<216x256xf32, #tpu.memory_space<vmem>>, vector<8x128xf32>,
    %c0_119 = arith.constant 0 : index
    %c0_120 = arith.constant 0 : index
    %100 = vector.load %arg16[%c0_119, %c0_120] : memref<8x256xf32, #tpu.memory_space<vmem>>, vector<8x128xf32>
    %c144_121 = arith.constant 144 : index
    %c128_122 = arith.constant 128 : index
    %101 = vector.load %arg14[%c144_121, %c128_122] : memref<216x256xf32, #tpu.memory_space<vmem>>, vector<8x128xf32>
    tpu.vector_store %arg14[%c144_121, %c128_122], %100 {strides = array<i32>} : memref<216x256xf32, #tpu.memory_space<vmem>>, vector<8x128xf32>,
    %c0_123 = arith.constant 0 : index
    %c129 = arith.constant 129 : index
    %102 = vector.load %arg15[%c0_123, %c129] : memref<8x256xf32, #tpu.memory_space<vmem>>, vector<8x127xf32>
    %c152 = arith.constant 152 : index
    %c0_124 = arith.constant 0 : index
    %103 = vector.load %arg14[%c152, %c0_124] : memref<216x256xf32, #tpu.memory_space<vmem>>, vector<8x127xf32>
    tpu.vector_store %arg14[%c152, %c0_124], %102 {strides = array<i32>} : memref<216x256xf32, #tpu.memory_space<vmem>>, vector<8x127xf32>,
    %c0_125 = arith.constant 0 : index
    %c0_126 = arith.constant 0 : index
    %104 = vector.load %arg16[%c0_125, %c0_126] : memref<8x256xf32, #tpu.memory_space<vmem>>, vector<8x129xf32>
    %c152_127 = arith.constant 152 : index
    %c127 = arith.constant 127 : index
    %105 = vector.load %arg14[%c152_127, %c127] : memref<216x256xf32, #tpu.memory_space<vmem>>, vector<8x129xf32>
    tpu.vector_store %arg14[%c152_127, %c127], %104 {strides = array<i32>} : memref<216x256xf32, #tpu.memory_space<vmem>>, vector<8x129xf32>,
    %c0_128 = arith.constant 0 : index
    %c130 = arith.constant 130 : index
    %106 = vector.load %arg15[%c0_128, %c130] : memref<8x256xf32, #tpu.memory_space<vmem>>, vector<8x126xf32>
    %c160 = arith.constant 160 : index
    %c0_129 = arith.constant 0 : index
    %107 = vector.load %arg14[%c160, %c0_129] : memref<216x256xf32, #tpu.memory_space<vmem>>, vector<8x126xf32>
    tpu.vector_store %arg14[%c160, %c0_129], %106 {strides = array<i32>} : memref<216x256xf32, #tpu.memory_space<vmem>>, vector<8x126xf32>,
    %c0_130 = arith.constant 0 : index
    %c0_131 = arith.constant 0 : index
    %108 = vector.load %arg16[%c0_130, %c0_131] : memref<8x256xf32, #tpu.memory_space<vmem>>, vector<8x130xf32>
    %c160_132 = arith.constant 160 : index
    %c126 = arith.constant 126 : index
    %109 = vector.load %arg14[%c160_132, %c126] : memref<216x256xf32, #tpu.memory_space<vmem>>, vector<8x130xf32>
    tpu.vector_store %arg14[%c160_132, %c126], %108 {strides = array<i32>} : memref<216x256xf32, #tpu.memory_space<vmem>>, vector<8x130xf32>,
    %c0_133 = arith.constant 0 : index
    %c136_134 = arith.constant 136 : index
    %110 = vector.load %arg15[%c0_133, %c136_134] : memref<8x256xf32, #tpu.memory_space<vmem>>, vector<8x120xf32>
    %c168 = arith.constant 168 : index
    %c0_135 = arith.constant 0 : index
    %111 = vector.load %arg14[%c168, %c0_135] : memref<216x256xf32, #tpu.memory_space<vmem>>, vector<8x120xf32>
    tpu.vector_store %arg14[%c168, %c0_135], %110 {strides = array<i32>} : memref<216x256xf32, #tpu.memory_space<vmem>>, vector<8x120xf32>,
    %c0_136 = arith.constant 0 : index
    %c0_137 = arith.constant 0 : index
    %112 = vector.load %arg16[%c0_136, %c0_137] : memref<8x256xf32, #tpu.memory_space<vmem>>, vector<8x136xf32>
    %c168_138 = arith.constant 168 : index
    %c120_139 = arith.constant 120 : index
    %113 = vector.load %arg14[%c168_138, %c120_139] : memref<216x256xf32, #tpu.memory_space<vmem>>, vector<8x136xf32>
    tpu.vector_store %arg14[%c168_138, %c120_139], %112 {strides = array<i32>} : memref<216x256xf32, #tpu.memory_space<vmem>>, vector<8x136xf32>,
    %c0_140 = arith.constant 0 : index
    %c137 = arith.constant 137 : index
    %114 = vector.load %arg15[%c0_140, %c137] : memref<8x256xf32, #tpu.memory_space<vmem>>, vector<8x119xf32>
    %c176_141 = arith.constant 176 : index
    %c0_142 = arith.constant 0 : index
    %115 = vector.load %arg14[%c176_141, %c0_142] : memref<216x256xf32, #tpu.memory_space<vmem>>, vector<8x119xf32>
    tpu.vector_store %arg14[%c176_141, %c0_142], %114 {strides = array<i32>} : memref<216x256xf32, #tpu.memory_space<vmem>>, vector<8x119xf32>,
    %c0_143 = arith.constant 0 : index
    %c0_144 = arith.constant 0 : index
    %116 = vector.load %arg16[%c0_143, %c0_144] : memref<8x256xf32, #tpu.memory_space<vmem>>, vector<8x137xf32>
    %c176_145 = arith.constant 176 : index
    %c119 = arith.constant 119 : index
    %117 = vector.load %arg14[%c176_145, %c119] : memref<216x256xf32, #tpu.memory_space<vmem>>, vector<8x137xf32>
    tpu.vector_store %arg14[%c176_145, %c119], %116 {strides = array<i32>} : memref<216x256xf32, #tpu.memory_space<vmem>>, vector<8x137xf32>,
    %c0_146 = arith.constant 0 : index
    %c138 = arith.constant 138 : index
    %118 = vector.load %arg15[%c0_146, %c138] : memref<8x256xf32, #tpu.memory_space<vmem>>, vector<8x118xf32>
    %c184_147 = arith.constant 184 : index
    %c0_148 = arith.constant 0 : index
    %119 = vector.load %arg14[%c184_147, %c0_148] : memref<216x256xf32, #tpu.memory_space<vmem>>, vector<8x118xf32>
    tpu.vector_store %arg14[%c184_147, %c0_148], %118 {strides = array<i32>} : memref<216x256xf32, #tpu.memory_space<vmem>>, vector<8x118xf32>,
    %c0_149 = arith.constant 0 : index
    %c0_150 = arith.constant 0 : index
    %120 = vector.load %arg16[%c0_149, %c0_150] : memref<8x256xf32, #tpu.memory_space<vmem>>, vector<8x138xf32>
    %c184_151 = arith.constant 184 : index
    %c118 = arith.constant 118 : index
    %121 = vector.load %arg14[%c184_151, %c118] : memref<216x256xf32, #tpu.memory_space<vmem>>, vector<8x138xf32>
    tpu.vector_store %arg14[%c184_151, %c118], %120 {strides = array<i32>} : memref<216x256xf32, #tpu.memory_space<vmem>>, vector<8x138xf32>,
    %c0_152 = arith.constant 0 : index
    %c144_153 = arith.constant 144 : index
    %122 = vector.load %arg15[%c0_152, %c144_153] : memref<8x256xf32, #tpu.memory_space<vmem>>, vector<8x112xf32>
    %c192_154 = arith.constant 192 : index
    %c0_155 = arith.constant 0 : index
    %123 = vector.load %arg14[%c192_154, %c0_155] : memref<216x256xf32, #tpu.memory_space<vmem>>, vector<8x112xf32>
    tpu.vector_store %arg14[%c192_154, %c0_155], %122 {strides = array<i32>} : memref<216x256xf32, #tpu.memory_space<vmem>>, vector<8x112xf32>,
    %c0_156 = arith.constant 0 : index
    %c0_157 = arith.constant 0 : index
    %124 = vector.load %arg16[%c0_156, %c0_157] : memref<8x256xf32, #tpu.memory_space<vmem>>, vector<8x144xf32>
    %c192_158 = arith.constant 192 : index
    %c112_159 = arith.constant 112 : index
    %125 = vector.load %arg14[%c192_158, %c112_159] : memref<216x256xf32, #tpu.memory_space<vmem>>, vector<8x144xf32>
    tpu.vector_store %arg14[%c192_158, %c112_159], %124 {strides = array<i32>} : memref<216x256xf32, #tpu.memory_space<vmem>>, vector<8x144xf32>,
    %c0_160 = arith.constant 0 : index
    %c145 = arith.constant 145 : index
    %126 = vector.load %arg15[%c0_160, %c145] : memref<8x256xf32, #tpu.memory_space<vmem>>, vector<8x111xf32>
    %c200 = arith.constant 200 : index
    %c0_161 = arith.constant 0 : index
    %127 = vector.load %arg14[%c200, %c0_161] : memref<216x256xf32, #tpu.memory_space<vmem>>, vector<8x111xf32>
    tpu.vector_store %arg14[%c200, %c0_161], %126 {strides = array<i32>} : memref<216x256xf32, #tpu.memory_space<vmem>>, vector<8x111xf32>,
    %c0_162 = arith.constant 0 : index
    %c0_163 = arith.constant 0 : index
    %128 = vector.load %arg16[%c0_162, %c0_163] : memref<8x256xf32, #tpu.memory_space<vmem>>, vector<8x145xf32>
    %c200_164 = arith.constant 200 : index
    %c111 = arith.constant 111 : index
    %129 = vector.load %arg14[%c200_164, %c111] : memref<216x256xf32, #tpu.memory_space<vmem>>, vector<8x145xf32>
    tpu.vector_store %arg14[%c200_164, %c111], %128 {strides = array<i32>} : memref<216x256xf32, #tpu.memory_space<vmem>>, vector<8x145xf32>,
    %c0_165 = arith.constant 0 : index
    %c146 = arith.constant 146 : index
    %130 = vector.load %arg15[%c0_165, %c146] : memref<8x256xf32, #tpu.memory_space<vmem>>, vector<8x110xf32>
    %c208 = arith.constant 208 : index
    %c0_166 = arith.constant 0 : index
    %131 = vector.load %arg14[%c208, %c0_166] : memref<216x256xf32, #tpu.memory_space<vmem>>, vector<8x110xf32>
    tpu.vector_store %arg14[%c208, %c0_166], %130 {strides = array<i32>} : memref<216x256xf32, #tpu.memory_space<vmem>>, vector<8x110xf32>,
    %c0_167 = arith.constant 0 : index
    %c0_168 = arith.constant 0 : index
    %132 = vector.load %arg16[%c0_167, %c0_168] : memref<8x256xf32, #tpu.memory_space<vmem>>, vector<8x146xf32>
    %c208_169 = arith.constant 208 : index
    %c110 = arith.constant 110 : index
    %133 = vector.load %arg14[%c208_169, %c110] : memref<216x256xf32, #tpu.memory_space<vmem>>, vector<8x146xf32>
    tpu.vector_store %arg14[%c208_169, %c110], %132 {strides = array<i32>} : memref<216x256xf32, #tpu.memory_space<vmem>>, vector<8x146xf32>,
    %c0_170 = arith.constant 0 : index
    %c0_171 = arith.constant 0 : index
    %134 = vector.load %arg4[%c0_170, %c0_171] : memref<8x216xbf16, #tpu.memory_space<vmem>>, vector<8x216xbf16>
    %c0_172 = arith.constant 0 : index
    %c0_173 = arith.constant 0 : index
    %135 = vector.load %arg14[%c0_172, %c0_173] : memref<216x256xf32, #tpu.memory_space<vmem>>, vector<216x256xf32>
    %136 = arith.truncf %135 : vector<216x256xf32> to vector<216x256xbf16>
    %cst_174 = arith.constant dense<0.000000e+00> : vector<8x256xf32>
    %137 = tpu.matmul %134, %136, %cst_174 {dimension_numbers = #tpu.dot_dimension_numbers<[1], [0], [0], [1], [0, 0, 1, 1], [], []>} : vector<8x216xbf16>, vector<216x256xbf16>, vector<8x256xf32> -> vector<8x256xf32>
    %c0_175 = arith.constant 0 : index
    %c0_176 = arith.constant 0 : index
    %138 = vector.load %arg5[%c0_175, %c0_176] : memref<8x1xf32, #tpu.memory_space<vmem>>, vector<8x1xf32>
    %139 = vector.broadcast %138 : vector<8x1xf32> to vector<8x256xf32>
    %140 = arith.addf %137, %139 : vector<8x256xf32>
    %c0_177 = arith.constant 0 : index
    %c0_178 = arith.constant 0 : index
    %c0_179 = arith.constant 0 : index
    %141 = vector.load %arg11[%c0_177, %c0_178, %c0_179] : memref<1x8x256xf32, #tpu.memory_space<vmem>>, vector<1x8x256xf32>
    %142 = vector.shape_cast %141 : vector<1x8x256xf32> to vector<8x256xf32>
    %143 = vector.shape_cast %140 : vector<8x256xf32> to vector<1x8x256xf32>
    tpu.vector_store %arg11[%c0_177, %c0_178, %c0_179], %143 {strides = array<i32>} : memref<1x8x256xf32, #tpu.memory_space<vmem>>, vector<1x8x256xf32>,
    %c0_180 = arith.constant 0 : index
    %c0_181 = arith.constant 0 : index
    %144 = vector.load %arg10[%c0_180, %c0_181] : memref<1x256xf32, #tpu.memory_space<vmem>>, vector<1x256xf32>
    %145 = vector.broadcast %144 : vector<1x256xf32> to vector<8x256xf32>
    %146 = arith.mulf %140, %145 : vector<8x256xf32>
    %cst_182 = arith.constant dense<0.000000e+00> : vector<8xf32>
    %147 = vector.multi_reduction <add>, %146, %cst_182 [1] : vector<8x256xf32> to vector<8xf32>
    %148 = vector.shape_cast %147 : vector<8xf32> to vector<8x1xf32>
    %c0_183 = arith.constant 0 : index
    %c0_184 = arith.constant 0 : index
    %c0_185 = arith.constant 0 : index
    %c0_186 = arith.constant 0 : index
    %149 = vector.load %arg12[%c0_183, %c0_184, %c0_185, %c0_186] : memref<1x1x8x1xf32, #tpu.memory_space<vmem>>, vector<1x1x8x1xf32>
    %150 = vector.shape_cast %149 : vector<1x1x8x1xf32> to vector<8x1xf32>
    %151 = vector.shape_cast %148 : vector<8x1xf32> to vector<1x1x8x1xf32>
    tpu.vector_store %arg12[%c0_183, %c0_184, %c0_185, %c0_186], %151 {strides = array<i32>} : memref<1x1x8x1xf32, #tpu.memory_space<vmem>>, vector<1x1x8x1xf32>,
    %152 = arith.mulf %146, %140 : vector<8x256xf32>
    %cst_187 = arith.constant dense<0.000000e+00> : vector<8xf32>
    %153 = vector.multi_reduction <add>, %152, %cst_187 [1] : vector<8x256xf32> to vector<8xf32>
    %154 = vector.shape_cast %153 : vector<8xf32> to vector<8x1xf32>
    %c0_188 = arith.constant 0 : index
    %c0_189 = arith.constant 0 : index
    %c0_190 = arith.constant 0 : index
    %c0_191 = arith.constant 0 : index
    %155 = vector.load %arg13[%c0_188, %c0_189, %c0_190, %c0_191] : memref<1x1x8x1xf32, #tpu.memory_space<vmem>>, vector<1x1x8x1xf32>
    %156 = vector.shape_cast %155 : vector<1x1x8x1xf32> to vector<8x1xf32>
    %157 = vector.shape_cast %154 : vector<8x1xf32> to vector<1x1x8x1xf32>
    tpu.vector_store %arg13[%c0_188, %c0_189, %c0_190, %c0_191], %157 {strides = array<i32>} : memref<1x1x8x1xf32, #tpu.memory_space<vmem>>, vector<1x1x8x1xf32>,
    return
  }
  func.func @transform_0(%arg0: i32, %arg1: i32) -> (i32, i32, i32) {
    %c0_i32 = arith.constant 0 : i32
    %c0_i32_0 = arith.constant 0 : i32
    return %arg0, %c0_i32, %arg1 : i32, i32, i32
  }
  func.func @transform_1(%arg0: i32, %arg1: i32) -> (i32, i32, i32) {
    %c1_i32 = arith.constant 1 : i32
    %0 = arith.addi %arg1, %c1_i32 : i32
    %c1_i32_0 = arith.constant 1 : i32
    %1 = arith.minsi %0, %c1_i32_0 : i32
    %c0_i32 = arith.constant 0 : i32
    %c0_i32_1 = arith.constant 0 : i32
    return %arg0, %c0_i32, %1 : i32, i32, i32
  }
  func.func @transform_2(%arg0: i32, %arg1: i32) -> (i32, i32) {
    %c0_i32 = arith.constant 0 : i32
    %c0_i32_0 = arith.constant 0 : i32
    %c0_i32_1 = arith.constant 0 : i32
    return %c0_i32, %c0_i32_0 : i32, i32
  }
  func.func @transform_3(%arg0: i32, %arg1: i32) -> (i32, i32) {
    %c0_i32 = arith.constant 0 : i32
    %c0_i32_0 = arith.constant 0 : i32
    %c0_i32_1 = arith.constant 0 : i32
    return %c0_i32, %c0_i32_0 : i32, i32
  }
  func.func @transform_4(%arg0: i32, %arg1: i32) -> (i32, i32) {
    %c0_i32 = arith.constant 0 : i32
    %c0_i32_0 = arith.constant 0 : i32
    %c0_i32_1 = arith.constant 0 : i32
    return %c0_i32, %c0_i32_0 : i32, i32
  }
  func.func @transform_5(%arg0: i32, %arg1: i32) -> (i32, i32) {
    %c0_i32 = arith.constant 0 : i32
    %c0_i32_0 = arith.constant 0 : i32
    %c0_i32_1 = arith.constant 0 : i32
    return %c0_i32, %c0_i32_0 : i32, i32
  }
  func.func @transform_6(%arg0: i32, %arg1: i32) -> (i32, i32) {
    %c0_i32 = arith.constant 0 : i32
    %c0_i32_0 = arith.constant 0 : i32
    return %c0_i32, %arg1 : i32, i32
  }
  func.func @transform_7(%arg0: i32, %arg1: i32) -> (i32, i32) {
    %c1_i32 = arith.constant 1 : i32
    %0 = arith.addi %arg1, %c1_i32 : i32
    %c1_i32_0 = arith.constant 1 : i32
    %1 = arith.minsi %0, %c1_i32_0 : i32
    %c0_i32 = arith.constant 0 : i32
    %c0_i32_1 = arith.constant 0 : i32
    return %c0_i32, %1 : i32, i32
  }
  func.func @transform_8(%arg0: i32, %arg1: i32) -> (i32, i32) {
    %c0_i32 = arith.constant 0 : i32
    %c0_i32_0 = arith.constant 0 : i32
    return %c0_i32, %arg1 : i32, i32
  }
  func.func @transform_9(%arg0: i32, %arg1: i32) -> (i32, i32, i32) {
    %c0_i32 = arith.constant 0 : i32
    %c0_i32_0 = arith.constant 0 : i32
    return %arg0, %c0_i32, %arg1 : i32, i32, i32
  }
  func.func @transform_10(%arg0: i32, %arg1: i32) -> (i32, i32, i32, i32) {
    %c0_i32 = arith.constant 0 : i32
    %c0_i32_0 = arith.constant 0 : i32
    %c0_i32_1 = arith.constant 0 : i32
    return %arg0, %arg1, %c0_i32, %c0_i32_0 : i32, i32, i32, i32
  }
  func.func @transform_11(%arg0: i32, %arg1: i32) -> (i32, i32, i32, i32) {
    %c0_i32 = arith.constant 0 : i32
    %c0_i32_0 = arith.constant 0 : i32
    %c0_i32_1 = arith.constant 0 : i32
    return %arg0, %arg1, %c0_i32, %c0_i32_0 : i32, i32, i32, i32
  }
}

module attributes {stable_mosaic.version = 11 : i64} {
  func.func @kernel(%arg0: i32, %arg1: i32, %arg2: memref<1x8x256xf32, #tpu.memory_space<vmem>>, %arg3: memref<1x8x256xf32, #tpu.memory_space<vmem>>, %arg4: memref<1x8x256xbf16, #tpu.memory_space<vmem>>, %arg5: memref<1x8x256xbf16, #tpu.memory_space<vmem>>, %arg6: memref<64x216xbf16, #tpu.memory_space<vmem>>, %arg7: memref<64x1xf32, #tpu.memory_space<vmem>>, %arg8: memref<8x1xf32, #tpu.memory_space<vmem>>, %arg9: memref<8x1xf32, #tpu.memory_space<vmem>>, %arg10: memref<1x256xf32, #tpu.memory_space<vmem>>, %arg11: memref<1x256xf32, #tpu.memory_space<vmem>>, %arg12: memref<8x8xbf16, #tpu.memory_space<vmem>>, %arg13: memref<1x64x256xf32, #tpu.memory_space<vmem>>, %arg14: memref<216x256xf32, #tpu.memory_space<vmem>>, %arg15: memref<8x256xf32, #tpu.memory_space<vmem>>, %arg16: memref<8x256xf32, #tpu.memory_space<vmem>>) attributes {dimension_semantics = [#tpu.dimension_semantics<parallel>, #tpu.dimension_semantics<parallel>], iteration_bounds = array<i64: 2, 2>, scalar_prefetch = 0 : i64, scratch_operands = 3 : i64, tpu.core_type = #tpu.core_type<tc>, window_params = [{transform_indices = @transform_0, window_bounds = array<i64: 1, 8, 256>}, {transform_indices = @transform_1, window_bounds = array<i64: 1, 8, 256>}, {transform_indices = @transform_2, window_bounds = array<i64: 1, 8, 256>}, {transform_indices = @transform_3, window_bounds = array<i64: 1, 8, 256>}, {pipeline_mode = #tpu.pipeline_mode<synchronous>, transform_indices = @transform_4, window_bounds = array<i64: 64, 216>}, {pipeline_mode = #tpu.pipeline_mode<synchronous>, transform_indices = @transform_5, window_bounds = array<i64: 64, 1>}, {pipeline_mode = #tpu.pipeline_mode<synchronous>, transform_indices = @transform_6, window_bounds = array<i64: 8, 1>}, {pipeline_mode = #tpu.pipeline_mode<synchronous>, transform_indices = @transform_7, window_bounds = array<i64: 8, 1>}, {transform_indices = @transform_8, window_bounds = array<i64: 1, 256>}, {transform_indices = @transform_9, window_bounds = array<i64: 1, 256>}, {pipeline_mode = #tpu.pipeline_mode<synchronous>, transform_indices = @transform_10, window_bounds = array<i64: 8, 8>}, {transform_indices = @transform_11, window_bounds = array<i64: 1, 64, 256>}]} {
    %c0 = arith.constant 0 : index
    %c0_0 = arith.constant 0 : index
    %0 = vector.load %arg12[%c0, %c0_0] : memref<8x8xbf16, #tpu.memory_space<vmem>>, vector<8x8xbf16>
    %c0_1 = arith.constant 0 : index
    %c0_2 = arith.constant 0 : index
    %c0_3 = arith.constant 0 : index
    %1 = vector.load %arg4[%c0_1, %c0_2, %c0_3] : memref<1x8x256xbf16, #tpu.memory_space<vmem>>, vector<1x8x256xbf16>
    %2 = vector.shape_cast %1 : vector<1x8x256xbf16> to vector<8x256xbf16>
    %cst = arith.constant dense<0.000000e+00> : vector<8x256xf32>
    %3 = tpu.matmul %0, %2, %cst {dimension_numbers = #tpu.dot_dimension_numbers<[1], [0], [0], [1], [0, 0, 1, 1], [], []>} : vector<8x8xbf16>, vector<8x256xbf16>, vector<8x256xf32> -> vector<8x256xf32>
    %c0_4 = arith.constant 0 : index
    %c0_5 = arith.constant 0 : index
    %4 = vector.load %arg12[%c0_4, %c0_5] : memref<8x8xbf16, #tpu.memory_space<vmem>>, vector<8x8xbf16>
    %c0_6 = arith.constant 0 : index
    %c0_7 = arith.constant 0 : index
    %c0_8 = arith.constant 0 : index
    %5 = vector.load %arg5[%c0_6, %c0_7, %c0_8] : memref<1x8x256xbf16, #tpu.memory_space<vmem>>, vector<1x8x256xbf16>
    %6 = vector.shape_cast %5 : vector<1x8x256xbf16> to vector<8x256xbf16>
    %cst_9 = arith.constant dense<0.000000e+00> : vector<8x256xf32>
    %7 = tpu.matmul %4, %6, %cst_9 {dimension_numbers = #tpu.dot_dimension_numbers<[1], [0], [0], [1], [0, 0, 1, 1], [], []>} : vector<8x8xbf16>, vector<8x256xbf16>, vector<8x256xf32> -> vector<8x256xf32>
    %c0_10 = arith.constant 0 : index
    %c0_11 = arith.constant 0 : index
    %8 = vector.load %arg8[%c0_10, %c0_11] : memref<8x1xf32, #tpu.memory_space<vmem>>, vector<8x1xf32>
    %c0_12 = arith.constant 0 : index
    %c0_13 = arith.constant 0 : index
    %c0_14 = arith.constant 0 : index
    %9 = vector.load %arg2[%c0_12, %c0_13, %c0_14] : memref<1x8x256xf32, #tpu.memory_space<vmem>>, vector<1x8x256xf32>
    %10 = vector.shape_cast %9 : vector<1x8x256xf32> to vector<8x256xf32>
    %11 = vector.broadcast %8 : vector<8x1xf32> to vector<8x256xf32>
    %12 = arith.mulf %11, %10 : vector<8x256xf32>
    %c0_15 = arith.constant 0 : index
    %c0_16 = arith.constant 0 : index
    %13 = vector.load %arg9[%c0_15, %c0_16] : memref<8x1xf32, #tpu.memory_space<vmem>>, vector<8x1xf32>
    %14 = vector.broadcast %13 : vector<8x1xf32> to vector<8x256xf32>
    %15 = arith.addf %12, %14 : vector<8x256xf32>
    %16 = arith.addf %15, %3 : vector<8x256xf32>
    %c0_17 = arith.constant 0 : index
    %c0_18 = arith.constant 0 : index
    %17 = vector.load %arg10[%c0_17, %c0_18] : memref<1x256xf32, #tpu.memory_space<vmem>>, vector<1x256xf32>
    %18 = vector.broadcast %17 : vector<1x256xf32> to vector<8x256xf32>
    %19 = arith.mulf %16, %18 : vector<8x256xf32>
    %c0_19 = arith.constant 0 : index
    %c0_20 = arith.constant 0 : index
    %20 = vector.load %arg15[%c0_19, %c0_20] : memref<8x256xf32, #tpu.memory_space<vmem>>, vector<8x256xf32>
    tpu.vector_store %arg15[%c0_19, %c0_20], %19 {strides = array<i32>} : memref<8x256xf32, #tpu.memory_space<vmem>>, vector<8x256xf32>,
    %c0_21 = arith.constant 0 : index
    %c0_22 = arith.constant 0 : index
    %21 = vector.load %arg8[%c0_21, %c0_22] : memref<8x1xf32, #tpu.memory_space<vmem>>, vector<8x1xf32>
    %c0_23 = arith.constant 0 : index
    %c0_24 = arith.constant 0 : index
    %c0_25 = arith.constant 0 : index
    %22 = vector.load %arg3[%c0_23, %c0_24, %c0_25] : memref<1x8x256xf32, #tpu.memory_space<vmem>>, vector<1x8x256xf32>
    %23 = vector.shape_cast %22 : vector<1x8x256xf32> to vector<8x256xf32>
    %24 = vector.broadcast %21 : vector<8x1xf32> to vector<8x256xf32>
    %25 = arith.mulf %24, %23 : vector<8x256xf32>
    %c0_26 = arith.constant 0 : index
    %c0_27 = arith.constant 0 : index
    %26 = vector.load %arg9[%c0_26, %c0_27] : memref<8x1xf32, #tpu.memory_space<vmem>>, vector<8x1xf32>
    %27 = vector.broadcast %26 : vector<8x1xf32> to vector<8x256xf32>
    %28 = arith.addf %25, %27 : vector<8x256xf32>
    %29 = arith.addf %28, %7 : vector<8x256xf32>
    %c0_28 = arith.constant 0 : index
    %c0_29 = arith.constant 0 : index
    %30 = vector.load %arg11[%c0_28, %c0_29] : memref<1x256xf32, #tpu.memory_space<vmem>>, vector<1x256xf32>
    %31 = vector.broadcast %30 : vector<1x256xf32> to vector<8x256xf32>
    %32 = arith.mulf %29, %31 : vector<8x256xf32>
    %c0_30 = arith.constant 0 : index
    %c0_31 = arith.constant 0 : index
    %33 = vector.load %arg16[%c0_30, %c0_31] : memref<8x256xf32, #tpu.memory_space<vmem>>, vector<8x256xf32>
    tpu.vector_store %arg16[%c0_30, %c0_31], %32 {strides = array<i32>} : memref<8x256xf32, #tpu.memory_space<vmem>>, vector<8x256xf32>,
    %c0_32 = arith.constant 0 : index
    %c0_33 = arith.constant 0 : index
    %34 = vector.load %arg15[%c0_32, %c0_33] : memref<8x256xf32, #tpu.memory_space<vmem>>, vector<8x256xf32>
    %c0_34 = arith.constant 0 : index
    %c0_35 = arith.constant 0 : index
    %35 = vector.load %arg14[%c0_34, %c0_35] : memref<216x256xf32, #tpu.memory_space<vmem>>, vector<8x256xf32>
    tpu.vector_store %arg14[%c0_34, %c0_35], %34 {strides = array<i32>} : memref<216x256xf32, #tpu.memory_space<vmem>>, vector<8x256xf32>,
    %c0_36 = arith.constant 0 : index
    %c1 = arith.constant 1 : index
    %36 = vector.load %arg15[%c0_36, %c1] : memref<8x256xf32, #tpu.memory_space<vmem>>, vector<8x255xf32>
    %c8 = arith.constant 8 : index
    %c0_37 = arith.constant 0 : index
    %37 = vector.load %arg14[%c8, %c0_37] : memref<216x256xf32, #tpu.memory_space<vmem>>, vector<8x255xf32>
    tpu.vector_store %arg14[%c8, %c0_37], %36 {strides = array<i32>} : memref<216x256xf32, #tpu.memory_space<vmem>>, vector<8x255xf32>,
    %c0_38 = arith.constant 0 : index
    %c0_39 = arith.constant 0 : index
    %38 = vector.load %arg16[%c0_38, %c0_39] : memref<8x256xf32, #tpu.memory_space<vmem>>, vector<8x1xf32>
    %c8_40 = arith.constant 8 : index
    %c255 = arith.constant 255 : index
    %39 = vector.load %arg14[%c8_40, %c255] : memref<216x256xf32, #tpu.memory_space<vmem>>, vector<8x1xf32>
    tpu.vector_store %arg14[%c8_40, %c255], %38 {strides = array<i32>} : memref<216x256xf32, #tpu.memory_space<vmem>>, vector<8x1xf32>,
    %c0_41 = arith.constant 0 : index
    %c2 = arith.constant 2 : index
    %40 = vector.load %arg15[%c0_41, %c2] : memref<8x256xf32, #tpu.memory_space<vmem>>, vector<8x254xf32>
    %c16 = arith.constant 16 : index
    %c0_42 = arith.constant 0 : index
    %41 = vector.load %arg14[%c16, %c0_42] : memref<216x256xf32, #tpu.memory_space<vmem>>, vector<8x254xf32>
    tpu.vector_store %arg14[%c16, %c0_42], %40 {strides = array<i32>} : memref<216x256xf32, #tpu.memory_space<vmem>>, vector<8x254xf32>,
    %c0_43 = arith.constant 0 : index
    %c0_44 = arith.constant 0 : index
    %42 = vector.load %arg16[%c0_43, %c0_44] : memref<8x256xf32, #tpu.memory_space<vmem>>, vector<8x2xf32>
    %c16_45 = arith.constant 16 : index
    %c254 = arith.constant 254 : index
    %43 = vector.load %arg14[%c16_45, %c254] : memref<216x256xf32, #tpu.memory_space<vmem>>, vector<8x2xf32>
    tpu.vector_store %arg14[%c16_45, %c254], %42 {strides = array<i32>} : memref<216x256xf32, #tpu.memory_space<vmem>>, vector<8x2xf32>,
    %c0_46 = arith.constant 0 : index
    %c8_47 = arith.constant 8 : index
    %44 = vector.load %arg15[%c0_46, %c8_47] : memref<8x256xf32, #tpu.memory_space<vmem>>, vector<8x248xf32>
    %c24 = arith.constant 24 : index
    %c0_48 = arith.constant 0 : index
    %45 = vector.load %arg14[%c24, %c0_48] : memref<216x256xf32, #tpu.memory_space<vmem>>, vector<8x248xf32>
    tpu.vector_store %arg14[%c24, %c0_48], %44 {strides = array<i32>} : memref<216x256xf32, #tpu.memory_space<vmem>>, vector<8x248xf32>,
    %c0_49 = arith.constant 0 : index
    %c0_50 = arith.constant 0 : index
    %46 = vector.load %arg16[%c0_49, %c0_50] : memref<8x256xf32, #tpu.memory_space<vmem>>, vector<8x8xf32>
    %c24_51 = arith.constant 24 : index
    %c248 = arith.constant 248 : index
    %47 = vector.load %arg14[%c24_51, %c248] : memref<216x256xf32, #tpu.memory_space<vmem>>, vector<8x8xf32>
    tpu.vector_store %arg14[%c24_51, %c248], %46 {strides = array<i32>} : memref<216x256xf32, #tpu.memory_space<vmem>>, vector<8x8xf32>,
    %c0_52 = arith.constant 0 : index
    %c9 = arith.constant 9 : index
    %48 = vector.load %arg15[%c0_52, %c9] : memref<8x256xf32, #tpu.memory_space<vmem>>, vector<8x247xf32>
    %c32 = arith.constant 32 : index
    %c0_53 = arith.constant 0 : index
    %49 = vector.load %arg14[%c32, %c0_53] : memref<216x256xf32, #tpu.memory_space<vmem>>, vector<8x247xf32>
    tpu.vector_store %arg14[%c32, %c0_53], %48 {strides = array<i32>} : memref<216x256xf32, #tpu.memory_space<vmem>>, vector<8x247xf32>,
    %c0_54 = arith.constant 0 : index
    %c0_55 = arith.constant 0 : index
    %50 = vector.load %arg16[%c0_54, %c0_55] : memref<8x256xf32, #tpu.memory_space<vmem>>, vector<8x9xf32>
    %c32_56 = arith.constant 32 : index
    %c247 = arith.constant 247 : index
    %51 = vector.load %arg14[%c32_56, %c247] : memref<216x256xf32, #tpu.memory_space<vmem>>, vector<8x9xf32>
    tpu.vector_store %arg14[%c32_56, %c247], %50 {strides = array<i32>} : memref<216x256xf32, #tpu.memory_space<vmem>>, vector<8x9xf32>,
    %c0_57 = arith.constant 0 : index
    %c10 = arith.constant 10 : index
    %52 = vector.load %arg15[%c0_57, %c10] : memref<8x256xf32, #tpu.memory_space<vmem>>, vector<8x246xf32>
    %c40 = arith.constant 40 : index
    %c0_58 = arith.constant 0 : index
    %53 = vector.load %arg14[%c40, %c0_58] : memref<216x256xf32, #tpu.memory_space<vmem>>, vector<8x246xf32>
    tpu.vector_store %arg14[%c40, %c0_58], %52 {strides = array<i32>} : memref<216x256xf32, #tpu.memory_space<vmem>>, vector<8x246xf32>,
    %c0_59 = arith.constant 0 : index
    %c0_60 = arith.constant 0 : index
    %54 = vector.load %arg16[%c0_59, %c0_60] : memref<8x256xf32, #tpu.memory_space<vmem>>, vector<8x10xf32>
    %c40_61 = arith.constant 40 : index
    %c246 = arith.constant 246 : index
    %55 = vector.load %arg14[%c40_61, %c246] : memref<216x256xf32, #tpu.memory_space<vmem>>, vector<8x10xf32>
    tpu.vector_store %arg14[%c40_61, %c246], %54 {strides = array<i32>} : memref<216x256xf32, #tpu.memory_space<vmem>>, vector<8x10xf32>,
    %c0_62 = arith.constant 0 : index
    %c16_63 = arith.constant 16 : index
    %56 = vector.load %arg15[%c0_62, %c16_63] : memref<8x256xf32, #tpu.memory_space<vmem>>, vector<8x240xf32>
    %c48 = arith.constant 48 : index
    %c0_64 = arith.constant 0 : index
    %57 = vector.load %arg14[%c48, %c0_64] : memref<216x256xf32, #tpu.memory_space<vmem>>, vector<8x240xf32>
    tpu.vector_store %arg14[%c48, %c0_64], %56 {strides = array<i32>} : memref<216x256xf32, #tpu.memory_space<vmem>>, vector<8x240xf32>,
    %c0_65 = arith.constant 0 : index
    %c0_66 = arith.constant 0 : index
    %58 = vector.load %arg16[%c0_65, %c0_66] : memref<8x256xf32, #tpu.memory_space<vmem>>, vector<8x16xf32>
    %c48_67 = arith.constant 48 : index
    %c240 = arith.constant 240 : index
    %59 = vector.load %arg14[%c48_67, %c240] : memref<216x256xf32, #tpu.memory_space<vmem>>, vector<8x16xf32>
    tpu.vector_store %arg14[%c48_67, %c240], %58 {strides = array<i32>} : memref<216x256xf32, #tpu.memory_space<vmem>>, vector<8x16xf32>,
    %c0_68 = arith.constant 0 : index
    %c17 = arith.constant 17 : index
    %60 = vector.load %arg15[%c0_68, %c17] : memref<8x256xf32, #tpu.memory_space<vmem>>, vector<8x239xf32>
    %c56 = arith.constant 56 : index
    %c0_69 = arith.constant 0 : index
    %61 = vector.load %arg14[%c56, %c0_69] : memref<216x256xf32, #tpu.memory_space<vmem>>, vector<8x239xf32>
    tpu.vector_store %arg14[%c56, %c0_69], %60 {strides = array<i32>} : memref<216x256xf32, #tpu.memory_space<vmem>>, vector<8x239xf32>,
    %c0_70 = arith.constant 0 : index
    %c0_71 = arith.constant 0 : index
    %62 = vector.load %arg16[%c0_70, %c0_71] : memref<8x256xf32, #tpu.memory_space<vmem>>, vector<8x17xf32>
    %c56_72 = arith.constant 56 : index
    %c239 = arith.constant 239 : index
    %63 = vector.load %arg14[%c56_72, %c239] : memref<216x256xf32, #tpu.memory_space<vmem>>, vector<8x17xf32>
    tpu.vector_store %arg14[%c56_72, %c239], %62 {strides = array<i32>} : memref<216x256xf32, #tpu.memory_space<vmem>>, vector<8x17xf32>,
    %c0_73 = arith.constant 0 : index
    %c18 = arith.constant 18 : index
    %64 = vector.load %arg15[%c0_73, %c18] : memref<8x256xf32, #tpu.memory_space<vmem>>, vector<8x238xf32>
    %c64 = arith.constant 64 : index
    %c0_74 = arith.constant 0 : index
    %65 = vector.load %arg14[%c64, %c0_74] : memref<216x256xf32, #tpu.memory_space<vmem>>, vector<8x238xf32>
    tpu.vector_store %arg14[%c64, %c0_74], %64 {strides = array<i32>} : memref<216x256xf32, #tpu.memory_space<vmem>>, vector<8x238xf32>,
    %c0_75 = arith.constant 0 : index
    %c0_76 = arith.constant 0 : index
    %66 = vector.load %arg16[%c0_75, %c0_76] : memref<8x256xf32, #tpu.memory_space<vmem>>, vector<8x18xf32>
    %c64_77 = arith.constant 64 : index
    %c238 = arith.constant 238 : index
    %67 = vector.load %arg14[%c64_77, %c238] : memref<216x256xf32, #tpu.memory_space<vmem>>, vector<8x18xf32>
    tpu.vector_store %arg14[%c64_77, %c238], %66 {strides = array<i32>} : memref<216x256xf32, #tpu.memory_space<vmem>>, vector<8x18xf32>,
    %c0_78 = arith.constant 0 : index
    %c64_79 = arith.constant 64 : index
    %68 = vector.load %arg15[%c0_78, %c64_79] : memref<8x256xf32, #tpu.memory_space<vmem>>, vector<8x192xf32>
    %c72 = arith.constant 72 : index
    %c0_80 = arith.constant 0 : index
    %69 = vector.load %arg14[%c72, %c0_80] : memref<216x256xf32, #tpu.memory_space<vmem>>, vector<8x192xf32>
    tpu.vector_store %arg14[%c72, %c0_80], %68 {strides = array<i32>} : memref<216x256xf32, #tpu.memory_space<vmem>>, vector<8x192xf32>,
    %c0_81 = arith.constant 0 : index
    %c0_82 = arith.constant 0 : index
    %70 = vector.load %arg16[%c0_81, %c0_82] : memref<8x256xf32, #tpu.memory_space<vmem>>, vector<8x64xf32>
    %c72_83 = arith.constant 72 : index
    %c192 = arith.constant 192 : index
    %71 = vector.load %arg14[%c72_83, %c192] : memref<216x256xf32, #tpu.memory_space<vmem>>, vector<8x64xf32>
    tpu.vector_store %arg14[%c72_83, %c192], %70 {strides = array<i32>} : memref<216x256xf32, #tpu.memory_space<vmem>>, vector<8x64xf32>,
    %c0_84 = arith.constant 0 : index
    %c65 = arith.constant 65 : index
    %72 = vector.load %arg15[%c0_84, %c65] : memref<8x256xf32, #tpu.memory_space<vmem>>, vector<8x191xf32>
    %c80 = arith.constant 80 : index
    %c0_85 = arith.constant 0 : index
    %73 = vector.load %arg14[%c80, %c0_85] : memref<216x256xf32, #tpu.memory_space<vmem>>, vector<8x191xf32>
    tpu.vector_store %arg14[%c80, %c0_85], %72 {strides = array<i32>} : memref<216x256xf32, #tpu.memory_space<vmem>>, vector<8x191xf32>,
    %c0_86 = arith.constant 0 : index
    %c0_87 = arith.constant 0 : index
    %74 = vector.load %arg16[%c0_86, %c0_87] : memref<8x256xf32, #tpu.memory_space<vmem>>, vector<8x65xf32>
    %c80_88 = arith.constant 80 : index
    %c191 = arith.constant 191 : index
    %75 = vector.load %arg14[%c80_88, %c191] : memref<216x256xf32, #tpu.memory_space<vmem>>, vector<8x65xf32>
    tpu.vector_store %arg14[%c80_88, %c191], %74 {strides = array<i32>} : memref<216x256xf32, #tpu.memory_space<vmem>>, vector<8x65xf32>,
    %c0_89 = arith.constant 0 : index
    %c66 = arith.constant 66 : index
    %76 = vector.load %arg15[%c0_89, %c66] : memref<8x256xf32, #tpu.memory_space<vmem>>, vector<8x190xf32>
    %c88 = arith.constant 88 : index
    %c0_90 = arith.constant 0 : index
    %77 = vector.load %arg14[%c88, %c0_90] : memref<216x256xf32, #tpu.memory_space<vmem>>, vector<8x190xf32>
    tpu.vector_store %arg14[%c88, %c0_90], %76 {strides = array<i32>} : memref<216x256xf32, #tpu.memory_space<vmem>>, vector<8x190xf32>,
    %c0_91 = arith.constant 0 : index
    %c0_92 = arith.constant 0 : index
    %78 = vector.load %arg16[%c0_91, %c0_92] : memref<8x256xf32, #tpu.memory_space<vmem>>, vector<8x66xf32>
    %c88_93 = arith.constant 88 : index
    %c190 = arith.constant 190 : index
    %79 = vector.load %arg14[%c88_93, %c190] : memref<216x256xf32, #tpu.memory_space<vmem>>, vector<8x66xf32>
    tpu.vector_store %arg14[%c88_93, %c190], %78 {strides = array<i32>} : memref<216x256xf32, #tpu.memory_space<vmem>>, vector<8x66xf32>,
    %c0_94 = arith.constant 0 : index
    %c72_95 = arith.constant 72 : index
    %80 = vector.load %arg15[%c0_94, %c72_95] : memref<8x256xf32, #tpu.memory_space<vmem>>, vector<8x184xf32>
    %c96 = arith.constant 96 : index
    %c0_96 = arith.constant 0 : index
    %81 = vector.load %arg14[%c96, %c0_96] : memref<216x256xf32, #tpu.memory_space<vmem>>, vector<8x184xf32>
    tpu.vector_store %arg14[%c96, %c0_96], %80 {strides = array<i32>} : memref<216x256xf32, #tpu.memory_space<vmem>>, vector<8x184xf32>,
    %c0_97 = arith.constant 0 : index
    %c0_98 = arith.constant 0 : index
    %82 = vector.load %arg16[%c0_97, %c0_98] : memref<8x256xf32, #tpu.memory_space<vmem>>, vector<8x72xf32>
    %c96_99 = arith.constant 96 : index
    %c184 = arith.constant 184 : index
    %83 = vector.load %arg14[%c96_99, %c184] : memref<216x256xf32, #tpu.memory_space<vmem>>, vector<8x72xf32>
    tpu.vector_store %arg14[%c96_99, %c184], %82 {strides = array<i32>} : memref<216x256xf32, #tpu.memory_space<vmem>>, vector<8x72xf32>,
    %c0_100 = arith.constant 0 : index
    %c73 = arith.constant 73 : index
    %84 = vector.load %arg15[%c0_100, %c73] : memref<8x256xf32, #tpu.memory_space<vmem>>, vector<8x183xf32>
    %c104 = arith.constant 104 : index
    %c0_101 = arith.constant 0 : index
    %85 = vector.load %arg14[%c104, %c0_101] : memref<216x256xf32, #tpu.memory_space<vmem>>, vector<8x183xf32>
    tpu.vector_store %arg14[%c104, %c0_101], %84 {strides = array<i32>} : memref<216x256xf32, #tpu.memory_space<vmem>>, vector<8x183xf32>,
    %c0_102 = arith.constant 0 : index
    %c0_103 = arith.constant 0 : index
    %86 = vector.load %arg16[%c0_102, %c0_103] : memref<8x256xf32, #tpu.memory_space<vmem>>, vector<8x73xf32>
    %c104_104 = arith.constant 104 : index
    %c183 = arith.constant 183 : index
    %87 = vector.load %arg14[%c104_104, %c183] : memref<216x256xf32, #tpu.memory_space<vmem>>, vector<8x73xf32>
    tpu.vector_store %arg14[%c104_104, %c183], %86 {strides = array<i32>} : memref<216x256xf32, #tpu.memory_space<vmem>>, vector<8x73xf32>,
    %c0_105 = arith.constant 0 : index
    %c74 = arith.constant 74 : index
    %88 = vector.load %arg15[%c0_105, %c74] : memref<8x256xf32, #tpu.memory_space<vmem>>, vector<8x182xf32>
    %c112 = arith.constant 112 : index
    %c0_106 = arith.constant 0 : index
    %89 = vector.load %arg14[%c112, %c0_106] : memref<216x256xf32, #tpu.memory_space<vmem>>, vector<8x182xf32>
    tpu.vector_store %arg14[%c112, %c0_106], %88 {strides = array<i32>} : memref<216x256xf32, #tpu.memory_space<vmem>>, vector<8x182xf32>,
    %c0_107 = arith.constant 0 : index
    %c0_108 = arith.constant 0 : index
    %90 = vector.load %arg16[%c0_107, %c0_108] : memref<8x256xf32, #tpu.memory_space<vmem>>, vector<8x74xf32>
    %c112_109 = arith.constant 112 : index
    %c182 = arith.constant 182 : index
    %91 = vector.load %arg14[%c112_109, %c182] : memref<216x256xf32, #tpu.memory_space<vmem>>, vector<8x74xf32>
    tpu.vector_store %arg14[%c112_109, %c182], %90 {strides = array<i32>} : memref<216x256xf32, #tpu.memory_space<vmem>>, vector<8x74xf32>,
    %c0_110 = arith.constant 0 : index
    %c80_111 = arith.constant 80 : index
    %92 = vector.load %arg15[%c0_110, %c80_111] : memref<8x256xf32, #tpu.memory_space<vmem>>, vector<8x176xf32>
    %c120 = arith.constant 120 : index
    %c0_112 = arith.constant 0 : index
    %93 = vector.load %arg14[%c120, %c0_112] : memref<216x256xf32, #tpu.memory_space<vmem>>, vector<8x176xf32>
    tpu.vector_store %arg14[%c120, %c0_112], %92 {strides = array<i32>} : memref<216x256xf32, #tpu.memory_space<vmem>>, vector<8x176xf32>,
    %c0_113 = arith.constant 0 : index
    %c0_114 = arith.constant 0 : index
    %94 = vector.load %arg16[%c0_113, %c0_114] : memref<8x256xf32, #tpu.memory_space<vmem>>, vector<8x80xf32>
    %c120_115 = arith.constant 120 : index
    %c176 = arith.constant 176 : index
    %95 = vector.load %arg14[%c120_115, %c176] : memref<216x256xf32, #tpu.memory_space<vmem>>, vector<8x80xf32>
    tpu.vector_store %arg14[%c120_115, %c176], %94 {strides = array<i32>} : memref<216x256xf32, #tpu.memory_space<vmem>>, vector<8x80xf32>,
    %c0_116 = arith.constant 0 : index
    %c81 = arith.constant 81 : index
    %96 = vector.load %arg15[%c0_116, %c81] : memref<8x256xf32, #tpu.memory_space<vmem>>, vector<8x175xf32>
    %c128 = arith.constant 128 : index
    %c0_117 = arith.constant 0 : index
    %97 = vector.load %arg14[%c128, %c0_117] : memref<216x256xf32, #tpu.memory_space<vmem>>, vector<8x175xf32>
    tpu.vector_store %arg14[%c128, %c0_117], %96 {strides = array<i32>} : memref<216x256xf32, #tpu.memory_space<vmem>>, vector<8x175xf32>,
    %c0_118 = arith.constant 0 : index
    %c0_119 = arith.constant 0 : index
    %98 = vector.load %arg16[%c0_118, %c0_119] : memref<8x256xf32, #tpu.memory_space<vmem>>, vector<8x81xf32>
    %c128_120 = arith.constant 128 : index
    %c175 = arith.constant 175 : index
    %99 = vector.load %arg14[%c128_120, %c175] : memref<216x256xf32, #tpu.memory_space<vmem>>, vector<8x81xf32>
    tpu.vector_store %arg14[%c128_120, %c175], %98 {strides = array<i32>} : memref<216x256xf32, #tpu.memory_space<vmem>>, vector<8x81xf32>,
    %c0_121 = arith.constant 0 : index
    %c82 = arith.constant 82 : index
    %100 = vector.load %arg15[%c0_121, %c82] : memref<8x256xf32, #tpu.memory_space<vmem>>, vector<8x174xf32>
    %c136 = arith.constant 136 : index
    %c0_122 = arith.constant 0 : index
    %101 = vector.load %arg14[%c136, %c0_122] : memref<216x256xf32, #tpu.memory_space<vmem>>, vector<8x174xf32>
    tpu.vector_store %arg14[%c136, %c0_122], %100 {strides = array<i32>} : memref<216x256xf32, #tpu.memory_space<vmem>>, vector<8x174xf32>,
    %c0_123 = arith.constant 0 : index
    %c0_124 = arith.constant 0 : index
    %102 = vector.load %arg16[%c0_123, %c0_124] : memref<8x256xf32, #tpu.memory_space<vmem>>, vector<8x82xf32>
    %c136_125 = arith.constant 136 : index
    %c174 = arith.constant 174 : index
    %103 = vector.load %arg14[%c136_125, %c174] : memref<216x256xf32, #tpu.memory_space<vmem>>, vector<8x82xf32>
    tpu.vector_store %arg14[%c136_125, %c174], %102 {strides = array<i32>} : memref<216x256xf32, #tpu.memory_space<vmem>>, vector<8x82xf32>,
    %c0_126 = arith.constant 0 : index
    %c128_127 = arith.constant 128 : index
    %104 = vector.load %arg15[%c0_126, %c128_127] : memref<8x256xf32, #tpu.memory_space<vmem>>, vector<8x128xf32>
    %c144 = arith.constant 144 : index
    %c0_128 = arith.constant 0 : index
    %105 = vector.load %arg14[%c144, %c0_128] : memref<216x256xf32, #tpu.memory_space<vmem>>, vector<8x128xf32>
    tpu.vector_store %arg14[%c144, %c0_128], %104 {strides = array<i32>} : memref<216x256xf32, #tpu.memory_space<vmem>>, vector<8x128xf32>,
    %c0_129 = arith.constant 0 : index
    %c0_130 = arith.constant 0 : index
    %106 = vector.load %arg16[%c0_129, %c0_130] : memref<8x256xf32, #tpu.memory_space<vmem>>, vector<8x128xf32>
    %c144_131 = arith.constant 144 : index
    %c128_132 = arith.constant 128 : index
    %107 = vector.load %arg14[%c144_131, %c128_132] : memref<216x256xf32, #tpu.memory_space<vmem>>, vector<8x128xf32>
    tpu.vector_store %arg14[%c144_131, %c128_132], %106 {strides = array<i32>} : memref<216x256xf32, #tpu.memory_space<vmem>>, vector<8x128xf32>,
    %c0_133 = arith.constant 0 : index
    %c129 = arith.constant 129 : index
    %108 = vector.load %arg15[%c0_133, %c129] : memref<8x256xf32, #tpu.memory_space<vmem>>, vector<8x127xf32>
    %c152 = arith.constant 152 : index
    %c0_134 = arith.constant 0 : index
    %109 = vector.load %arg14[%c152, %c0_134] : memref<216x256xf32, #tpu.memory_space<vmem>>, vector<8x127xf32>
    tpu.vector_store %arg14[%c152, %c0_134], %108 {strides = array<i32>} : memref<216x256xf32, #tpu.memory_space<vmem>>, vector<8x127xf32>,
    %c0_135 = arith.constant 0 : index
    %c0_136 = arith.constant 0 : index
    %110 = vector.load %arg16[%c0_135, %c0_136] : memref<8x256xf32, #tpu.memory_space<vmem>>, vector<8x129xf32>
    %c152_137 = arith.constant 152 : index
    %c127 = arith.constant 127 : index
    %111 = vector.load %arg14[%c152_137, %c127] : memref<216x256xf32, #tpu.memory_space<vmem>>, vector<8x129xf32>
    tpu.vector_store %arg14[%c152_137, %c127], %110 {strides = array<i32>} : memref<216x256xf32, #tpu.memory_space<vmem>>, vector<8x129xf32>,
    %c0_138 = arith.constant 0 : index
    %c130 = arith.constant 130 : index
    %112 = vector.load %arg15[%c0_138, %c130] : memref<8x256xf32, #tpu.memory_space<vmem>>, vector<8x126xf32>
    %c160 = arith.constant 160 : index
    %c0_139 = arith.constant 0 : index
    %113 = vector.load %arg14[%c160, %c0_139] : memref<216x256xf32, #tpu.memory_space<vmem>>, vector<8x126xf32>
    tpu.vector_store %arg14[%c160, %c0_139], %112 {strides = array<i32>} : memref<216x256xf32, #tpu.memory_space<vmem>>, vector<8x126xf32>,
    %c0_140 = arith.constant 0 : index
    %c0_141 = arith.constant 0 : index
    %114 = vector.load %arg16[%c0_140, %c0_141] : memref<8x256xf32, #tpu.memory_space<vmem>>, vector<8x130xf32>
    %c160_142 = arith.constant 160 : index
    %c126 = arith.constant 126 : index
    %115 = vector.load %arg14[%c160_142, %c126] : memref<216x256xf32, #tpu.memory_space<vmem>>, vector<8x130xf32>
    tpu.vector_store %arg14[%c160_142, %c126], %114 {strides = array<i32>} : memref<216x256xf32, #tpu.memory_space<vmem>>, vector<8x130xf32>,
    %c0_143 = arith.constant 0 : index
    %c136_144 = arith.constant 136 : index
    %116 = vector.load %arg15[%c0_143, %c136_144] : memref<8x256xf32, #tpu.memory_space<vmem>>, vector<8x120xf32>
    %c168 = arith.constant 168 : index
    %c0_145 = arith.constant 0 : index
    %117 = vector.load %arg14[%c168, %c0_145] : memref<216x256xf32, #tpu.memory_space<vmem>>, vector<8x120xf32>
    tpu.vector_store %arg14[%c168, %c0_145], %116 {strides = array<i32>} : memref<216x256xf32, #tpu.memory_space<vmem>>, vector<8x120xf32>,
    %c0_146 = arith.constant 0 : index
    %c0_147 = arith.constant 0 : index
    %118 = vector.load %arg16[%c0_146, %c0_147] : memref<8x256xf32, #tpu.memory_space<vmem>>, vector<8x136xf32>
    %c168_148 = arith.constant 168 : index
    %c120_149 = arith.constant 120 : index
    %119 = vector.load %arg14[%c168_148, %c120_149] : memref<216x256xf32, #tpu.memory_space<vmem>>, vector<8x136xf32>
    tpu.vector_store %arg14[%c168_148, %c120_149], %118 {strides = array<i32>} : memref<216x256xf32, #tpu.memory_space<vmem>>, vector<8x136xf32>,
    %c0_150 = arith.constant 0 : index
    %c137 = arith.constant 137 : index
    %120 = vector.load %arg15[%c0_150, %c137] : memref<8x256xf32, #tpu.memory_space<vmem>>, vector<8x119xf32>
    %c176_151 = arith.constant 176 : index
    %c0_152 = arith.constant 0 : index
    %121 = vector.load %arg14[%c176_151, %c0_152] : memref<216x256xf32, #tpu.memory_space<vmem>>, vector<8x119xf32>
    tpu.vector_store %arg14[%c176_151, %c0_152], %120 {strides = array<i32>} : memref<216x256xf32, #tpu.memory_space<vmem>>, vector<8x119xf32>,
    %c0_153 = arith.constant 0 : index
    %c0_154 = arith.constant 0 : index
    %122 = vector.load %arg16[%c0_153, %c0_154] : memref<8x256xf32, #tpu.memory_space<vmem>>, vector<8x137xf32>
    %c176_155 = arith.constant 176 : index
    %c119 = arith.constant 119 : index
    %123 = vector.load %arg14[%c176_155, %c119] : memref<216x256xf32, #tpu.memory_space<vmem>>, vector<8x137xf32>
    tpu.vector_store %arg14[%c176_155, %c119], %122 {strides = array<i32>} : memref<216x256xf32, #tpu.memory_space<vmem>>, vector<8x137xf32>,
    %c0_156 = arith.constant 0 : index
    %c138 = arith.constant 138 : index
    %124 = vector.load %arg15[%c0_156, %c138] : memref<8x256xf32, #tpu.memory_space<vmem>>, vector<8x118xf32>
    %c184_157 = arith.constant 184 : index
    %c0_158 = arith.constant 0 : index
    %125 = vector.load %arg14[%c184_157, %c0_158] : memref<216x256xf32, #tpu.memory_space<vmem>>, vector<8x118xf32>
    tpu.vector_store %arg14[%c184_157, %c0_158], %124 {strides = array<i32>} : memref<216x256xf32, #tpu.memory_space<vmem>>, vector<8x118xf32>,
    %c0_159 = arith.constant 0 : index
    %c0_160 = arith.constant 0 : index
    %126 = vector.load %arg16[%c0_159, %c0_160] : memref<8x256xf32, #tpu.memory_space<vmem>>, vector<8x138xf32>
    %c184_161 = arith.constant 184 : index
    %c118 = arith.constant 118 : index
    %127 = vector.load %arg14[%c184_161, %c118] : memref<216x256xf32, #tpu.memory_space<vmem>>, vector<8x138xf32>
    tpu.vector_store %arg14[%c184_161, %c118], %126 {strides = array<i32>} : memref<216x256xf32, #tpu.memory_space<vmem>>, vector<8x138xf32>,
    %c0_162 = arith.constant 0 : index
    %c144_163 = arith.constant 144 : index
    %128 = vector.load %arg15[%c0_162, %c144_163] : memref<8x256xf32, #tpu.memory_space<vmem>>, vector<8x112xf32>
    %c192_164 = arith.constant 192 : index
    %c0_165 = arith.constant 0 : index
    %129 = vector.load %arg14[%c192_164, %c0_165] : memref<216x256xf32, #tpu.memory_space<vmem>>, vector<8x112xf32>
    tpu.vector_store %arg14[%c192_164, %c0_165], %128 {strides = array<i32>} : memref<216x256xf32, #tpu.memory_space<vmem>>, vector<8x112xf32>,
    %c0_166 = arith.constant 0 : index
    %c0_167 = arith.constant 0 : index
    %130 = vector.load %arg16[%c0_166, %c0_167] : memref<8x256xf32, #tpu.memory_space<vmem>>, vector<8x144xf32>
    %c192_168 = arith.constant 192 : index
    %c112_169 = arith.constant 112 : index
    %131 = vector.load %arg14[%c192_168, %c112_169] : memref<216x256xf32, #tpu.memory_space<vmem>>, vector<8x144xf32>
    tpu.vector_store %arg14[%c192_168, %c112_169], %130 {strides = array<i32>} : memref<216x256xf32, #tpu.memory_space<vmem>>, vector<8x144xf32>,
    %c0_170 = arith.constant 0 : index
    %c145 = arith.constant 145 : index
    %132 = vector.load %arg15[%c0_170, %c145] : memref<8x256xf32, #tpu.memory_space<vmem>>, vector<8x111xf32>
    %c200 = arith.constant 200 : index
    %c0_171 = arith.constant 0 : index
    %133 = vector.load %arg14[%c200, %c0_171] : memref<216x256xf32, #tpu.memory_space<vmem>>, vector<8x111xf32>
    tpu.vector_store %arg14[%c200, %c0_171], %132 {strides = array<i32>} : memref<216x256xf32, #tpu.memory_space<vmem>>, vector<8x111xf32>,
    %c0_172 = arith.constant 0 : index
    %c0_173 = arith.constant 0 : index
    %134 = vector.load %arg16[%c0_172, %c0_173] : memref<8x256xf32, #tpu.memory_space<vmem>>, vector<8x145xf32>
    %c200_174 = arith.constant 200 : index
    %c111 = arith.constant 111 : index
    %135 = vector.load %arg14[%c200_174, %c111] : memref<216x256xf32, #tpu.memory_space<vmem>>, vector<8x145xf32>
    tpu.vector_store %arg14[%c200_174, %c111], %134 {strides = array<i32>} : memref<216x256xf32, #tpu.memory_space<vmem>>, vector<8x145xf32>,
    %c0_175 = arith.constant 0 : index
    %c146 = arith.constant 146 : index
    %136 = vector.load %arg15[%c0_175, %c146] : memref<8x256xf32, #tpu.memory_space<vmem>>, vector<8x110xf32>
    %c208 = arith.constant 208 : index
    %c0_176 = arith.constant 0 : index
    %137 = vector.load %arg14[%c208, %c0_176] : memref<216x256xf32, #tpu.memory_space<vmem>>, vector<8x110xf32>
    tpu.vector_store %arg14[%c208, %c0_176], %136 {strides = array<i32>} : memref<216x256xf32, #tpu.memory_space<vmem>>, vector<8x110xf32>,
    %c0_177 = arith.constant 0 : index
    %c0_178 = arith.constant 0 : index
    %138 = vector.load %arg16[%c0_177, %c0_178] : memref<8x256xf32, #tpu.memory_space<vmem>>, vector<8x146xf32>
    %c208_179 = arith.constant 208 : index
    %c110 = arith.constant 110 : index
    %139 = vector.load %arg14[%c208_179, %c110] : memref<216x256xf32, #tpu.memory_space<vmem>>, vector<8x146xf32>
    tpu.vector_store %arg14[%c208_179, %c110], %138 {strides = array<i32>} : memref<216x256xf32, #tpu.memory_space<vmem>>, vector<8x146xf32>,
    %c0_180 = arith.constant 0 : index
    %c0_181 = arith.constant 0 : index
    %140 = vector.load %arg6[%c0_180, %c0_181] : memref<64x216xbf16, #tpu.memory_space<vmem>>, vector<64x216xbf16>
    %c0_182 = arith.constant 0 : index
    %c0_183 = arith.constant 0 : index
    %141 = vector.load %arg14[%c0_182, %c0_183] : memref<216x256xf32, #tpu.memory_space<vmem>>, vector<216x256xf32>
    %142 = arith.truncf %141 : vector<216x256xf32> to vector<216x256xbf16>
    %cst_184 = arith.constant dense<0.000000e+00> : vector<64x256xf32>
    %143 = tpu.matmul %140, %142, %cst_184 {dimension_numbers = #tpu.dot_dimension_numbers<[1], [0], [0], [1], [0, 0, 1, 1], [], []>} : vector<64x216xbf16>, vector<216x256xbf16>, vector<64x256xf32> -> vector<64x256xf32>
    %c0_185 = arith.constant 0 : index
    %c0_186 = arith.constant 0 : index
    %144 = vector.load %arg7[%c0_185, %c0_186] : memref<64x1xf32, #tpu.memory_space<vmem>>, vector<64x1xf32>
    %145 = vector.broadcast %144 : vector<64x1xf32> to vector<64x256xf32>
    %146 = arith.addf %143, %145 : vector<64x256xf32>
    %cst_187 = arith.constant 0.000000e+00 : f32
    %147 = vector.broadcast %cst_187 : f32 to vector<64x256xf32>
    %148 = arith.maximumf %146, %147 : vector<64x256xf32>
    %c0_188 = arith.constant 0 : index
    %c0_189 = arith.constant 0 : index
    %c0_190 = arith.constant 0 : index
    %149 = vector.load %arg13[%c0_188, %c0_189, %c0_190] : memref<1x64x256xf32, #tpu.memory_space<vmem>>, vector<1x64x256xf32>
    %150 = vector.shape_cast %149 : vector<1x64x256xf32> to vector<64x256xf32>
    %151 = vector.shape_cast %148 : vector<64x256xf32> to vector<1x64x256xf32>
    tpu.vector_store %arg13[%c0_188, %c0_189, %c0_190], %151 {strides = array<i32>} : memref<1x64x256xf32, #tpu.memory_space<vmem>>, vector<1x64x256xf32>,
    return
  }
  func.func @transform_0(%arg0: i32, %arg1: i32) -> (i32, i32, i32) {
    %c0_i32 = arith.constant 0 : i32
    %c0_i32_0 = arith.constant 0 : i32
    return %arg0, %c0_i32, %arg1 : i32, i32, i32
  }
  func.func @transform_1(%arg0: i32, %arg1: i32) -> (i32, i32, i32) {
    %c1_i32 = arith.constant 1 : i32
    %0 = arith.addi %arg1, %c1_i32 : i32
    %c1_i32_0 = arith.constant 1 : i32
    %1 = arith.minsi %0, %c1_i32_0 : i32
    %c0_i32 = arith.constant 0 : i32
    %c0_i32_1 = arith.constant 0 : i32
    return %arg0, %c0_i32, %1 : i32, i32, i32
  }
  func.func @transform_2(%arg0: i32, %arg1: i32) -> (i32, i32, i32) {
    %c0_i32 = arith.constant 0 : i32
    %c0_i32_0 = arith.constant 0 : i32
    return %arg0, %c0_i32, %arg1 : i32, i32, i32
  }
  func.func @transform_3(%arg0: i32, %arg1: i32) -> (i32, i32, i32) {
    %c1_i32 = arith.constant 1 : i32
    %0 = arith.addi %arg1, %c1_i32 : i32
    %c1_i32_0 = arith.constant 1 : i32
    %1 = arith.minsi %0, %c1_i32_0 : i32
    %c0_i32 = arith.constant 0 : i32
    %c0_i32_1 = arith.constant 0 : i32
    return %arg0, %c0_i32, %1 : i32, i32, i32
  }
  func.func @transform_4(%arg0: i32, %arg1: i32) -> (i32, i32) {
    %c0_i32 = arith.constant 0 : i32
    %c0_i32_0 = arith.constant 0 : i32
    %c0_i32_1 = arith.constant 0 : i32
    return %c0_i32, %c0_i32_0 : i32, i32
  }
  func.func @transform_5(%arg0: i32, %arg1: i32) -> (i32, i32) {
    %c0_i32 = arith.constant 0 : i32
    %c0_i32_0 = arith.constant 0 : i32
    %c0_i32_1 = arith.constant 0 : i32
    return %c0_i32, %c0_i32_0 : i32, i32
  }
  func.func @transform_6(%arg0: i32, %arg1: i32) -> (i32, i32) {
    %c0_i32 = arith.constant 0 : i32
    %c0_i32_0 = arith.constant 0 : i32
    %c0_i32_1 = arith.constant 0 : i32
    return %c0_i32, %c0_i32_0 : i32, i32
  }
  func.func @transform_7(%arg0: i32, %arg1: i32) -> (i32, i32) {
    %c0_i32 = arith.constant 0 : i32
    %c0_i32_0 = arith.constant 0 : i32
    %c0_i32_1 = arith.constant 0 : i32
    return %c0_i32, %c0_i32_0 : i32, i32
  }
  func.func @transform_8(%arg0: i32, %arg1: i32) -> (i32, i32) {
    %c0_i32 = arith.constant 0 : i32
    %c0_i32_0 = arith.constant 0 : i32
    return %c0_i32, %arg1 : i32, i32
  }
  func.func @transform_9(%arg0: i32, %arg1: i32) -> (i32, i32) {
    %c1_i32 = arith.constant 1 : i32
    %0 = arith.addi %arg1, %c1_i32 : i32
    %c1_i32_0 = arith.constant 1 : i32
    %1 = arith.minsi %0, %c1_i32_0 : i32
    %c0_i32 = arith.constant 0 : i32
    %c0_i32_1 = arith.constant 0 : i32
    return %c0_i32, %1 : i32, i32
  }
  func.func @transform_10(%arg0: i32, %arg1: i32) -> (i32, i32) {
    %c0_i32 = arith.constant 0 : i32
    %c0_i32_0 = arith.constant 0 : i32
    %c0_i32_1 = arith.constant 0 : i32
    return %c0_i32, %c0_i32_0 : i32, i32
  }
  func.func @transform_11(%arg0: i32, %arg1: i32) -> (i32, i32, i32) {
    %c0_i32 = arith.constant 0 : i32
    %c0_i32_0 = arith.constant 0 : i32
    return %arg0, %c0_i32, %arg1 : i32, i32, i32
  }
}

</mosaic_0001>

<bundles_post_ra>
// kernel: tile.8
= control target key start
LH: loop header
LB: loop body
LE: loop exit
PB: predicated region body
PF: predicated region fallthrough
CT: control target
= control target key end

     0   :  { %2 = vsyncpa [#allocation1], 0  ;;  %s42_s6 = smov [#allocation0]   ;;  %s59_s0 = inlined_call_operand.hbm [shape: f32[8], index: 0, kind: input, shape index: {}]   ;;  %s60_s1 = inlined_call_operand.vmem [shape: f32[8,8], index: 1, kind: output, shape index: {}]  }
   0x1   :  { %s9_s7 = sshll.u32 %s42_s6, 4  ;;  %s10_s7 = int_to_ptr.vmem [resolvable:$true] %s9_s7 }
   0x2   :  { %s28_s8 = scalar_lea.vmem %s10_s7, 16  ;;  %s32_s9 = scalar_lea.vmem %s10_s7, 32 }
   0x3   :  { %p29_p0 = scmp.ne.s32.totalorder %s10_s7, %s28_s8  ;;  %p33_p1 = scmp.lt.s32.totalorder %s10_s7, %s10_s7 }
   0x4   :  { %p34_p2 = scmp.lt.s32.totalorder %s32_s9, %s28_s8 }
   0x6   :  { %p35_p3 = por %p34_p2, %p33_p1 }
   0x8   :  { %p36_p4 = pnand %p35_p3, %p29_p0 }
   0xa   :  { %39 = shalt.err (!%p36_p4)
}
   0xb   :  { %12 = dma.hbm_to_vmem [thread:$0]  %s59_s0, 16, %s10_s7, [#allocation1]  }
   0xc   :  { %40 = dma.done.wait [#allocation1], 16  }
   0xd   :  { %41 = vsyncadd [#allocation1], 4294967280  ;;  %v16_v0 = vld [vmem:[#allocation0] ss:$0 sm:$0xff] }
   0xe   :  { %17 = vst [vmem:[%s60_s1] sm:$0xff] %v16_v0 }
   0xf   :  { %18 = vsyncpa [#allocation1], 1 }

// kernel: tile.0
= control target key start
LH: loop header
LB: loop body
LE: loop exit
PB: predicated region body
PF: predicated region fallthrough
CT: control target
= control target key end

     0   :  { %vm3_vm0 = vcmask 7168   ;;  %s84_s8 = smov 125   ;;  %s85_s13 = smov 126   ;;  %s167_s0 = inlined_call_operand.vmem [shape: f32[8,8], index: 0, kind: input, shape index: {}]   ;;  %s168_s1 = inlined_call_operand.vmem [shape: f32[64,1], index: 1, kind: output, shape index: {}]  }
   0x1   :  { %v6_v0 = vld [vmem:[%s167_s0] sm:$0xff]   ;;  %s83_s0 = smov 127   ;;  %s86_s14 = smov 124  }
   0x2   :  { %7 = vrot.lane.b32.xlu0 %v6_v0, %s83_s0  ;;  %23 = vrot.lane.b32.xlu1 %v6_v0, %s84_s8  ;;  %4 = vst.msk [vmem:[%s168_s1] ss:$8 sm:$0xf] %vm3_vm0, %v6_v0   ;;  %5 = vst.msk [vmem:[%s168_s1] ss:$8 sm:$0xf0] %vm3_vm0, %v6_v0  }
   0x3   :  { %s87_s15 = smov 123   ;;  %s88_s16 = smov 122  }
   0x4   :  { %s89_s17 = smov 121  }
   0x6   :  { %15 = vrot.lane.b32.xlu0 %v6_v0, %s85_s13  ;;  %31 = vrot.lane.b32.xlu1 %v6_v0, %s86_s14 }
   0xa   :  { %39 = vrot.lane.b32.xlu0 %v6_v0, %s87_s15  ;;  %47 = vrot.lane.b32.xlu1 %v6_v0, %s88_s16 }
   0xe   :  { %55 = vrot.lane.b32.xlu0 %v6_v0, %s89_s17 }
  0x74   :  { %v8_v1 = vpop.permute.xlu0 %7   ;;  %v24_v2 = vpop.permute.xlu1 %23  }
  0x75   :  { %62 = vst.msk [vmem:[%s168_s1 + $0x1] ss:$8 sm:$0xf] %vm3_vm0, %v8_v1   ;;  %63 = vst.msk [vmem:[%s168_s1 + $0x1] ss:$8 sm:$0xf0] %vm3_vm0, %v8_v1  }
  0x76   :  { %66 = vst.msk [vmem:[%s168_s1 + $0x3] ss:$8 sm:$0xf] %vm3_vm0, %v24_v2   ;;  %67 = vst.msk [vmem:[%s168_s1 + $0x3] ss:$8 sm:$0xf0] %vm3_vm0, %v24_v2  }
  0x78   :  { %v16_v3 = vpop.permute.xlu0 %15   ;;  %v32_v4 = vpop.permute.xlu1 %31  }
  0x79   :  { %64 = vst.msk [vmem:[%s168_s1 + $0x2] ss:$8 sm:$0xf] %vm3_vm0, %v16_v3   ;;  %65 = vst.msk [vmem:[%s168_s1 + $0x2] ss:$8 sm:$0xf0] %vm3_vm0, %v16_v3  }
  0x7a   :  { %68 = vst.msk [vmem:[%s168_s1 + $0x4] ss:$8 sm:$0xf] %vm3_vm0, %v32_v4   ;;  %69 = vst.msk [vmem:[%s168_s1 + $0x4] ss:$8 sm:$0xf0] %vm3_vm0, %v32_v4  }
  0x7c   :  { %v40_v5 = vpop.permute.xlu0 %39   ;;  %v48_v6 = vpop.permute.xlu1 %47  }
  0x7d   :  { %70 = vst.msk [vmem:[%s168_s1 + $0x5] ss:$8 sm:$0xf] %vm3_vm0, %v40_v5   ;;  %71 = vst.msk [vmem:[%s168_s1 + $0x5] ss:$8 sm:$0xf0] %vm3_vm0, %v40_v5  }
  0x7e   :  { %72 = vst.msk [vmem:[%s168_s1 + $0x6] ss:$8 sm:$0xf] %vm3_vm0, %v48_v6   ;;  %73 = vst.msk [vmem:[%s168_s1 + $0x6] ss:$8 sm:$0xf0] %vm3_vm0, %v48_v6  }
  0x80   :  { %v56_v7 = vpop.permute.xlu0 %55  }
  0x81   :  { %74 = vst.msk [vmem:[%s168_s1 + $0x7] ss:$8 sm:$0xf] %vm3_vm0, %v56_v7   ;;  %75 = vst.msk [vmem:[%s168_s1 + $0x7] ss:$8 sm:$0xf0] %vm3_vm0, %v56_v7  }

// kernel: res_block_up_3d_forward.3
= control target key start
LH: loop header
LB: loop body
LE: loop exit
PB: predicated region body
PF: predicated region fallthrough
CT: control target
= control target key end

     0   :  { %s1730_s24 = smov 0   ;;  %s1732_s25 = smov 0   ;;  %s2003_s0 = inlined_call_operand.vmem [shape: bf16[2,8,512], index: 0, kind: input, shape index: {}, may-alias: {0,1}]   ;;  %s2004_s1 = inlined_call_operand.vmem [shape: bf16[2,8,512], index: 1, kind: input, shape index: {}, may-alias: {0,1}]   ;;  %s2005_s2 = inlined_call_operand.vmem [shape: bf16[8,216], index: 2, kind: input, shape index: {}]   ;;  %s2006_s3 = inlined_call_operand.vmem [shape: f32[8,1], index: 3, kind: input, shape index: {}]   ;;  %s2007_s4 = inlined_call_operand.vmem [shape: f32[1,512], index: 4, kind: input, shape index: {}]   ;;  %s2008_s5 = inlined_call_operand.vmem [shape: f32[2,8,512], index: 5, kind: output, shape index: {0}]   ;;  %s2009_s6 = inlined_call_operand.vmem [shape: f32[2,2,8,1], index: 6, kind: output, shape index: {1}]   ;;  %s2010_s7 = inlined_call_operand.vmem [shape: f32[2,2,8,1], index: 7, kind: output, shape index: {2}]  }
   0x1   :  { %s1734_s26 = smov 0   ;;  %s1736_s27 = smov 0  }
   0x2   :  { %s1738_s28 = smov 0  }
   0x3 LB: > { %s27_s29 = sadd.s32 1, %s1662_s26  ;;  %s30_s30 = sadd.s32 1, %s1666_s27  ;;  %s1670_s28 = sphi %s1738_s28, %s18_s28   ;;  %s1666_s27 = sphi %s1736_s27, %s2014_s27   ;;  %s1662_s26 = sphi %s1734_s26, %s2013_s26   ;;  %s1658_s25 = sphi %s1732_s25, %s2012_s25   ;;  %s1654_s24 = sphi %s1730_s24, %s2011_s24  }
   0x4   : > { %p28_p0 = scmp.ge.s32.totalorder %s27_s29, 2  ;;  %p1395_p1 = scmp.ge.s32.totalorder %s1670_s28, 1 }
   0x5   : > { %p306_p2 = scmp.lt.s32.totalorder %s1670_s28, 5 }
   0x6   : > { %s2016_s29 = smov (%p28_p0, %s27_s29), 0  ;;  %s2018_s30 = smov (!%p28_p0, %s30_s30), %s1666_s27 }
   0x7   : > { %p307_p3 = pnand %p1395_p1, %p306_p2  ;;  %p32_p4 = scmp.ge.s32.totalorder %s2018_s30, 2 }
   0x8   : > { %s1396_s8 = sshll.u32 (!%p307_p3), %s1654_s24, 1  ;;  %p379_p5 = scmp.lt.s32.totalorder (!%p307_p3), %s1658_s25, 1 }
   0x9   : > { %s2020_s30 = smov (%p32_p4, %s2018_s30), 0  ;;  %310 = sbr.rel (%p307_p3) target bundleno = 580 (0x244), region = 40 }
   0xa   : > { %p381_p6 = scmp.lt.s32.totalorder (!%p307_p3), %s1396_s8, 3  ;;  %s388_s15 = sadd.s32 (!%p307_p3), 1, %s1654_s24 }
   0xb   : > { %p389_p7 = scmp.lt.s32.totalorder (!%p307_p3), %s388_s15, 1  ;;  %s1672_s16 = smov (!%p307_p3), 54  }
   0xc   : > { %s1673_s17 = smov (!%p307_p3), 55   ;;  %s1674_s19 = smov (!%p307_p3), 48  }
   0xd   : > { %s1675_s20 = smov (!%p307_p3), 62   ;;  %s1676_s13 = smov (!%p307_p3), 56  }
   0xe   : > { %s2022_s25 = smov (!%p379_p5, %s1658_s25), 1  ;;  %s2024_s8 = smov (!%p381_p6, %s1396_s8), 3  ;;  %vm1101_vm0 = vcmask 719872   ;;  %vm749_vm1 = vcmask 441344   ;;  %vm726_vm2 = vcmask 449536   ;;  %vm772_vm3 = vcmask 392192  }
   0xf   : > { %s1397_s9 = sshll.u32 %s2022_s25, 2  ;;  %s2026_s15 = smov (!%p389_p7, %s388_s15), 1  ;;  %vm680_vm4 = vcmask 506880   ;;  %vm703_vm5 = vcmask 457728   ;;  %vm761_vm6 = vcmask 1047984   ;;  %vm657_vm7 = vcmask 515072  }
  0x10   : > { %s1769_s10 = sadd.s32 %s1397_s9, %s2024_s8  ;;  %s1399_s18 = sshll.u32 %s2026_s15, 1  ;;  %vm784_vm8 = vcmask 1047936   ;;  %vm715_vm9 = vcmask 1048000   ;;  %vm738_vm10 = vcmask 1047992   ;;  %vm669_vm11 = vcmask 1048056  }
  0x11   : > { %s1398_s11 = sshll.u32 %s1769_s10, 2  ;;  %p394_p8 = scmp.lt.s32.totalorder %s1399_s18, 3  ;;  %vm692_vm12 = vcmask 1048048   ;;  %vm611_vm13 = vcmask 900096   ;;  %vm634_vm14 = vcmask 523264   ;;  %vm623_vm15 = vcmask 1048432  }
  0x12   : > { %s1775_s14 = scalar_lea.vmem %s2003_s0, %s1398_s11  ;;  %s1678_s15 = smov 110  }
  0x13   : > { %v1778_v0 = vld [vmem:[%s1775_s14] sm:$0xff]  ;;  %s2028_s18 = smov (!%p394_p8, %s1399_s18), 3  ;;  %s1686_s23 = smov 127  }
  0x14   : > { %v741_v1 = vunpack.c.l.bf16 %v1778_v0  ;;  %v742_v2 = vunpack.c.h.bf16 %v1778_v0  ;;  %s397_s21 = sadd.s32 %s1397_s9, %s2028_s18  ;;  %s1677_s9 = smov 63   ;;  %v985_v16 = vld [vmem:[%s1775_s14 + $0x4] sm:$0xf] }
  0x15   : > { %s1401_s22 = sshll.u32 %s397_s21, 2  ;;  %v986_v19 = vunpack.c.l.bf16 %v985_v16  ;;  %s1681_s18 = smov 111   ;;  %v943_v43 = vld [vmem:[%s1775_s14 + $0x4] sm:$0xf]  ;;  %v1689_v16 = vmov 0  }
  0x16   : > { %v1787_v3 = vpack.i.bf16 %v741_v1, %v742_v2  ;;  %s1797_s12 = scalar_lea.vmem %s2004_s1, %s1401_s22  ;;  %s1684_s21 = smov 126   ;;  %v964_v45 = vld [vmem:[%s1775_s14 + $0x4] sm:$0xf]  ;;  %v944_v47 = vunpack.c.l.bf16 %v943_v43  ;;  %1629 = vset.pattern.permute.xlu0 %v1689_v16 }
  0x17   : > { %v755_v4 = vld [vmem:[%s1797_s12] sm:$0xf]  ;;  %s1685_s22 = smov 120   ;;  %v901_v49 = vld [vmem:[%s1775_s14 + $0x4] sm:$0xf]  ;;  %v965_v50 = vunpack.c.l.bf16 %v964_v45  ;;  %s1687_s11 = smov 47  }
  0x18   : > { %1475 = vrot.lane.b32.xlu0 %v1787_v3, %s1672_s16  ;;  %1490 = vrot.lane.b32.xlu1 %v1787_v3, %s1673_s17  ;;  %v778_v5 = vld [vmem:[%s1797_s12] sm:$0xf]  ;;  %v756_v6 = vunpack.c.l.bf16 %v755_v4  ;;  %v922_v51 = vld [vmem:[%s1775_s14 + $0x4] sm:$0xf]  ;;  %v902_v53 = vunpack.c.l.bf16 %v901_v49  ;;  %p421_p9 = scmp.lt.s32.totalorder %s1654_s24, 1 }
  0x19   : > { %v709_v7 = vld [vmem:[%s1797_s12] sm:$0xf]  ;;  %v779_v8 = vunpack.c.l.bf16 %v778_v5  ;;  %v859_v55 = vld [vmem:[%s1775_s14 + $0x4] sm:$0xf]  ;;  %v923_v56 = vunpack.c.l.bf16 %v922_v51 }
  0x1a   : > { %v732_v9 = vld [vmem:[%s1797_s12] sm:$0xf]  ;;  %v710_v10 = vunpack.c.l.bf16 %v709_v7  ;;  %v860_v58 = vunpack.c.l.bf16 %v859_v55  ;;  %v880_v63 = vld [vmem:[%s1775_s14 + $0x4] sm:$0xf]  ;;  %s2030_s24 = smov (!%p421_p9, %s1654_s24), 1 }
  0x1b   : > { %v663_v11 = vld [vmem:[%s1797_s12] sm:$0xf]  ;;  %v733_v12 = vunpack.c.l.bf16 %v732_v9  ;;  %v881_v4 = vunpack.c.l.bf16 %v880_v63  ;;  %v838_v5 = vld [vmem:[%s1775_s14 + $0x4] sm:$0xf] }
  0x1c   : > { %1480 = vrot.lane.b32.xlu0 %v1787_v3, %s1674_s19  ;;  %1500 = vrot.lane.b32.xlu1 %v1787_v3, %s1675_s20  ;;  %v686_v13 = vld [vmem:[%s1797_s12] sm:$0xf]  ;;  %v664_v14 = vunpack.c.l.bf16 %v663_v11 }
  0x1d   : > { %v617_v15 = vld [vmem:[%s1797_s12] sm:$0xf]  ;;  %v687_v17 = vunpack.c.l.bf16 %v686_v13 }
  0x1e   : > { %v618_v18 = vunpack.c.l.bf16 %v617_v15  ;;  %v640_v20 = vld [vmem:[%s1797_s12] sm:$0xf] }
  0x1f   : > { %v971_v22 = vld [vmem:[%s1797_s12] sm:$0xff]  ;;  %v641_v24 = vunpack.c.l.bf16 %v640_v20 }
  0x20   : > { %1485 = vrot.lane.b32.xlu0 %v1787_v3, %s1676_s13  ;;  %758 = vrot.lane.b32.xlu1 %v756_v6, %s1672_s16  ;;  %v1514_v21 = vpack.i.bf16 %v986_v19, %v618_v18  ;;  %v571_v23 = vld [vmem:[%s1797_s12] sm:$0xf]  ;;  %s1679_s16 = smov 64   ;;  %v972_v26 = vunpack.c.l.bf16 %v971_v22  ;;  %v952_v44 = vunpack.c.h.bf16 %v971_v22  ;;  %v1863_v6 = vld [vmem:[%s1775_s14 + $0x4] sm:$0xf] }
  0x21   : > { %v594_v25 = vld [vmem:[%s1797_s12] sm:$0xf]  ;;  %v572_v27 = vunpack.c.l.bf16 %v571_v23  ;;  %v833_v7 = vunpack.c.l.bf16 %v1863_v6 }
  0x22   : > { %v595_v28 = vunpack.c.l.bf16 %v594_v25  ;;  %v525_v30 = vld [vmem:[%s1797_s12] sm:$0xf]  ;;  %v1579_v48 = vpack.i.bf16 %v952_v44, %v972_v26  ;;  %v1584_v52 = vpack.i.bf16 %v944_v47, %v952_v44  ;;  %v1589_v54 = vpack.i.bf16 %v965_v50, %v952_v44 }
  0x23   : > { %v1529_v29 = vpack.i.bf16 %v972_v26, %v572_v27  ;;  %v548_v32 = vld [vmem:[%s1797_s12] sm:$0xf]  ;;  %v526_v33 = vunpack.c.l.bf16 %v525_v30  ;;  %v1594_v57 = vpack.i.bf16 %v902_v53, %v952_v44  ;;  %v1599_v59 = vpack.i.bf16 %v923_v56, %v952_v44 }
  0x24   : > { %1495 = vrot.lane.b32.xlu0 %v1787_v3, %s1677_s9  ;;  %781 = vrot.lane.b32.xlu1 %v779_v8, %s1674_s19  ;;  %v1534_v31 = vpack.i.bf16 %v972_v26, %v595_v28  ;;  %v549_v34 = vunpack.c.l.bf16 %v548_v32  ;;  %s1682_s19 = smov 119   ;;  %v479_v36 = vld [vmem:[%s1797_s12] sm:$0xf]  ;;  %v1604_v61 = vpack.i.bf16 %v860_v58, %v952_v44  ;;  %v839_v8 = vunpack.c.l.bf16 %v838_v5 }
  0x25   : > { %v1549_v35 = vpack.i.bf16 %v972_v26, %v526_v33  ;;  %v480_v38 = vunpack.c.l.bf16 %v479_v36  ;;  %v502_v39 = vld [vmem:[%s1797_s12] sm:$0xf] }
  0x26   : > { %v1554_v37 = vpack.i.bf16 %v972_v26, %v549_v34  ;;  %v503_v41 = vunpack.c.l.bf16 %v502_v39  ;;  %v456_v42 = vld [vmem:[%s1797_s12] sm:$0xf] }
  0x27   : > { %v1569_v40 = vpack.i.bf16 %v972_v26, %v480_v38  ;;  %v457_v46 = vunpack.c.l.bf16 %v456_v42  ;;  %v1853_v60 = vld [vmem:[%s1797_s12] sm:$0xf] }
  0x28   : > { %712 = vrot.lane.b32.xlu0 %v710_v10, %s1676_s13  ;;  %735 = vrot.lane.b32.xlu1 %v733_v12, %s1673_s17  ;;  %s1680_s17 = smov 112   ;;  %v836_v62 = vunpack.c.l.bf16 %v1853_v60  ;;  %v801_v9 = vld [vmem:[%s1797_s12] sm:$0xf]  ;;  %s1688_s13 = smov 46  }
  0x29   : > { %v824_v10 = vld [vmem:[%s1797_s12] sm:$0xf]  ;;  %v802_v11 = vunpack.c.l.bf16 %v801_v9 }
  0x2a   : > { %v825_v12 = vunpack.c.l.bf16 %v824_v10  ;;  %v1876_v13 = vld [vmem:[%s2005_s2] sm:$0xff] }
  0x2b   : > { %v1089_v15 = vld [vmem:[%s2006_s3] sm:$0xff]  ;;  %v1410_v60 = vcombine.low %v1876_v13, %v1876_v13 }
  0x2c   : > { %666 = vrot.lane.b32.xlu0 %v664_v14, %s1677_s9  ;;  %689 = vrot.lane.b32.xlu1 %v687_v17, %s1675_s20  ;;  %s1683_s20 = smov 118   ;;  %v1411_v14 = vcombine.high %v1876_v13, %v1876_v13 }
  0x2e   : > { %1413 = vmatprep.mubr.msk.bf16.mxu0 %vm1101_vm0, %v1411_v14  ;;  %vm646_vm0 = vcmask 1048064  }
  0x30   : > { %1505 = vrot.lane.b32.xlu0 %v1787_v3, %s1678_s15  ;;  %1510 = vrot.lane.b32.xlu1 %v1787_v3, %s1679_s16 }
  0x34   : > { %1515 = vrot.lane.b32.xlu0 %v1514_v21, %s1678_s15  ;;  %643 = vrot.lane.b32.xlu1 %v641_v24, %s1679_s16 }
  0x38   : > { %1520 = vrot.lane.b32.xlu0 %v1787_v3, %s1680_s17  ;;  %1525 = vrot.lane.b32.xlu1 %v1787_v3, %s1681_s18 }
  0x3c   : > { %1530 = vrot.lane.b32.xlu0 %v1529_v29, %s1680_s17  ;;  %1535 = vrot.lane.b32.xlu1 %v1534_v31, %s1681_s18 }
  0x40   : > { %1540 = vrot.lane.b32.xlu0 %v1787_v3, %s1682_s19  ;;  %1545 = vrot.lane.b32.xlu1 %v1787_v3, %s1683_s20 }
  0x44   : > { %1550 = vrot.lane.b32.xlu0 %v1549_v35, %s1682_s19  ;;  %1555 = vrot.lane.b32.xlu1 %v1554_v37, %s1683_s20 }
  0x48   : > { %1560 = vrot.lane.b32.xlu0 %v1787_v3, %s1684_s21  ;;  %1565 = vrot.lane.b32.xlu1 %v1787_v3, %s1685_s22 }
  0x4c   : > { %1570 = vrot.lane.b32.xlu0 %v1569_v40, %s1684_s21  ;;  %505 = vrot.lane.b32.xlu1 %v503_v41, %s1685_s22 }
  0x50   : > { %1575 = vrot.lane.b32.xlu0 %v1787_v3, %s1686_s23  ;;  %459 = vrot.lane.b32.xlu1 %v457_v46, %s1686_s23 }
  0x54   : > { %1580 = vrot.lane.b32.xlu0 %v1579_v48, %s1678_s15  ;;  %1585 = vrot.lane.b32.xlu1 %v1584_v52, %s1680_s17 }
  0x58   : > { %1590 = vrot.lane.b32.xlu0 %v1589_v54, %s1681_s18  ;;  %1595 = vrot.lane.b32.xlu1 %v1594_v57, %s1682_s19  ;;  %s407_s18 = scalar_lea.vmem %s2007_s4, %s2024_s8  ;;  %s1405_s19 = sshll.u32 %s1769_s10, 3 }
  0x59   : > { %s1406_s8 = sshll.u32 %s2022_s25, 1 }
  0x5a   : > { %s424_s10 = sadd.s32 %s1406_s8, %s2030_s24 }
  0x5c   : > { %1600 = vrot.lane.b32.xlu0 %v1599_v59, %s1683_s20  ;;  %1605 = vrot.lane.b32.xlu1 %v1604_v61, %s1684_s21 }
  0x60   : > { %1610 = vrot.lane.b32.xlu0 %v1579_v48, %s1685_s22  ;;  %883 = vrot.lane.b32.xlu1 %v881_v4, %s1685_s22  ;;  %s417_s22 = scalar_lea.vmem %s2008_s5, %s1405_s19 }
  0x64   : > { %1615 = vrot.lane.b32.xlu0 %v1579_v48, %s1686_s23  ;;  %841 = vrot.lane.b32.xlu1 %v839_v8, %s1686_s23  ;;  %s1407_s23 = sshll.u32 %s424_s10, 3 }
  0x65   : > { %s426_s14 = scalar_lea.vmem %s2009_s6, %s1407_s23  ;;  %s434_s16 = scalar_lea.vmem %s2010_s7, %s1407_s23 }
  0x68   : > { %1620 = vrot.lane.b32.xlu0 %v1787_v3, %s1687_s11  ;;  %1625 = vrot.lane.b32.xlu1 %v1787_v3, %s1688_s13 }
  0x6c   : > { %804 = vrot.lane.b32.xlu0 %v802_v11, %s1687_s11  ;;  %827 = vrot.lane.b32.xlu1 %v825_v12, %s1688_s13 }
  0x70   : > { %1092 = vperm.xlu0 %1629, %v1089_v15  }
  0x8a   : > { %v1476_v3 = vpop.permute.xlu0 %1475  ;;  %v1491_v17 = vpop.permute.xlu1 %1490 }
  0x8b   : > { %v1478_v18 = vunpack.i.h.bf16 %v1476_v3  ;;  %v1477_v19 = vunpack.i.l.bf16 %v1476_v3  ;;  %v1493_v20 = vunpack.i.h.bf16 %v1491_v17  ;;  %v1492_v21 = vunpack.i.l.bf16 %v1491_v17 }
  0x8d   : > { %v750_v22 = vsel %vm749_vm1, %v1478_v18, %v1477_v19  ;;  %754 = vst.msk [vmem:[#allocation2 + $0xe8] sm:$0xff] %vm749_vm1, %v1477_v19  ;;  %v1883_v23 = vsel %vm726_vm2, %v1493_v20, %v1492_v21  ;;  %vm565_vm1 = vcmask 916480  }
  0x8e   : > { %731 = vst.msk [vmem:[#allocation2 + $0xd8] sm:$0xff] %vm726_vm2, %v1492_v21  ;;  %v1481_v24 = vpop.permute.xlu0 %1480  ;;  %v1501_v25 = vpop.permute.xlu1 %1500  ;;  %vm588_vm2 = vcmask 908288  }
  0x8f   : > { %v1483_v26 = vunpack.i.h.bf16 %v1481_v24  ;;  %v1482_v27 = vunpack.i.l.bf16 %v1481_v24  ;;  %v1503_v28 = vunpack.i.h.bf16 %v1501_v25  ;;  %v1502_v29 = vunpack.i.l.bf16 %v1501_v25 }
  0x91   : > { %v773_v30 = vsel %vm772_vm3, %v1483_v26, %v1482_v27  ;;  %777 = vst.msk [vmem:[#allocation2 + $0xf8] sm:$0xff] %vm772_vm3, %v1482_v27  ;;  %v1885_v31 = vsel %vm680_vm4, %v1503_v28, %v1502_v29  ;;  %vm577_vm3 = vcmask 1048448  }
  0x92   : > { %685 = vst.msk [vmem:[#allocation2 + $0xb8] sm:$0xff] %vm680_vm4, %v1502_v29  ;;  %v1486_v32 = vpop.permute.xlu0 %1485  ;;  %v759_v36 = vpop.permute.xlu1 %758  ;;  %v1075_v50 = vpack.c.bf16 %v773_v30, %v750_v22  ;;  %vm600_vm4 = vcmask 1048440  }
  0x93   : > { %v1488_v33 = vunpack.i.h.bf16 %v1486_v32  ;;  %v1487_v34 = vunpack.i.l.bf16 %v1486_v32  ;;  %762 = vst.msk [vmem:[#allocation2 + $0xe8] sm:$0xff] %vm761_vm6, %v759_v36  ;;  %vm542_vm6 = vcmask 965632  }
  0x95   : > { %v704_v35 = vsel %vm703_vm5, %v1488_v33, %v1487_v34  ;;  %708 = vst.msk [vmem:[#allocation2 + $0xc8] sm:$0xff] %vm703_vm5, %v1487_v34  ;;  %vm519_vm5 = vcmask 973824  }
  0x96   : > { %v1496_v37 = vpop.permute.xlu0 %1495  ;;  %v782_v40 = vpop.permute.xlu1 %781  ;;  %v1073_v63 = vpack.c.bf16 %v1883_v23, %v704_v35 }
  0x97   : > { %v1498_v38 = vunpack.i.h.bf16 %v1496_v37  ;;  %v1497_v39 = vunpack.i.l.bf16 %v1496_v37  ;;  %785 = vst.msk [vmem:[#allocation2 + $0xf8] sm:$0xff] %vm784_vm8, %v782_v40  ;;  %vm554_vm8 = vcmask 1048496  }
  0x99   : > { %v658_v41 = vsel %vm657_vm7, %v1498_v38, %v1497_v39  ;;  %662 = vst.msk [vmem:[#allocation2 + $0xa8] sm:$0xff] %vm657_vm7, %v1497_v39  ;;  %vm531_vm7 = vcmask 1048504  }
  0x9a   : > { %v713_v42 = vpop.permute.xlu0 %712  ;;  %v736_v43 = vpop.permute.xlu1 %735  ;;  %v1036_v46 = vld [vmem:[#allocation2 + $0xe8] sm:$0xff]  ;;  %v1071_v15 = vpack.c.bf16 %v1885_v31, %v658_v41 }
  0x9b   : > { %716 = vst.msk [vmem:[#allocation2 + $0xc8] sm:$0xff] %vm715_vm9, %v713_v42  ;;  %vm473_vm9 = vcmask 1031168  }
  0x9c   : > { %739 = vst.msk [vmem:[#allocation2 + $0xd8] sm:$0xff] %vm738_vm10, %v736_v43  ;;  %vm496_vm10 = vcmask 982016  }
  0x9e   : > { %v667_v44 = vpop.permute.xlu0 %666  ;;  %v690_v45 = vpop.permute.xlu1 %689  ;;  %v1038_v47 = vld [vmem:[#allocation2 + $0xf8] sm:$0xff] }
  0x9f   : > { %670 = vst.msk [vmem:[#allocation2 + $0xa8] sm:$0xff] %vm669_vm11, %v667_v44  ;;  %v1076_v48 = vpack.c.bf16 %v1038_v47, %v1036_v46  ;;  %vm485_vm11 = vcmask 1048560  }
  0xa0   : > { %693 = vst.msk [vmem:[#allocation2 + $0xb8] sm:$0xff] %vm692_vm12, %v690_v45  ;;  %vm508_vm12 = vcmask 1048512  }
  0xa1   : > { %1112 = vmatprep.subr.bf16.mxu0 %v1076_v48 }
  0xa2   : > { %v1506_v49 = vpop.permute.xlu0 %1505  ;;  %v1032_v53 = vld [vmem:[#allocation2 + $0xc8] sm:$0xff]  ;;  %1113 = vmatpush1.bf16.msra.mxu0 %v1075_v50  ;;  %v1511_v54 = vpop.permute.xlu1 %1510 }
  0xa3   : > { %v1508_v51 = vunpack.i.h.bf16 %v1506_v49  ;;  %v1507_v52 = vunpack.i.l.bf16 %v1506_v49  ;;  %v1034_v56 = vld [vmem:[#allocation2 + $0xd8] sm:$0xff]  ;;  %v1513_v57 = vunpack.i.h.bf16 %v1511_v54  ;;  %v1512_v58 = vunpack.i.l.bf16 %v1511_v54 }
  0xa4   : > { %v1074_v59 = vpack.c.bf16 %v1034_v56, %v1032_v53 }
  0xa5   : > { %v612_v55 = vsel %vm611_vm13, %v1508_v51, %v1507_v52  ;;  %616 = vst.msk [vmem:[#allocation2 + $0x88] sm:$0xff] %vm611_vm13, %v1507_v52  ;;  %v635_v9 = vsel %vm634_vm14, %v1513_v57, %v1512_v58 }
  0xa6   : > { %v1516_v61 = vpop.permute.xlu0 %1515  ;;  %v1028_v8 = vld [vmem:[#allocation2 + $0xa8] sm:$0xff]  ;;  %639 = vst.msk [vmem:[#allocation2 + $0x98] sm:$0xff] %vm634_vm14, %v1512_v58  ;;  %1114 = vmatprep.subr.bf16.mxu0 %v1074_v59  ;;  %v644_v10 = vpop.permute.xlu1 %643  ;;  %v1069_v32 = vpack.c.bf16 %v635_v9, %v612_v55  ;;  %vm450_vm14 = vcmask 1039360  }
  0xa7   : > { %v1518_v4 = vunpack.i.h.bf16 %v1516_v61  ;;  %v1517_v5 = vunpack.i.l.bf16 %v1516_v61  ;;  %1115 = vmatpush1.bf16.msra.mxu0 %v1073_v63  ;;  %v1030_v11 = vld [vmem:[#allocation2 + $0xb8] sm:$0xff]  ;;  %647 = vst.msk [vmem:[#allocation2 + $0x98] sm:$0xff] %vm646_vm0, %v644_v10  ;;  %vm462_vm0 = vcmask 1048568  }
  0xa8   : > { %v1072_v12 = vpack.c.bf16 %v1030_v11, %v1028_v8 }
  0xa9   : > { %991 = vst.msk [vmem:[#allocation2 + $0x1a0] sm:$0xff] %vm611_vm13, %v1518_v4 }
  0xaa   : > { %624 = vst.msk [vmem:[#allocation2 + $0x88] sm:$0xff] %vm623_vm15, %v1517_v5  ;;  %v1521_v14 = vpop.permute.xlu0 %1520  ;;  %1116 = vmatprep.subr.bf16.mxu0 %v1072_v12  ;;  %v1526_v17 = vpop.permute.xlu1 %1525 }
  0xab   : > { %v1523_v16 = vunpack.i.h.bf16 %v1521_v14  ;;  %v1522_v3 = vunpack.i.l.bf16 %v1521_v14  ;;  %1117 = vmatpush1.bf16.msra.mxu0 %v1071_v15  ;;  %v1528_v19 = vunpack.i.h.bf16 %v1526_v17  ;;  %v1527_v20 = vunpack.i.l.bf16 %v1526_v17 }
  0xad   : > { %v566_v18 = vsel %vm565_vm1, %v1523_v16, %v1522_v3  ;;  %570 = vst.msk [vmem:[#allocation2 + $0x68] sm:$0xff] %vm565_vm1, %v1522_v3  ;;  %v589_v23 = vsel %vm588_vm2, %v1528_v19, %v1527_v20 }
  0xae   : > { %v1897_v21 = vpop.permute.xlu0 %1530  ;;  %593 = vst.msk [vmem:[#allocation2 + $0x78] sm:$0xff] %vm588_vm2, %v1527_v20  ;;  %v1902_v25 = vpop.permute.xlu1 %1535  ;;  %v1026_v26 = vld [vmem:[#allocation2 + $0x98] sm:$0xff]  ;;  %v1067_v50 = vpack.c.bf16 %v589_v23, %v566_v18 }
  0xaf   : > { %v1532_v22 = vunpack.i.l.bf16 %v1897_v21  ;;  %v1537_v27 = vunpack.i.l.bf16 %v1902_v25  ;;  %v1533_v17 = vunpack.i.h.bf16 %v1897_v21  ;;  %v1538_v23 = vunpack.i.h.bf16 %v1902_v25 }
  0xb1   : > { %v1024_v24 = vld [vmem:[#allocation2 + $0x88] sm:$0xff]  ;;  %578 = vst.msk [vmem:[#allocation2 + $0x68] sm:$0xff] %vm577_vm3, %v1532_v22 }
  0xb2   : > { %v1541_v28 = vpop.permute.xlu0 %1540  ;;  %v1070_v29 = vpack.c.bf16 %v1026_v26, %v1024_v24  ;;  %601 = vst.msk [vmem:[#allocation2 + $0x78] sm:$0xff] %vm600_vm4, %v1537_v27  ;;  %v1546_v33 = vpop.permute.xlu1 %1545 }
  0xb3   : > { %v1543_v30 = vunpack.i.h.bf16 %v1541_v28  ;;  %v1542_v31 = vunpack.i.l.bf16 %v1541_v28  ;;  %v1548_v35 = vunpack.i.h.bf16 %v1546_v33  ;;  %v1547_v36 = vunpack.i.l.bf16 %v1546_v33 }
  0xb4   : > { %1118 = vmatprep.subr.bf16.mxu0 %v1070_v29 }
  0xb5   : > { %v520_v34 = vsel %vm519_vm5, %v1543_v30, %v1542_v31  ;;  %524 = vst.msk [vmem:[#allocation2 + $0x48] sm:$0xff] %vm519_vm5, %v1542_v31  ;;  %1119 = vmatpush1.bf16.msra.mxu0 %v1069_v32  ;;  %v543_v39 = vsel %vm542_vm6, %v1548_v35, %v1547_v36 }
  0xb6   : > { %v1909_v37 = vpop.permute.xlu0 %1550  ;;  %547 = vst.msk [vmem:[#allocation2 + $0x58] sm:$0xff] %vm542_vm6, %v1547_v36  ;;  %v1914_v40 = vpop.permute.xlu1 %1555  ;;  %v1065_v9 = vpack.c.bf16 %v543_v39, %v520_v34 }
  0xb7   : > { %v1552_v38 = vunpack.i.l.bf16 %v1909_v37  ;;  %v1557_v42 = vunpack.i.l.bf16 %v1914_v40  ;;  %v1553_v25 = vunpack.i.h.bf16 %v1909_v37  ;;  %v1558_v35 = vunpack.i.h.bf16 %v1914_v40 }
  0xb8   : > { %v1020_v41 = vld [vmem:[#allocation2 + $0x68] sm:$0xff] }
  0xb9   : > { %532 = vst.msk [vmem:[#allocation2 + $0x48] sm:$0xff] %vm531_vm7, %v1552_v38  ;;  %v1022_v46 = vld [vmem:[#allocation2 + $0x78] sm:$0xff] }
  0xba   : > { %v1561_v43 = vpop.permute.xlu0 %1560  ;;  %555 = vst.msk [vmem:[#allocation2 + $0x58] sm:$0xff] %vm554_vm8, %v1557_v42  ;;  %v1068_v47 = vpack.c.bf16 %v1022_v46, %v1020_v41  ;;  %v1566_v48 = vpop.permute.xlu1 %1565 }
  0xbb   : > { %v1563_v44 = vunpack.i.h.bf16 %v1561_v43  ;;  %v1562_v45 = vunpack.i.l.bf16 %v1561_v43  ;;  %v1568_v51 = vunpack.i.h.bf16 %v1566_v48  ;;  %v1567_v52 = vunpack.i.l.bf16 %v1566_v48 }
  0xbc   : > { %1120 = vmatprep.subr.bf16.mxu0 %v1068_v47 }
  0xbd   : > { %v474_v49 = vsel %vm473_vm9, %v1563_v44, %v1562_v45  ;;  %478 = vst.msk [vmem:[#allocation2 + $0x28] sm:$0xff] %vm473_vm9, %v1562_v45  ;;  %1121 = vmatpush1.bf16.msra.mxu0 %v1067_v50  ;;  %v497_v55 = vsel %vm496_vm10, %v1568_v51, %v1567_v52 }
  0xbe   : > { %v1921_v53 = vpop.permute.xlu0 %1570  ;;  %501 = vst.msk [vmem:[#allocation2 + $0x38] sm:$0xff] %vm496_vm10, %v1567_v52  ;;  %v506_v56 = vpop.permute.xlu1 %505  ;;  %v1063_v27 = vpack.c.bf16 %v497_v55, %v474_v49 }
  0xbf   : > { %v1572_v54 = vunpack.i.l.bf16 %v1921_v53  ;;  %509 = vst.msk [vmem:[#allocation2 + $0x38] sm:$0xff] %vm508_vm12, %v506_v56  ;;  %v1573_v44 = vunpack.i.h.bf16 %v1921_v53 }
  0xc0   : > { %v1016_v57 = vld [vmem:[#allocation2 + $0x48] sm:$0xff] }
  0xc1   : > { %486 = vst.msk [vmem:[#allocation2 + $0x28] sm:$0xff] %vm485_vm11, %v1572_v54  ;;  %v1018_v63 = vld [vmem:[#allocation2 + $0x58] sm:$0xff] }
  0xc2   : > { %v1576_v58 = vpop.permute.xlu0 %1575  ;;  %v1066_v4 = vpack.c.bf16 %v1018_v63, %v1016_v57  ;;  %v460_v5 = vpop.permute.xlu1 %459 }
  0xc3   : > { %v1578_v59 = vunpack.i.h.bf16 %v1576_v58  ;;  %v1577_v61 = vunpack.i.l.bf16 %v1576_v58 }
  0xc4   : > { %1122 = vmatprep.subr.bf16.mxu0 %v1066_v4 }
  0xc5   : > { %v451_v8 = vsel %vm450_vm14, %v1578_v59, %v1577_v61  ;;  %455 = vst.msk [vmem:[#allocation2 + $0x18] sm:$0xff] %vm450_vm14, %v1577_v61  ;;  %1123 = vmatpush1.bf16.msra.mxu0 %v1065_v9 }
  0xc6   : > { %463 = vst.msk [vmem:[#allocation2 + $0x18] sm:$0xff] %vm462_vm0, %v460_v5  ;;  %v1581_v10 = vpop.permute.xlu0 %1580  ;;  %v1586_v15 = vpop.permute.xlu1 %1585  ;;  %v1014_v3 = vld [vmem:[#allocation2 + $0x38] sm:$0xff]  ;;  %v1061_v39 = vpack.c.bf16 %v451_v8, %v741_v1 }
  0xc7   : > { %v1583_v11 = vunpack.i.h.bf16 %v1581_v10  ;;  %v1582_v12 = vunpack.i.l.bf16 %v1581_v10  ;;  %v1588_v18 = vunpack.i.h.bf16 %v1586_v15  ;;  %v1587_v19 = vunpack.i.l.bf16 %v1586_v15 }
  0xc8   : > { %v1012_v14 = vld [vmem:[#allocation2 + $0x28] sm:$0xff] }
  0xc9   : > { %v1001_v16 = vsel %vm611_vm13, %v1582_v12, %v1583_v11  ;;  %1004 = vst.msk [vmem:[#allocation2 + $0x1a0] sm:$0xff] %vm623_vm15, %v1582_v12  ;;  %v1064_v22 = vpack.c.bf16 %v1014_v3, %v1012_v14  ;;  %v959_v28 = vsel %vm565_vm1, %v1533_v17, %v1587_v19  ;;  %vm1105_vm13 = vcmask 1043456  }
  0xca   : > { %v1591_v20 = vpop.permute.xlu0 %1590  ;;  %949 = vst.msk [vmem:[#allocation2 + $0x180] sm:$0xff] %vm565_vm1, %v1588_v18  ;;  %v1596_v29 = vpop.permute.xlu1 %1595  ;;  %v1088_v37 = vpack.c.bf16 %v1001_v16, %v1001_v16  ;;  %vm795_vm15 = vcmask 384000   ;;  %vm807_vm1 = vcmask 1047928  }
  0xcb   : > { %v1593_v24 = vunpack.i.h.bf16 %v1591_v20  ;;  %v1592_v26 = vunpack.i.l.bf16 %v1591_v20  ;;  %1124 = vmatprep.subr.bf16.mxu0 %v1064_v22  ;;  %962 = vst.msk [vmem:[#allocation2 + $0x180] sm:$0xff] %vm577_vm3, %v1533_v17  ;;  %v1598_v31 = vunpack.i.h.bf16 %v1596_v29  ;;  %v1597_v32 = vunpack.i.l.bf16 %v1596_v29 }
  0xcc   : > { %1125 = vmatpush1.bf16.msra.mxu0 %v1063_v27  ;;  %vm830_vm3 = vcmask 1047920  }
  0xcd   : > { %970 = vst.msk [vmem:[#allocation2 + $0x190] sm:$0xff] %vm588_vm2, %v1593_v24  ;;  %v980_v21 = vsel %vm588_vm2, %v1538_v23, %v1592_v26  ;;  %v1010_v30 = vld [vmem:[#allocation2 + $0x18] sm:$0xff]  ;;  %v917_v41 = vsel %vm519_vm5, %v1553_v25, %v1597_v32  ;;  %vm818_vm2 = vcmask 375808  }
  0xce   : > { %983 = vst.msk [vmem:[#allocation2 + $0x190] sm:$0xff] %vm600_vm4, %v1538_v23  ;;  %v1601_v33 = vpop.permute.xlu0 %1600  ;;  %v1062_v34 = vpack.c.bf16 %v1010_v30, %v742_v2  ;;  %v1606_v43 = vpop.permute.xlu1 %1605  ;;  %v1086_v50 = vpack.c.bf16 %v980_v21, %v959_v28  ;;  %vm1172_vm4 = vcmask 7168  }
  0xcf   : > { %v1603_v36 = vunpack.i.h.bf16 %v1601_v33  ;;  %v1602_v38 = vunpack.i.l.bf16 %v1601_v33  ;;  %907 = vst.msk [vmem:[#allocation2 + $0x160] sm:$0xff] %vm519_vm5, %v1598_v31  ;;  %v1608_v0 = vunpack.i.h.bf16 %v1606_v43  ;;  %v1607_v1 = vunpack.i.l.bf16 %v1606_v43  ;;  %v1155_v31 = vld [vmem:[%s407_s18] sm:$0x3] }
  0xd0   : > { %1126 = vmatprep.subr.bf16.mxu0 %v1062_v34  ;;  %v1059_v42 = vld [vmem:[#allocation2 + $0x1a0] sm:$0xff]  ;;  %920 = vst.msk [vmem:[#allocation2 + $0x160] sm:$0xff] %vm531_vm7, %v1553_v25 }
  0xd1   : > { %928 = vst.msk [vmem:[#allocation2 + $0x170] sm:$0xff] %vm542_vm6, %v1603_v36  ;;  %v938_v2 = vsel %vm542_vm6, %v1558_v35, %v1602_v38  ;;  %1127 = vmatpush1.bf16.msra.mxu0 %v1061_v39  ;;  %v1087_v40 = vpack.c.bf16 %v1059_v42, %v1059_v42  ;;  %v875_v49 = vsel %vm473_vm9, %v1573_v44, %v1607_v1 }
  0xd2   : > { %941 = vst.msk [vmem:[#allocation2 + $0x170] sm:$0xff] %vm554_vm8, %v1558_v35  ;;  %v1611_v45 = vpop.permute.xlu0 %1610  ;;  %1412 = vmatprep.subr.msk.bf16.mxu0 %vm1105_vm13, %v1088_v37  ;;  %v884_v51 = vpop.permute.xlu1 %883  ;;  %v1055_v53 = vld [vmem:[#allocation2 + $0x180] sm:$0xff]  ;;  %v1084_v59 = vpack.c.bf16 %v938_v2, %v917_v41 }
  0xd3   : > { %v1613_v46 = vunpack.i.h.bf16 %v1611_v45  ;;  %v1612_v47 = vunpack.i.l.bf16 %v1611_v45  ;;  %v1107_v48 = vsel %vm1105_vm13, %v1087_v40, 0  ;;  %865 = vst.msk [vmem:[#allocation2 + $0x140] sm:$0xff] %vm473_vm9, %v1608_v0 }
  0xd4   : > { %878 = vst.msk [vmem:[#allocation2 + $0x140] sm:$0xff] %vm485_vm11, %v1573_v44 }
  0xd5   : > { %v896_v52 = vsel %vm496_vm10, %v1612_v47, %v1613_v46  ;;  %1133 = vmatpush2.bf16.msra.mxu0 %v1107_v48  ;;  %v1057_v54 = vld [vmem:[#allocation2 + $0x190] sm:$0xff]  ;;  %886 = vst.msk [vmem:[#allocation2 + $0x150] sm:$0xff] %vm496_vm10, %v884_v51 }
  0xd6   : > { %v1616_v55 = vpop.permute.xlu0 %1615  ;;  %1134 = vmatprep.subr.bf16.mxu0 %v1086_v50  ;;  %v1085_v56 = vpack.c.bf16 %v1057_v54, %v1055_v53  ;;  %899 = vst.msk [vmem:[#allocation2 + $0x150] sm:$0xff] %vm508_vm12, %v1612_v47  ;;  %v842_v61 = vpop.permute.xlu1 %841  ;;  %v1082_v12 = vpack.c.bf16 %v896_v52, %v875_v49 }
  0xd7   : > { %v1618_v57 = vunpack.i.h.bf16 %v1616_v55  ;;  %v1617_v58 = vunpack.i.l.bf16 %v1616_v55  ;;  %v1051_v4 = vld [vmem:[#allocation2 + $0x160] sm:$0xff]  ;;  %844 = vst.msk [vmem:[#allocation2 + $0x130] sm:$0xff] %vm450_vm14, %v842_v61 }
  0xd9   : > { %v854_v63 = vsel %vm450_vm14, %v1617_v58, %v1618_v57  ;;  %1135 = vmatpush2.bf16.msra.mxu0 %v1085_v56  ;;  %v1053_v5 = vld [vmem:[#allocation2 + $0x170] sm:$0xff]  ;;  %857 = vst.msk [vmem:[#allocation2 + $0x130] sm:$0xff] %vm462_vm0, %v1617_v58 }
  0xda   : > { %v1621_v8 = vpop.permute.xlu0 %1620  ;;  %1136 = vmatprep.subr.bf16.mxu0 %v1084_v59  ;;  %v1083_v9 = vpack.c.bf16 %v1053_v5, %v1051_v4  ;;  %v1626_v14 = vpop.permute.xlu1 %1625  ;;  %v1080_v23 = vpack.c.bf16 %v854_v63, %v836_v62  ;;  %v1157_v62 = vlaneseq }
  0xdb   : > { %v1623_v10 = vunpack.i.h.bf16 %v1621_v8  ;;  %v1622_v11 = vunpack.i.l.bf16 %v1621_v8  ;;  %v1628_v16 = vunpack.i.h.bf16 %v1626_v14  ;;  %v1627_v3 = vunpack.i.l.bf16 %v1626_v14  ;;  %v1047_v18 = vld [vmem:[#allocation2 + $0x140] sm:$0xff] }
  0xdc   : > { %v1158_v25 = vshrl.u32 %v1157_v62, 7 }
  0xdd   : > { %v796_v15 = vsel %vm795_vm15, %v1623_v10, %v1622_v11  ;;  %800 = vst.msk [vmem:[#allocation2 + $0x108] sm:$0xff] %vm795_vm15, %v1622_v11  ;;  %1137 = vmatpush2.bf16.msra.mxu0 %v1083_v9  ;;  %v1049_v19 = vld [vmem:[#allocation2 + $0x150] sm:$0xff]  ;;  %v819_v22 = vsel %vm818_vm2, %v1628_v16, %v1627_v3 }
  0xde   : > { %v805_v17 = vpop.permute.xlu0 %804  ;;  %1138 = vmatprep.subr.bf16.mxu0 %v1082_v12  ;;  %v1081_v20 = vpack.c.bf16 %v1049_v19, %v1047_v18  ;;  %823 = vst.msk [vmem:[#allocation2 + $0x118] sm:$0xff] %vm818_vm2, %v1627_v3  ;;  %v828_v24 = vpop.permute.xlu1 %827  ;;  %v1077_v30 = vpack.c.bf16 %v819_v22, %v796_v15  ;;  %v1159_v6 = vsub.s32 0, %v1158_v25 }
  0xdf   : > { %808 = vst.msk [vmem:[#allocation2 + $0x108] sm:$0xff] %vm807_vm1, %v805_v17 }
  0xe0   : > { %831 = vst.msk [vmem:[#allocation2 + $0x118] sm:$0xff] %vm830_vm3, %v828_v24  ;;  %v1045_v26 = vld [vmem:[#allocation2 + $0x130] sm:$0xff]  ;;  %v1160_v33 = vrot.slane %v1155_v31, %v1159_v6 }
  0xe1   : > { %1139 = vmatpush2.bf16.msra.mxu0 %v1081_v20  ;;  %v1079_v27 = vpack.c.bf16 %v1045_v26, %v833_v7  ;;  %v1163_v7 = vsub.s32 1, %v1158_v25 }
  0xe2   : > { %1140 = vmatprep.subr.bf16.mxu0 %v1080_v23 }
  0xe3   : > { %v1164_v35 = vrot.slane %v1155_v31, %v1163_v7 }
  0xe5   : > { %1141 = vmatpush2.bf16.msra.mxu0 %v1079_v27 }
  0xe6   : > { %v1040_v28 = vld [vmem:[#allocation2 + $0x108] sm:$0xff] }
  0xe7   : > { %v1042_v29 = vld [vmem:[#allocation2 + $0x118] sm:$0xff] }
  0xe8   : > { %v1078_v21 = vpack.c.bf16 %v1042_v29, %v1040_v28 }
  0xea   : > { %1142 = vmatprep.subr.bf16.mxu0 %v1078_v21 }
  0xeb   : > { %1143 = vmatpush2.bf16.msra.mxu0 %v1077_v30  ;;  %v1093_v32 = vpop.permute.xlu0 %1092 }
  0xee   : > { %1145 = vmatmul.mubr.bf16.vlgmr.msra.gmra.mxu0 %v1410_v60 }
 0x1ae   : > { %v1146_v34 = vpop.f32.mrf.mxu0 }
 0x1af   : > { %v1147_v13 = vadd.f32 %v1146_v34, %v1093_v32 }
 0x1b0   : > { %v1148_v36 = vpop.f32.mrf.mxu0 }
 0x1b1   : > { %1153 = vst [vmem:[%s417_s22] sm:$0xff] %v1147_v13  ;;  %v1149_v38 = vadd.f32 %v1148_v36, %v1093_v32  ;;  %v1167_v39 = vmul.f32 %v1160_v33, %v1147_v13 }
 0x1b2   : > { %v1150_v41 = vpop.f32.mrf.mxu0 }
 0x1b3   : > { %1154 = vst [vmem:[%s417_s22 + $0x8] sm:$0xff] %v1149_v38  ;;  %v1168_v37 = vmul.f32 %v1164_v35, %v1149_v38  ;;  %v1174_v2 = vmul.f32 %v1167_v39, %v1147_v13 }
 0x1b4   : > { %v1151_v42 = vpop.f32.mrf.mxu0 }
 0x1b5   : > { %v1169_v43 = vadd.f32 %v1168_v37, %v1167_v39  ;;  %v1175_v40 = vmul.f32 %v1168_v37, %v1149_v38 }
 0x1b7   : > { %1170 = vadd.xlane.f32.xlu1 %v1169_v43  ;;  %v1176_v44 = vadd.f32 %v1175_v40, %v1174_v2 }
 0x1b9   : > { %1177 = vadd.xlane.f32.xlu0 %v1176_v44 }
 0x240   : > { %v1171_v0 = vpop.xlane.xlu1 %1170 }
 0x241   : > { %1173 = vst.msk [vmem:[%s426_s14] sm:$0xff] %vm1172_vm4, %v1171_v0 }
 0x242   : > { %v1178_v1 = vpop.xlane.xlu0 %1177 }
 0x243   : > { %1179 = vst.msk [vmem:[%s434_s16] sm:$0xff] %vm1172_vm4, %v1178_v1 }
 0x244 PF: > { %s18_s28 = sadd.s32 1, %s1670_s28   ;;  %s2011_s24 = smov %s1662_s26 }
 0x245   : > { %p15_p10 = scmp.ge.s32.totalorder %s18_s28, 6   ;;  %s2012_s25 = smov %s1666_s27 }
 0x246   : > { %s2013_s26 = smov %s2016_s29  ;;  %s2014_s27 = smov %s2020_s30 }
 0x247   :  { %17 = sbr.rel (!%p15_p10) target bundleno = 3 (0x3), region = 100 }

// kernel: res_block_up_3d_forward.4
= control target key start
LH: loop header
LB: loop body
LE: loop exit
PB: predicated region body
PF: predicated region fallthrough
CT: control target
= control target key end

     0   :  { %s1802_s17 = smov 0   ;;  %s1804_s18 = smov 0   ;;  %s2116_s0 = inlined_call_operand.vmem [shape: f32[2,8,512], index: 0, kind: input, shape index: {}, may-alias: {0,1}]   ;;  %s2117_s1 = inlined_call_operand.vmem [shape: f32[2,8,512], index: 1, kind: input, shape index: {}, may-alias: {0,1}]   ;;  %s2118_s2 = inlined_call_operand.vmem [shape: bf16[8,216], index: 2, kind: input, shape index: {}]   ;;  %s2119_s3 = inlined_call_operand.vmem [shape: f32[8,1], index: 3, kind: input, shape index: {}]   ;;  %s2120_s4 = inlined_call_operand.vmem [shape: f32[8,1], index: 4, kind: input, shape index: {}]   ;;  %s2121_s5 = inlined_call_operand.vmem [shape: f32[8,1], index: 5, kind: input, shape index: {}]   ;;  %s2122_s6 = inlined_call_operand.vmem [shape: f32[1,512], index: 6, kind: input, shape index: {}, may-alias: {6,7}]   ;;  %s2123_s7 = inlined_call_operand.vmem [shape: f32[1,512], index: 7, kind: input, shape index: {}, may-alias: {6,7}]   ;;  %s2124_s8 = inlined_call_operand.vmem [shape: f32[1,512], index: 8, kind: input, shape index: {}]   ;;  %s2125_s9 = inlined_call_operand.vmem [shape: f32[2,8,512], index: 9, kind: output, shape index: {0}]   ;;  %s2126_s10 = inlined_call_operand.vmem [shape: f32[2,2,8,1], index: 10, kind: output, shape index: {1}]   ;;  %s2127_s11 = inlined_call_operand.vmem [shape: f32[2,2,8,1], index: 11, kind: output, shape index: {2}]  }
   0x1   :  { %2129 = sst [smem:[#allocation6_spill]] %s2120_s4  ;;  %s1806_s19 = smov 0  }
   0x2   :  { %2130 = sst [smem:[#allocation7_spill]] %s2121_s5  ;;  %s1808_s20 = smov 0  }
   0x3   :  { %s1810_s21 = smov 0  }
   0x4 LB: > { %s31_s22 = sadd.s32 1, %s1714_s19  ;;  %s34_s23 = sadd.s32 1, %s1718_s20  ;;  %s1722_s21 = sphi %s1810_s21, %s22_s21   ;;  %s1718_s20 = sphi %s1808_s20, %s2139_s20   ;;  %s1714_s19 = sphi %s1806_s19, %s2138_s19   ;;  %s1710_s18 = sphi %s1804_s18, %s2137_s18   ;;  %s1706_s17 = sphi %s1802_s17, %s2136_s17  }
   0x5   : > { %p32_p0 = scmp.ge.s32.totalorder %s31_s22, 2  ;;  %p1599_p1 = scmp.ge.s32.totalorder %s1722_s21, 1 }
   0x6   : > { %p438_p2 = scmp.lt.s32.totalorder %s1722_s21, 5 }
   0x7   : > { %s2141_s22 = smov (%p32_p0, %s31_s22), 0  ;;  %s2143_s23 = smov (!%p32_p0, %s34_s23), %s1718_s20 }
   0x8   : > { %p439_p3 = pnand %p1599_p1, %p438_p2  ;;  %p36_p4 = scmp.ge.s32.totalorder %s2143_s23, 2 }
   0x9   : > { %s2132_s5 = sld [smem:[#allocation7_spill]] (!%p439_p3)  ;;  %s539_s28 = sadd.s32 (!%p439_p3), 1, %s1706_s17 }
   0xa   : > { %s2145_s23 = smov (%p36_p4, %s2143_s23), 0  ;;  %442 = sbr.rel (%p439_p3) target bundleno = 770 (0x302), region = 56 }
   0xb   : > { %2131 = sst [smem:[#allocation5_spill]] %s2145_s23  ;;  %p540_p5 = scmp.lt.s32.totalorder (!%p439_p3), %s539_s28, 1 }
   0xc   : > { %s2133_s4 = sld [smem:[#allocation6_spill]] (!%p439_p3)  ;;  %s1600_s29 = sshll.u32 (!%p439_p3), %s1706_s17, 1 }
   0xd   : > { %p530_p6 = scmp.lt.s32.totalorder (!%p439_p3), %s1710_s18, 1  ;;  %p532_p7 = scmp.lt.s32.totalorder (!%p439_p3), %s1600_s29, 3 }
   0xe   : > { %s1727_s23 = smov (!%p439_p3), 55   ;;  %s1731_s27 = smov (!%p439_p3), 64  }
   0xf   : > { %v613_v0 = vld [vmem:[%s2132_s5] sm:$0xff]  ;;  %v1724_v2 = vmov 0   ;;  %s2147_s28 = smov (!%p540_p5, %s539_s28), 1  ;;  %s2149_s18 = smov (!%p530_p6, %s1710_s18), 1  ;;  %v625_v3 = vlaneseq  ;;  %vm981_vm0 = vcmask 392192   ;;  %vm960_vm1 = vcmask 441344  }
  0x10   : > { %1681 = vset.pattern.permute.xlu1 %v1724_v2  ;;  %1680 = vset.pattern.permute.xlu0 %v1724_v2  ;;  %s1603_s30 = sshll.u32 %s2147_s28, 1  ;;  %s2151_s29 = smov (!%p532_p7, %s1600_s29), 3  ;;  %vm971_vm2 = vcmask 1047984   ;;  %vm992_vm3 = vcmask 1047936   ;;  %vm939_vm4 = vcmask 449536   ;;  %vm918_vm5 = vcmask 457728  }
  0x11   : > { %616 = vperm.xlu1 %1681, %v613_v0   ;;  %s1601_s12 = sshll.u32 %s2149_s18, 2  ;;  %p545_p8 = scmp.lt.s32.totalorder %s1603_s30, 3  ;;  %v626_v4 = vshrl.u32 %v625_v3, 7  ;;  %vm929_vm6 = vcmask 1048000   ;;  %vm950_vm7 = vcmask 1047992   ;;  %vm897_vm8 = vcmask 506880  }
  0x12   : > { %v603_v1 = vld [vmem:[%s2133_s4] sm:$0xff]  ;;  %s1852_s13 = sadd.s32 %s1601_s12, %s2151_s29  ;;  %s558_s4 = scalar_lea.vmem %s2122_s6, %s2151_s29  ;;  %vm876_vm9 = vcmask 515072   ;;  %vm887_vm10 = vcmask 1048056   ;;  %vm908_vm11 = vcmask 1048048   ;;  %vm1287_vm12 = vcmask 719872  }
  0x13   : > { %608 = vperm.xlu0 %1680, %v603_v1   ;;  %s2153_s30 = smov (!%p545_p8, %s1603_s30), 3  ;;  %s1602_s14 = sshll.u32 %s1852_s13, 3  ;;  %v1864_v7 = vsub.s32 0, %v626_v4  ;;  %v1866_v8 = vsub.s32 1, %v626_v4  ;;  %v623_v11 = vld [vmem:[%s558_s4] sm:$0x3] }
  0x14   : > { %s548_s15 = sadd.s32 %s1601_s12, %s2153_s30  ;;  %s537_s25 = scalar_lea.vmem %s2116_s0, %s1602_s14  ;;  %v1275_v2 = vld [vmem:[%s2119_s3] sm:$0xff]  ;;  %vm855_vm13 = vcmask 523264   ;;  %vm834_vm14 = vcmask 900096   ;;  %vm845_vm15 = vcmask 1048432  }
  0x15   : > { %652 = vperm.xlu1 %1681, %v613_v0   ;;  %s1605_s26 = sshll.u32 %s548_s15, 3  ;;  %v604_v5 = vld [vmem:[%s537_s25] sm:$0xff]  ;;  %v605_v6 = vld [vmem:[%s537_s25 + $0x8] sm:$0xff]  ;;  %s566_s15 = scalar_lea.vmem %s2123_s7, %s2153_s30  ;;  %v628_v18 = vrot.slane %v623_v11, %v1864_v7  ;;  %v632_v19 = vrot.slane %v623_v11, %v1866_v8 }
  0x16   : > { %s550_s12 = scalar_lea.vmem %s2117_s1, %s1605_s26  ;;  %v659_v20 = vld [vmem:[%s566_s15] sm:$0x3]  ;;  %s1725_s4 = smov 48  }
  0x17   : > { %644 = vperm.xlu0 %1680, %v603_v1   ;;  %v640_v14 = vld [vmem:[%s550_s12] sm:$0xff]  ;;  %v641_v15 = vld [vmem:[%s550_s12 + $0x8] sm:$0xff]  ;;  %v664_v27 = vrot.slane %v659_v20, %v1864_v7  ;;  %v668_v28 = vrot.slane %v659_v20, %v1866_v8  ;;  %s1726_s5 = smov 54   ;;  %s1728_s30 = smov 56  }
  0x18   : > { %s1729_s25 = smov 62   ;;  %s1730_s26 = smov 63   ;;  %v2019_v3 = vld [vmem:[%s2118_s2] sm:$0xff] }
  0x19   : > { %s1732_s28 = smov 110   ;;  %s1733_s12 = smov 111  }
  0x1a   : > { %s1734_s16 = smov 112   ;;  %s1735_s24 = smov 118  }
  0x1b   : > { %s1736_s15 = smov 119   ;;  %p588_p9 = scmp.lt.s32.totalorder %s1706_s17, 1 }
  0x1d   : > { %s2155_s17 = smov (!%p588_p9, %s1706_s17), 1 }
  0x8c   : > { %v617_v9 = vpop.permute.xlu1 %616 }
  0x8e   : > { %v609_v10 = vpop.permute.xlu0 %608 }
  0x8f   : > { %v611_v12 = vmul.f32 %v609_v10, %v604_v5  ;;  %v612_v13 = vmul.f32 %v609_v10, %v605_v6  ;;  %v1617_v6 = vcombine.high %v2019_v3, %v2019_v3 }
  0x90   : > { %v653_v26 = vpop.permute.xlu1 %652 }
  0x91   : > { %v619_v16 = vadd.f32 %v617_v9, %v611_v12  ;;  %v620_v17 = vadd.f32 %v617_v9, %v612_v13  ;;  %1619 = vmatprep.mubr.msk.bf16.mxu0 %vm1287_vm12, %v1617_v6  ;;  %vm740_vm12 = vcmask 1048512  }
  0x92   : > { %v645_v21 = vpop.permute.xlu0 %644 }
  0x93   : > { %v621_v22 = vmax.f32 %v619_v16, 0.0  ;;  %v622_v23 = vmax.f32 %v620_v17, 0.0  ;;  %v647_v24 = vmul.f32 %v645_v21, %v640_v14  ;;  %v648_v25 = vmul.f32 %v645_v21, %v641_v15 }
  0x95   : > { %v1878_v29 = vmul.f32 %v628_v18, %v621_v22  ;;  %v1880_v30 = vmul.f32 %v632_v19, %v622_v23  ;;  %v655_v31 = vadd.f32 %v653_v26, %v647_v24  ;;  %v656_v32 = vadd.f32 %v653_v26, %v648_v25 }
  0x97   : > { %v657_v33 = vmax.f32 %v655_v31, 0.0  ;;  %v658_v34 = vmax.f32 %v656_v32, 0.0  ;;  %979 = vrot.lane.b32.xlu1 %v1880_v30, %s1725_s4  ;;  %958 = vrot.lane.b32.xlu0 %v1880_v30, %s1726_s5 }
  0x99   : > { %v1884_v35 = vmul.f32 %v664_v27, %v657_v33  ;;  %v1886_v36 = vmul.f32 %v668_v28, %v658_v34 }
  0x9b   : > { %968 = vrot.lane.b32.xlu1 %v1884_v35, %s1726_s5  ;;  %956 = vrot.lane.b32.xlu0 %v1878_v29, %s1726_s5  ;;  %s1738_s5 = smov 126  }
  0x9f   : > { %989 = vrot.lane.b32.xlu1 %v1884_v35, %s1725_s4  ;;  %977 = vrot.lane.b32.xlu0 %v1878_v29, %s1725_s4  ;;  %s1737_s4 = smov 120  }
  0xa3   : > { %937 = vrot.lane.b32.xlu1 %v1880_v30, %s1727_s23  ;;  %916 = vrot.lane.b32.xlu0 %v1880_v30, %s1728_s30 }
  0xa7   : > { %926 = vrot.lane.b32.xlu1 %v1884_v35, %s1728_s30  ;;  %914 = vrot.lane.b32.xlu0 %v1878_v29, %s1728_s30  ;;  %s1740_s30 = smov 47  }
  0xab   : > { %947 = vrot.lane.b32.xlu1 %v1884_v35, %s1727_s23  ;;  %935 = vrot.lane.b32.xlu0 %v1878_v29, %s1727_s23  ;;  %s1739_s23 = smov 127  }
  0xaf   : > { %895 = vrot.lane.b32.xlu1 %v1880_v30, %s1729_s25  ;;  %874 = vrot.lane.b32.xlu0 %v1880_v30, %s1730_s26 }
  0xb3   : > { %884 = vrot.lane.b32.xlu1 %v1884_v35, %s1730_s26  ;;  %872 = vrot.lane.b32.xlu0 %v1878_v29, %s1730_s26 }
  0xb7   : > { %905 = vrot.lane.b32.xlu1 %v1884_v35, %s1729_s25  ;;  %893 = vrot.lane.b32.xlu0 %v1878_v29, %s1729_s25  ;;  %s1741_s25 = smov 46  }
  0xbb   : > { %853 = vrot.lane.b32.xlu1 %v1880_v30, %s1731_s27  ;;  %832 = vrot.lane.b32.xlu0 %v1880_v30, %s1732_s28 }
  0xbf   : > { %842 = vrot.lane.b32.xlu1 %v1884_v35, %s1732_s28  ;;  %830 = vrot.lane.b32.xlu0 %v1878_v29, %s1732_s28 }
  0xc3   : > { %863 = vrot.lane.b32.xlu1 %v1884_v35, %s1731_s27  ;;  %851 = vrot.lane.b32.xlu0 %v1878_v29, %s1731_s27 }
  0xc7   : > { %811 = vrot.lane.b32.xlu1 %v1880_v30, %s1733_s12  ;;  %790 = vrot.lane.b32.xlu0 %v1880_v30, %s1734_s16 }
  0xcb   : > { %800 = vrot.lane.b32.xlu1 %v1884_v35, %s1734_s16  ;;  %788 = vrot.lane.b32.xlu0 %v1878_v29, %s1734_s16 }
  0xcf   : > { %821 = vrot.lane.b32.xlu1 %v1884_v35, %s1733_s12  ;;  %809 = vrot.lane.b32.xlu0 %v1878_v29, %s1733_s12 }
  0xd3   : > { %769 = vrot.lane.b32.xlu1 %v1880_v30, %s1735_s24  ;;  %748 = vrot.lane.b32.xlu0 %v1880_v30, %s1736_s15 }
  0xd7   : > { %758 = vrot.lane.b32.xlu1 %v1884_v35, %s1736_s15  ;;  %746 = vrot.lane.b32.xlu0 %v1878_v29, %s1736_s15 }
  0xdb   : > { %779 = vrot.lane.b32.xlu1 %v1884_v35, %s1735_s24  ;;  %767 = vrot.lane.b32.xlu0 %v1878_v29, %s1735_s24 }
  0xdf   : > { %727 = vrot.lane.b32.xlu1 %v1880_v30, %s1737_s4  ;;  %706 = vrot.lane.b32.xlu0 %v1880_v30, %s1738_s5 }
  0xe3   : > { %716 = vrot.lane.b32.xlu1 %v1884_v35, %s1738_s5  ;;  %704 = vrot.lane.b32.xlu0 %v1878_v29, %s1738_s5 }
  0xe7   : > { %737 = vrot.lane.b32.xlu1 %v1884_v35, %s1737_s4  ;;  %725 = vrot.lane.b32.xlu0 %v1878_v29, %s1737_s4 }
  0xeb   : > { %683 = vrot.lane.b32.xlu1 %v1878_v29, %s1739_s23  ;;  %685 = vrot.lane.b32.xlu0 %v1880_v30, %s1739_s23 }
  0xef   : > { %1175 = vrot.lane.b32.xlu1 %v1880_v30, %s1732_s28  ;;  %695 = vrot.lane.b32.xlu0 %v1884_v35, %s1739_s23 }
  0xf3   : > { %1185 = vrot.lane.b32.xlu1 %v1886_v36, %s1732_s28  ;;  %1183 = vrot.lane.b32.xlu0 %v1884_v35, %s1732_s28 }
  0xf7   : > { %1147 = vrot.lane.b32.xlu1 %v1886_v36, %s1734_s16  ;;  %1145 = vrot.lane.b32.xlu0 %v1884_v35, %s1734_s16 }
  0xfb   : > { %1166 = vrot.lane.b32.xlu1 %v1886_v36, %s1733_s12  ;;  %1164 = vrot.lane.b32.xlu0 %v1884_v35, %s1733_s12 }
  0xff   : > { %1156 = vrot.lane.b32.xlu1 %v1880_v30, %s1733_s12  ;;  %1137 = vrot.lane.b32.xlu0 %v1880_v30, %s1734_s16 }
 0x103   : > { %1109 = vrot.lane.b32.xlu1 %v1886_v36, %s1736_s15  ;;  %1107 = vrot.lane.b32.xlu0 %v1884_v35, %s1736_s15 }
 0x107   : > { %1128 = vrot.lane.b32.xlu1 %v1886_v36, %s1735_s24  ;;  %1126 = vrot.lane.b32.xlu0 %v1884_v35, %s1735_s24 }
 0x109   : > { %v980_v37 = vpop.permute.xlu1 %979  ;;  %v959_v38 = vpop.permute.xlu0 %958 }
 0x10a   : > { %986 = vst.msk [vmem:[#allocation2 + $0xf8] sm:$0xff] %vm981_vm0, %v980_v37 }
 0x10b   : > { %965 = vst.msk [vmem:[#allocation2 + $0xe8] sm:$0xff] %vm960_vm1, %v959_v38  ;;  %1118 = vrot.lane.b32.xlu1 %v1880_v30, %s1735_s24  ;;  %1099 = vrot.lane.b32.xlu0 %v1880_v30, %s1736_s15  ;;  %s574_s15 = scalar_lea.vmem %s2124_s8, %s2151_s29  ;;  %s1612_s29 = sshll.u32 %s2149_s18, 1 }
 0x10c   : > { %s591_s13 = sadd.s32 %s1612_s29, %s2155_s17 }
 0x10d   : > { %v969_v39 = vpop.permute.xlu1 %968  ;;  %v957_v40 = vpop.permute.xlu0 %956 }
 0x10e   : > { %972 = vst.msk [vmem:[#allocation2 + $0xe8] sm:$0xff] %vm971_vm2, %v969_v39  ;;  %v961_v41 = vsel %vm960_vm1, %v957_v40, %v959_v38  ;;  %vm813_vm1 = vcmask 908288   ;;  %vm792_vm2 = vcmask 916480  }
 0x10f   : > { %1071 = vrot.lane.b32.xlu1 %v1886_v36, %s1738_s5  ;;  %1069 = vrot.lane.b32.xlu0 %v1884_v35, %s1738_s5 }
 0x111   : > { %v990_v42 = vpop.permute.xlu1 %989  ;;  %v978_v43 = vpop.permute.xlu0 %977 }
 0x112   : > { %993 = vst.msk [vmem:[#allocation2 + $0xf8] sm:$0xff] %vm992_vm3, %v990_v42  ;;  %v982_v44 = vsel %vm981_vm0, %v978_v43, %v980_v37  ;;  %vm866_vm0 = vcmask 1048064   ;;  %vm803_vm3 = vcmask 1048448  }
 0x113   : > { %1090 = vrot.lane.b32.xlu1 %v1886_v36, %s1737_s4  ;;  %1088 = vrot.lane.b32.xlu0 %v1884_v35, %s1737_s4  ;;  %v1261_v53 = vpack.c.bf16 %v982_v44, %v961_v41 }
 0x115   : > { %v938_v45 = vpop.permute.xlu1 %937  ;;  %v917_v46 = vpop.permute.xlu0 %916  ;;  %v1222_v49 = vld [vmem:[#allocation2 + $0xe8] sm:$0xff] }
 0x116   : > { %944 = vst.msk [vmem:[#allocation2 + $0xd8] sm:$0xff] %vm939_vm4, %v938_v45 }
 0x117   : > { %923 = vst.msk [vmem:[#allocation2 + $0xc8] sm:$0xff] %vm918_vm5, %v917_v46  ;;  %1080 = vrot.lane.b32.xlu1 %v1880_v30, %s1737_s4  ;;  %1061 = vrot.lane.b32.xlu0 %v1880_v30, %s1738_s5 }
 0x119   : > { %v927_v47 = vpop.permute.xlu1 %926  ;;  %v915_v48 = vpop.permute.xlu0 %914  ;;  %v1224_v50 = vld [vmem:[#allocation2 + $0xf8] sm:$0xff] }
 0x11a   : > { %930 = vst.msk [vmem:[#allocation2 + $0xc8] sm:$0xff] %vm929_vm6, %v927_v47  ;;  %v919_v51 = vsel %vm918_vm5, %v915_v48, %v917_v46  ;;  %v1262_v52 = vpack.c.bf16 %v1224_v50, %v1222_v49  ;;  %vm771_vm5 = vcmask 965632   ;;  %vm750_vm6 = vcmask 973824  }
 0x11b   : > { %1052 = vrot.lane.b32.xlu1 %v1886_v36, %s1739_s23  ;;  %1050 = vrot.lane.b32.xlu0 %v1884_v35, %s1739_s23 }
 0x11c   : > { %1298 = vmatprep.subr.bf16.mxu0 %v1262_v52 }
 0x11d   : > { %v948_v54 = vpop.permute.xlu1 %947  ;;  %1299 = vmatpush1.bf16.msra.mxu0 %v1261_v53  ;;  %v936_v55 = vpop.permute.xlu0 %935 }
 0x11e   : > { %951 = vst.msk [vmem:[#allocation2 + $0xd8] sm:$0xff] %vm950_vm7, %v948_v54  ;;  %v940_v56 = vsel %vm939_vm4, %v936_v55, %v938_v45  ;;  %vm824_vm4 = vcmask 1048440   ;;  %vm761_vm7 = vcmask 1048504  }
 0x11f   : > { %1000 = vrot.lane.b32.xlu1 %v1880_v30, %s1740_s30  ;;  %1042 = vrot.lane.b32.xlu0 %v1880_v30, %s1739_s23  ;;  %v1259_v1 = vpack.c.bf16 %v940_v56, %v919_v51  ;;  %s584_s23 = scalar_lea.vmem %s2125_s9, %s1602_s14  ;;  %s1613_s14 = sshll.u32 %s591_s13, 3 }
 0x120   : > { %s593_s26 = scalar_lea.vmem %s2126_s10, %s1613_s14  ;;  %s601_s12 = scalar_lea.vmem %s2127_s11, %s1613_s14 }
 0x121   : > { %v896_v57 = vpop.permute.xlu1 %895  ;;  %v875_v58 = vpop.permute.xlu0 %874  ;;  %v1218_v61 = vld [vmem:[#allocation2 + $0xc8] sm:$0xff] }
 0x122   : > { %902 = vst.msk [vmem:[#allocation2 + $0xb8] sm:$0xff] %vm897_vm8, %v896_v57 }
 0x123   : > { %881 = vst.msk [vmem:[#allocation2 + $0xa8] sm:$0xff] %vm876_vm9, %v875_v58  ;;  %998 = vrot.lane.b32.xlu1 %v1878_v29, %s1740_s30  ;;  %1021 = vrot.lane.b32.xlu0 %v1880_v30, %s1741_s25 }
 0x125   : > { %v885_v59 = vpop.permute.xlu1 %884  ;;  %v873_v60 = vpop.permute.xlu0 %872  ;;  %v1220_v62 = vld [vmem:[#allocation2 + $0xd8] sm:$0xff] }
 0x126   : > { %888 = vst.msk [vmem:[#allocation2 + $0xa8] sm:$0xff] %vm887_vm10, %v885_v59  ;;  %v877_v63 = vsel %vm876_vm9, %v873_v60, %v875_v58  ;;  %v1260_v0 = vpack.c.bf16 %v1220_v62, %v1218_v61  ;;  %vm729_vm9 = vcmask 982016   ;;  %vm708_vm10 = vcmask 1031168  }
 0x127   : > { %1019 = vrot.lane.b32.xlu1 %v1878_v29, %s1741_s25  ;;  %1010 = vrot.lane.b32.xlu0 %v1884_v35, %s1740_s30 }
 0x128   : > { %1300 = vmatprep.subr.bf16.mxu0 %v1260_v0 }
 0x129   : > { %v906_v4 = vpop.permute.xlu1 %905  ;;  %1301 = vmatpush1.bf16.msra.mxu0 %v1259_v1  ;;  %v894_v5 = vpop.permute.xlu0 %893 }
 0x12a   : > { %909 = vst.msk [vmem:[#allocation2 + $0xb8] sm:$0xff] %vm908_vm11, %v906_v4  ;;  %v898_v9 = vsel %vm897_vm8, %v894_v5, %v896_v57  ;;  %vm782_vm8 = vcmask 1048496   ;;  %vm719_vm11 = vcmask 1048560  }
 0x12b   : > { %1278 = vperm.xlu1 %1681, %v1275_v2   ;;  %1031 = vrot.lane.b32.xlu0 %v1884_v35, %s1741_s25  ;;  %v1257_v18 = vpack.c.bf16 %v898_v9, %v877_v63 }
 0x12d   : > { %v854_v10 = vpop.permute.xlu1 %853  ;;  %v833_v11 = vpop.permute.xlu0 %832  ;;  %v1214_v14 = vld [vmem:[#allocation2 + $0xa8] sm:$0xff] }
 0x12e   : > { %860 = vst.msk [vmem:[#allocation2 + $0x98] sm:$0xff] %vm855_vm13, %v854_v10 }
 0x12f   : > { %839 = vst.msk [vmem:[#allocation2 + $0x88] sm:$0xff] %vm834_vm14, %v833_v11 }
 0x131   : > { %v843_v12 = vpop.permute.xlu1 %842  ;;  %v831_v13 = vpop.permute.xlu0 %830  ;;  %v1216_v15 = vld [vmem:[#allocation2 + $0xb8] sm:$0xff] }
 0x132   : > { %846 = vst.msk [vmem:[#allocation2 + $0x88] sm:$0xff] %vm845_vm15, %v843_v12  ;;  %v835_v16 = vsel %vm834_vm14, %v831_v13, %v833_v11  ;;  %v1258_v17 = vpack.c.bf16 %v1216_v15, %v1214_v14 }
 0x134   : > { %1302 = vmatprep.subr.bf16.mxu0 %v1258_v17 }
 0x135   : > { %v864_v19 = vpop.permute.xlu1 %863  ;;  %1303 = vmatpush1.bf16.msra.mxu0 %v1257_v18  ;;  %v852_v20 = vpop.permute.xlu0 %851 }
 0x136   : > { %867 = vst.msk [vmem:[#allocation2 + $0x98] sm:$0xff] %vm866_vm0, %v864_v19  ;;  %v856_v21 = vsel %vm855_vm13, %v852_v20, %v854_v10  ;;  %vm687_vm13 = vcmask 1039360   ;;  %vm2128_vm0 = vcmask 1048568  }
 0x137   : > { %v1255_v32 = vpack.c.bf16 %v856_v21, %v835_v16 }
 0x139   : > { %v812_v22 = vpop.permute.xlu1 %811  ;;  %v791_v23 = vpop.permute.xlu0 %790  ;;  %v1210_v26 = vld [vmem:[#allocation2 + $0x88] sm:$0xff] }
 0x13a   : > { %818 = vst.msk [vmem:[#allocation2 + $0x78] sm:$0xff] %vm813_vm1, %v812_v22 }
 0x13b   : > { %797 = vst.msk [vmem:[#allocation2 + $0x68] sm:$0xff] %vm792_vm2, %v791_v23 }
 0x13d   : > { %v801_v24 = vpop.permute.xlu1 %800  ;;  %v789_v25 = vpop.permute.xlu0 %788  ;;  %v1212_v27 = vld [vmem:[#allocation2 + $0x98] sm:$0xff] }
 0x13e   : > { %804 = vst.msk [vmem:[#allocation2 + $0x68] sm:$0xff] %vm803_vm3, %v801_v24  ;;  %v793_v28 = vsel %vm792_vm2, %v789_v25, %v791_v23  ;;  %v1256_v31 = vpack.c.bf16 %v1212_v27, %v1210_v26 }
 0x140   : > { %1304 = vmatprep.subr.bf16.mxu0 %v1256_v31 }
 0x141   : > { %v822_v33 = vpop.permute.xlu1 %821  ;;  %1305 = vmatpush1.bf16.msra.mxu0 %v1255_v32  ;;  %v810_v34 = vpop.permute.xlu0 %809 }
 0x142   : > { %825 = vst.msk [vmem:[#allocation2 + $0x78] sm:$0xff] %vm824_vm4, %v822_v33  ;;  %v814_v36 = vsel %vm813_vm1, %v810_v34, %v812_v22 }
 0x143   : > { %v1253_v45 = vpack.c.bf16 %v814_v36, %v793_v28 }
 0x145   : > { %v770_v37 = vpop.permute.xlu1 %769  ;;  %v749_v38 = vpop.permute.xlu0 %748  ;;  %v1206_v41 = vld [vmem:[#allocation2 + $0x68] sm:$0xff] }
 0x146   : > { %776 = vst.msk [vmem:[#allocation2 + $0x58] sm:$0xff] %vm771_vm5, %v770_v37 }
 0x147   : > { %755 = vst.msk [vmem:[#allocation2 + $0x48] sm:$0xff] %vm750_vm6, %v749_v38 }
 0x149   : > { %v759_v39 = vpop.permute.xlu1 %758  ;;  %v747_v40 = vpop.permute.xlu0 %746  ;;  %v1208_v42 = vld [vmem:[#allocation2 + $0x78] sm:$0xff] }
 0x14a   : > { %762 = vst.msk [vmem:[#allocation2 + $0x48] sm:$0xff] %vm761_vm7, %v759_v39  ;;  %v751_v43 = vsel %vm750_vm6, %v747_v40, %v749_v38  ;;  %v1254_v44 = vpack.c.bf16 %v1208_v42, %v1206_v41 }
 0x14c   : > { %1306 = vmatprep.subr.bf16.mxu0 %v1254_v44 }
 0x14d   : > { %v780_v46 = vpop.permute.xlu1 %779  ;;  %1307 = vmatpush1.bf16.msra.mxu0 %v1253_v45  ;;  %v768_v47 = vpop.permute.xlu0 %767 }
 0x14e   : > { %783 = vst.msk [vmem:[#allocation2 + $0x58] sm:$0xff] %vm782_vm8, %v780_v46  ;;  %v772_v48 = vsel %vm771_vm5, %v768_v47, %v770_v37 }
 0x14f   : > { %v1251_v57 = vpack.c.bf16 %v772_v48, %v751_v43 }
 0x151   : > { %v728_v49 = vpop.permute.xlu1 %727  ;;  %v707_v50 = vpop.permute.xlu0 %706  ;;  %v1202_v53 = vld [vmem:[#allocation2 + $0x48] sm:$0xff] }
 0x152   : > { %734 = vst.msk [vmem:[#allocation2 + $0x38] sm:$0xff] %vm729_vm9, %v728_v49 }
 0x153   : > { %713 = vst.msk [vmem:[#allocation2 + $0x28] sm:$0xff] %vm708_vm10, %v707_v50 }
 0x155   : > { %v717_v51 = vpop.permute.xlu1 %716  ;;  %v705_v52 = vpop.permute.xlu0 %704  ;;  %v1204_v54 = vld [vmem:[#allocation2 + $0x58] sm:$0xff] }
 0x156   : > { %720 = vst.msk [vmem:[#allocation2 + $0x28] sm:$0xff] %vm719_vm11, %v717_v51  ;;  %v709_v55 = vsel %vm708_vm10, %v705_v52, %v707_v50  ;;  %v1252_v56 = vpack.c.bf16 %v1204_v54, %v1202_v53 }
 0x158   : > { %1308 = vmatprep.subr.bf16.mxu0 %v1252_v56 }
 0x159   : > { %v738_v58 = vpop.permute.xlu1 %737  ;;  %1309 = vmatpush1.bf16.msra.mxu0 %v1251_v57  ;;  %v726_v59 = vpop.permute.xlu0 %725 }
 0x15a   : > { %741 = vst.msk [vmem:[#allocation2 + $0x38] sm:$0xff] %vm740_vm12, %v738_v58  ;;  %v730_v60 = vsel %vm729_vm9, %v726_v59, %v728_v49 }
 0x15b   : > { %v1249_v6 = vpack.c.bf16 %v730_v60, %v709_v55 }
 0x15d   : > { %v684_v61 = vpop.permute.xlu1 %683  ;;  %v686_v62 = vpop.permute.xlu0 %685  ;;  %v1198_v2 = vld [vmem:[#allocation2 + $0x28] sm:$0xff] }
 0x15e   : > { %v688_v63 = vsel %vm687_vm13, %v684_v61, %v686_v62  ;;  %692 = vst.msk [vmem:[#allocation2 + $0x18] sm:$0xff] %vm687_vm13, %v686_v62 }
 0x15f   : > { %v1247_v17 = vpack.c.bf16 %v688_v63, %v1878_v29 }
 0x161   : > { %v1176_v0 = vpop.permute.xlu1 %1175  ;;  %v696_v1 = vpop.permute.xlu0 %695  ;;  %v1200_v4 = vld [vmem:[#allocation2 + $0x38] sm:$0xff] }
 0x162   : > { %1178 = vst.msk [vmem:[#allocation2 + $0x1a0] sm:$0xff] %vm834_vm14, %v1176_v0  ;;  %v1250_v5 = vpack.c.bf16 %v1200_v4, %v1198_v2 }
 0x163   : > { %699 = vst.msk [vmem:[#allocation2 + $0x18] sm:$0xff] %vm2128_vm0, %v696_v1  ;;  %vm1291_vm0 = vcmask 1043456  }
 0x164   : > { %1310 = vmatprep.subr.bf16.mxu0 %v1250_v5 }
 0x165   : > { %v1186_v9 = vpop.permute.xlu1 %1185  ;;  %1311 = vmatpush1.bf16.msra.mxu0 %v1249_v6  ;;  %v1184_v10 = vpop.permute.xlu0 %1183 }
 0x166   : > { %v1187_v11 = vsel %vm834_vm14, %v1184_v10, %v1186_v9  ;;  %1190 = vst.msk [vmem:[#allocation2 + $0x1a0] sm:$0xff] %vm845_vm15, %v1184_v10  ;;  %vm1002_vm14 = vcmask 384000   ;;  %vm2134_vm15 = vcmask 1048568  }
 0x167   : > { %v1274_v18 = vpack.c.bf16 %v1187_v11, %v1187_v11 }
 0x169   : > { %v1148_v12 = vpop.permute.xlu1 %1147  ;;  %v1146_v13 = vpop.permute.xlu0 %1145 }
 0x16a   : > { %v1196_v14 = vld [vmem:[#allocation2 + $0x18] sm:$0xff]  ;;  %v1149_v15 = vsel %vm792_vm2, %v1146_v13, %v1148_v12 }
 0x16b   : > { %v1248_v16 = vpack.c.bf16 %v1196_v14, %v1880_v30  ;;  %v1616_v14 = vcombine.low %v2019_v3, %v2019_v3 }
 0x16d   : > { %1312 = vmatprep.subr.bf16.mxu0 %v1248_v16  ;;  %v1167_v19 = vpop.permute.xlu1 %1166  ;;  %v1165_v20 = vpop.permute.xlu0 %1164  ;;  %v1245_v21 = vld [vmem:[#allocation2 + $0x1a0] sm:$0xff] }
 0x16e   : > { %1313 = vmatpush1.bf16.msra.mxu0 %v1247_v17  ;;  %v1168_v22 = vsel %vm813_vm1, %v1165_v20, %v1167_v19  ;;  %v1273_v23 = vpack.c.bf16 %v1245_v21, %v1245_v21 }
 0x16f   : > { %1618 = vmatprep.subr.msk.bf16.mxu0 %vm1291_vm0, %v1274_v18  ;;  %v1272_v24 = vpack.c.bf16 %v1168_v22, %v1149_v15  ;;  %v1341_v15 = vld [vmem:[%s574_s15] sm:$0x3] }
 0x170   : > { %v1293_v25 = vsel %vm1291_vm0, %v1273_v23, 0  ;;  %v1350_v3 = vrot.slane %v1341_v15, %v1866_v8 }
 0x171   : > { %v1157_v26 = vpop.permute.xlu1 %1156  ;;  %v1138_v27 = vpop.permute.xlu0 %1137 }
 0x172   : > { %1319 = vmatpush2.bf16.msra.mxu0 %v1293_v25  ;;  %1159 = vst.msk [vmem:[#allocation2 + $0x190] sm:$0xff] %vm813_vm1, %v1157_v26  ;;  %vm1023_vm1 = vcmask 375808  }
 0x173   : > { %1140 = vst.msk [vmem:[#allocation2 + $0x180] sm:$0xff] %vm792_vm2, %v1138_v27  ;;  %1320 = vmatprep.subr.bf16.mxu0 %v1272_v24  ;;  %vm1013_vm2 = vcmask 1047928  }
 0x174   : > { %1171 = vst.msk [vmem:[#allocation2 + $0x190] sm:$0xff] %vm824_vm4, %v1165_v20  ;;  %vm1358_vm4 = vcmask 7168  }
 0x175   : > { %1152 = vst.msk [vmem:[#allocation2 + $0x180] sm:$0xff] %vm803_vm3, %v1146_v13  ;;  %v1110_v29 = vpop.permute.xlu1 %1109  ;;  %v1108_v28 = vpop.permute.xlu0 %1107  ;;  %vm1034_vm3 = vcmask 1047920  }
 0x176   : > { %v1111_v31 = vsel %vm750_vm6, %v1108_v28, %v1110_v29 }
 0x179   : > { %v1129_v32 = vpop.permute.xlu1 %1128  ;;  %v1127_v33 = vpop.permute.xlu0 %1126 }
 0x17a   : > { %v1130_v34 = vsel %vm771_vm5, %v1127_v33, %v1129_v32 }
 0x17b   : > { %v1243_v37 = vld [vmem:[#allocation2 + $0x190] sm:$0xff]  ;;  %v1270_v39 = vpack.c.bf16 %v1130_v34, %v1111_v31 }
 0x17c   : > { %v1241_v36 = vld [vmem:[#allocation2 + $0x180] sm:$0xff] }
 0x17d   : > { %v1271_v38 = vpack.c.bf16 %v1243_v37, %v1241_v36  ;;  %v1119_v40 = vpop.permute.xlu1 %1118  ;;  %v1100_v41 = vpop.permute.xlu0 %1099 }
 0x17e   : > { %1121 = vst.msk [vmem:[#allocation2 + $0x170] sm:$0xff] %vm771_vm5, %v1119_v40 }
 0x17f   : > { %1321 = vmatpush2.bf16.msra.mxu0 %v1271_v38  ;;  %1102 = vst.msk [vmem:[#allocation2 + $0x160] sm:$0xff] %vm750_vm6, %v1100_v41 }
 0x180   : > { %1322 = vmatprep.subr.bf16.mxu0 %v1270_v39  ;;  %1133 = vst.msk [vmem:[#allocation2 + $0x170] sm:$0xff] %vm782_vm8, %v1127_v33 }
 0x181   : > { %1114 = vst.msk [vmem:[#allocation2 + $0x160] sm:$0xff] %vm761_vm7, %v1108_v28  ;;  %v1072_v42 = vpop.permute.xlu1 %1071  ;;  %v1070_v43 = vpop.permute.xlu0 %1069 }
 0x182   : > { %v1073_v44 = vsel %vm708_vm10, %v1070_v43, %v1072_v42 }
 0x185   : > { %v1091_v45 = vpop.permute.xlu1 %1090  ;;  %v1089_v46 = vpop.permute.xlu0 %1088 }
 0x186   : > { %v1092_v47 = vsel %vm729_vm9, %v1089_v46, %v1091_v45 }
 0x187   : > { %v1239_v49 = vld [vmem:[#allocation2 + $0x170] sm:$0xff]  ;;  %v1268_v51 = vpack.c.bf16 %v1092_v47, %v1073_v44 }
 0x188   : > { %v1237_v48 = vld [vmem:[#allocation2 + $0x160] sm:$0xff] }
 0x189   : > { %v1269_v50 = vpack.c.bf16 %v1239_v49, %v1237_v48  ;;  %v1081_v52 = vpop.permute.xlu1 %1080  ;;  %v1062_v53 = vpop.permute.xlu0 %1061 }
 0x18a   : > { %1083 = vst.msk [vmem:[#allocation2 + $0x150] sm:$0xff] %vm729_vm9, %v1081_v52 }
 0x18b   : > { %1323 = vmatpush2.bf16.msra.mxu0 %v1269_v50  ;;  %1064 = vst.msk [vmem:[#allocation2 + $0x140] sm:$0xff] %vm708_vm10, %v1062_v53 }
 0x18c   : > { %1324 = vmatprep.subr.bf16.mxu0 %v1268_v51  ;;  %1095 = vst.msk [vmem:[#allocation2 + $0x150] sm:$0xff] %vm740_vm12, %v1089_v46 }
 0x18d   : > { %1076 = vst.msk [vmem:[#allocation2 + $0x140] sm:$0xff] %vm719_vm11, %v1070_v43  ;;  %v1053_v54 = vpop.permute.xlu1 %1052  ;;  %v1051_v55 = vpop.permute.xlu0 %1050 }
 0x18e   : > { %v1054_v56 = vsel %vm687_vm13, %v1051_v55, %v1053_v54 }
 0x18f   : > { %v1266_v62 = vpack.c.bf16 %v1054_v56, %v1884_v35 }
 0x191   : > { %v1001_v57 = vpop.permute.xlu1 %1000  ;;  %v1043_v58 = vpop.permute.xlu0 %1042 }
 0x192   : > { %1007 = vst.msk [vmem:[#allocation2 + $0x108] sm:$0xff] %vm1002_vm14, %v1001_v57 }
 0x193   : > { %1045 = vst.msk [vmem:[#allocation2 + $0x130] sm:$0xff] %vm687_vm13, %v1043_v58  ;;  %v1235_v60 = vld [vmem:[#allocation2 + $0x150] sm:$0xff] }
 0x194   : > { %v1233_v59 = vld [vmem:[#allocation2 + $0x140] sm:$0xff]  ;;  %1057 = vst.msk [vmem:[#allocation2 + $0x130] sm:$0xff] %vm2134_vm15, %v1051_v55 }
 0x195   : > { %v1267_v61 = vpack.c.bf16 %v1235_v60, %v1233_v59  ;;  %v999_v63 = vpop.permute.xlu1 %998  ;;  %v1022_v0 = vpop.permute.xlu0 %1021 }
 0x196   : > { %v1003_v1 = vsel %vm1002_vm14, %v999_v63, %v1001_v57  ;;  %1028 = vst.msk [vmem:[#allocation2 + $0x118] sm:$0xff] %vm1023_vm1, %v1022_v0 }
 0x197   : > { %1325 = vmatpush2.bf16.msra.mxu0 %v1267_v61 }
 0x198   : > { %1326 = vmatprep.subr.bf16.mxu0 %v1266_v62 }
 0x199   : > { %v1020_v2 = vpop.permute.xlu1 %1019  ;;  %v1011_v4 = vpop.permute.xlu0 %1010 }
 0x19a   : > { %v1024_v5 = vsel %vm1023_vm1, %v1020_v2, %v1022_v0  ;;  %1014 = vst.msk [vmem:[#allocation2 + $0x108] sm:$0xff] %vm1013_vm2, %v1011_v4 }
 0x19b   : > { %v1231_v6 = vld [vmem:[#allocation2 + $0x130] sm:$0xff]  ;;  %v1263_v13 = vpack.c.bf16 %v1024_v5, %v1003_v1 }
 0x19c   : > { %v1265_v9 = vpack.c.bf16 %v1231_v6, %v1880_v30  ;;  %v1346_v30 = vrot.slane %v1341_v15, %v1864_v7 }
 0x19d   : > { %v1032_v10 = vpop.permute.xlu0 %1031 }
 0x19e   : > { %1327 = vmatpush2.bf16.msra.mxu0 %v1265_v9  ;;  %1035 = vst.msk [vmem:[#allocation2 + $0x118] sm:$0xff] %vm1034_vm3, %v1032_v10 }
 0x1a1   : > { %v1226_v35 = vld [vmem:[#allocation2 + $0x108] sm:$0xff] }
 0x1a5   : > { %v1228_v11 = vld [vmem:[#allocation2 + $0x118] sm:$0xff] }
 0x1a6   : > { %v1264_v12 = vpack.c.bf16 %v1228_v11, %v1226_v35  ;;  %v1279_v16 = vpop.permute.xlu1 %1278 }
 0x1a8   : > { %1328 = vmatprep.subr.bf16.mxu0 %v1264_v12 }
 0x1a9   : > { %1329 = vmatpush2.bf16.msra.mxu0 %v1263_v13 }
 0x1ac   : > { %1331 = vmatmul.mubr.bf16.vlgmr.msra.gmra.mxu0 %v1616_v14 }
 0x26c   : > { %v1332_v17 = vpop.f32.mrf.mxu0 }
 0x26d   : > { %v1333_v18 = vadd.f32 %v1332_v17, %v1279_v16 }
 0x26e   : > { %v1334_v19 = vpop.f32.mrf.mxu0 }
 0x26f   : > { %1339 = vst [vmem:[%s584_s23] sm:$0xff] %v1333_v18  ;;  %v1335_v20 = vadd.f32 %v1334_v19, %v1279_v16  ;;  %v1353_v21 = vmul.f32 %v1346_v30, %v1333_v18 }
 0x270   : > { %v1336_v22 = vpop.f32.mrf.mxu0 }
 0x271   : > { %1340 = vst [vmem:[%s584_s23 + $0x8] sm:$0xff] %v1335_v20  ;;  %v1354_v7 = vmul.f32 %v1350_v3, %v1335_v20  ;;  %v1360_v25 = vmul.f32 %v1353_v21, %v1333_v18 }
 0x272   : > { %v1337_v23 = vpop.f32.mrf.mxu0 }
 0x273   : > { %v1355_v24 = vadd.f32 %v1354_v7, %v1353_v21  ;;  %v1361_v26 = vmul.f32 %v1354_v7, %v1335_v20 }
 0x275   : > { %1356 = vadd.xlane.f32.xlu0 %v1355_v24  ;;  %v1362_v27 = vadd.f32 %v1361_v26, %v1360_v25 }
 0x277   : > { %1363 = vadd.xlane.f32.xlu1 %v1362_v27 }
 0x2fe   : > { %v1357_v8 = vpop.xlane.xlu0 %1356 }
 0x2ff   : > { %1359 = vst.msk [vmem:[%s593_s26] sm:$0xff] %vm1358_vm4, %v1357_v8 }
 0x300   : > { %v1364_v29 = vpop.xlane.xlu1 %1363 }
 0x301   : > { %1365 = vst.msk [vmem:[%s601_s12] sm:$0xff] %vm1358_vm4, %v1364_v29 }
 0x302 PF: > { %s22_s21 = sadd.s32 1, %s1722_s21   ;;  %s2135_s16 = sld [smem:[#allocation5_spill]] }
 0x303   : > { %p19_p10 = scmp.ge.s32.totalorder %s22_s21, 6   ;;  %s2136_s17 = smov %s1714_s19 }
 0x304   : > { %s2137_s18 = smov %s1718_s20  ;;  %s2138_s19 = smov %s2141_s22 }
 0x305   :  { %21 = sbr.rel (!%p19_p10) target bundleno = 4 (0x4), region = 122 }
 0x308   : > { %s2139_s20 = smov %s2135_s16 }

// kernel: res_block_up_3d_forward.5
= control target key start
LH: loop header
LB: loop body
LE: loop exit
PB: predicated region body
PF: predicated region fallthrough
CT: control target
= control target key end

     0   :  { %s2639_s0 = inlined_call_operand.vmem [shape: f32[2,8,512], index: 0, kind: input, shape index: {}, may-alias: {0,1}]   ;;  %s2640_s1 = inlined_call_operand.vmem [shape: f32[2,8,512], index: 1, kind: input, shape index: {}, may-alias: {0,1}]   ;;  %s2641_s2 = inlined_call_operand.vmem [shape: bf16[2,8,512], index: 2, kind: input, shape index: {}, may-alias: {2,3}]   ;;  %s2642_s3 = inlined_call_operand.vmem [shape: bf16[2,8,512], index: 3, kind: input, shape index: {}, may-alias: {2,3}]   ;;  %s2643_s4 = inlined_call_operand.vmem [shape: bf16[64,216], index: 4, kind: input, shape index: {}]   ;;  %s2644_s5 = inlined_call_operand.vmem [shape: f32[64,1], index: 5, kind: input, shape index: {}]   ;;  %s2645_s6 = inlined_call_operand.vmem [shape: f32[8,1], index: 6, kind: input, shape index: {}]   ;;  %s2646_s7 = inlined_call_operand.vmem [shape: f32[8,1], index: 7, kind: input, shape index: {}]   ;;  %s2647_s8 = inlined_call_operand.vmem [shape: f32[1,512], index: 8, kind: input, shape index: {}, may-alias: {8,9}]   ;;  %s2648_s9 = inlined_call_operand.vmem [shape: f32[1,512], index: 9, kind: input, shape index: {}, may-alias: {8,9}]   ;;  %s2649_s10 = inlined_call_operand.vmem [shape: bf16[8,8], index: 10, kind: input, shape index: {}]   ;;  %s2650_s11 = inlined_call_operand.vmem [shape: f32[2,64,512], index: 11, kind: output, shape index: {}]  }
   0x1   :  { %2660 = sst [smem:[#allocation8_spill]] %s2641_s2 }
   0x2   :  { %2661 = sst [smem:[#allocation9_spill]] %s2642_s3 }
   0x3   :  { %2662 = sst [smem:[#allocation10_spill]] %s2645_s6 }
   0x4   :  { %2663 = sst [smem:[#allocation11_spill]] %s2646_s7 }
   0x5   :  { %s2124_s17 = smov 0   ;;  %s2126_s18 = smov 0  }
   0x6   :  { %s2128_s19 = smov 0   ;;  %s2130_s20 = smov 0  }
   0x7   :  { %s2132_s21 = smov 0   ;;  %s2134_s22 = smov 0  }
   0x8   :  { %s2136_s23 = smov 0  }
   0x9 LB: > { %s30_s24 = sadd.s32 1, %s2036_s21  ;;  %s33_s25 = sadd.s32 1, %s2040_s22  ;;  %s2044_s23 = sphi %s2136_s23, %s21_s23   ;;  %s2040_s22 = sphi %s2134_s22, %s2685_s22   ;;  %s2036_s21 = sphi %s2132_s21, %s2684_s21   ;;  %s2032_s20 = sphi %s2130_s20, %s2683_s20   ;;  %s2028_s19 = sphi %s2128_s19, %s2682_s19   ;;  %s2024_s18 = sphi %s2126_s18, %s2681_s18   ;;  %s2020_s17 = sphi %s2124_s17, %s2680_s17  }
   0xa   : > { %p31_p0 = scmp.ge.s32.totalorder %s30_s24, 2  ;;  %s1823_s26 = sadd.s32 4294967295, %s2044_s23  }
   0xb   : > { %p339_p1 = scmp.ne.s32.totalorder %s2024_s18, %s2020_s17  ;;  %p340_p2 = scmp.eq.s32.totalorder %s1823_s26, 3 }
   0xc   : > { %s2687_s24 = smov (%p31_p0, %s30_s24), 0  ;;  %s2689_s25 = smov (!%p31_p0, %s33_s25), %s2040_s22 }
   0xd   : > { %2664 = sst [smem:[#allocation6_spill]] %s2687_s24  ;;  %s325_s27 = ssub.s32 %s2036_s21, %s2687_s24 }
   0xe   : > { %p35_p3 = scmp.ge.s32.totalorder %s2689_s25, 2  ;;  %p1827_p4 = scmp.ge.s32.totalorder %s2044_s23, 1 }
   0xf   : > { %p2170_p5 = por %p340_p2, %p339_p1  ;;  %p465_p6 = scmp.lt.s32.totalorder %s2044_s23, 5 }
  0x10   : > { %s2691_s25 = smov (%p35_p3, %s2689_s25), 0  ;;  %s329_s12 = sadd.s32 1, %s2024_s18 }
  0x11   : > { %2666 = sst [smem:[#allocation7_spill]] %s2691_s25  ;;  %p466_p7 = pnand %p1827_p4, %p465_p6 }
  0x12   : > { %s324_s29 = ssub.s32 %s2040_s22, %s2691_s25  ;;  %s2184_s14 = sshll.u32 (!%p466_p7), %s2028_s19, 1 }
  0x13   : > { %s326_s30 = sor.u32 %s325_s27, %s324_s29  ;;  %469 = sbr.rel (%p466_p7) target bundleno = 736 (0x2e0), region = 64 }
  0x14   : > { %p327_p8 = scmp.eq.s32.totalorder %s326_s30, 0  ;;  %p553_p9 = scmp.lt.s32.totalorder (!%p466_p7), %s2032_s20, 1 }
  0x15   : > { %p555_p10 = scmp.lt.s32.totalorder (!%p466_p7), %s2184_s14, 3  ;;  %s562_s15 = sadd.s32 (!%p466_p7), 1, %s2028_s19 }
  0x16   : > { %s2181_s13 = scalar_select %p327_p8, %s2024_s18, %s329_s12  }
  0x17   : > { %s2667_s6 = sld [smem:[#allocation10_spill]] (!%p466_p7)  ;;  %p563_p11 = scmp.lt.s32.totalorder (!%p466_p7), %s562_s15, 1 }
  0x18   : > { %v2046_v0 = vmov 0   ;;  %s2668_s7 = sld [smem:[#allocation11_spill]]  ;;  %vm633_vm0 = vcmask 1043456   ;;  %v622_v7 = vld [vmem:[%s2649_s10] sm:$0xf]  ;;  %vm629_vm1 = vcmask 64512   ;;  %v756_v12 = vlaneseq }
  0x19   : > { %672 = vmatprep.mubr.bf16.mxu0 %v2046_v0  ;;  %725 = vmatprep.mubr.bf16.mxu1 %v2046_v0  ;;  %s554_s30 = scalar_select %p553_p9, %s2032_s20, 1  ;;  %vm1112_vm2 = vcmask 392192   ;;  %vm1070_vm3 = vcmask 449536   ;;  %vm1028_vm4 = vcmask 506880   ;;  %vm986_vm5 = vcmask 523264  }
  0x1a   : > { %1972 = vset.pattern.permute.xlu0 %v2046_v0  ;;  %1973 = vset.pattern.permute.xlu1 %v2046_v0  ;;  %s2197_s12 = scalar_select %p555_p10, %s2184_s14, 3  ;;  %v757_v13 = vshrl.u32 %v756_v12, 7  ;;  %vm944_vm6 = vcmask 908288   ;;  %vm902_vm7 = vcmask 965632   ;;  %vm2658_vm8 = vcmask 982016  }
  0x1b   : > { %s1830_s25 = sshll.u32 %s554_s30, 2  ;;  %s2669_s2 = sld [smem:[#allocation8_spill]]  ;;  %vm965_vm9 = vcmask 900096   ;;  %vm2656_vm10 = vcmask 719872   ;;  %vm2657_vm11 = vcmask 384000   ;;  %vm1123_vm12 = vcmask 1047936  }
  0x1c   : > { %s2200_s19 = sadd.s32 %s1830_s25, %s2197_s12  ;;  %s2693_s15 = smov (!%p563_p11, %s562_s15), 1  ;;  %v762_v14 = vsub.s32 1, %v757_v13  ;;  %v758_v21 = vsub.s32 0, %v757_v13  ;;  %v1978_v13 = vld [vmem:[%s2643_s4 + $0x4] ss:$8 sps:$4 sm:$0xff]   ;;  %vm1091_vm13 = vcmask 441344  }
  0x1d   : > { %v734_v1 = vld [vmem:[%s2667_s6] sm:$0xff]  ;;  %s1837_s24 = sshll.u32 %s2200_s19, 2  ;;  %s1832_s27 = sshll.u32 %s2693_s15, 1  ;;  %vm1102_vm14 = vcmask 1047984   ;;  %vm1049_vm15 = vcmask 457728  }
  0x1e   : > { %v744_v2 = vld [vmem:[%s2668_s7] sm:$0xff]  ;;  %739 = vperm.xlu0 %1972, %v734_v1   ;;  %p568_p12 = scmp.lt.s32.totalorder %s1832_s27, 3  ;;  %s2670_s3 = sld [smem:[#allocation9_spill]] }
  0x1f   : > { %747 = vperm.xlu1 %1973, %v744_v2   ;;  %s607_s7 = scalar_lea.vmem %s2647_s8, %s2197_s12  ;;  %s2050_s12 = smov 55  }
  0x20   : > { %s2695_s27 = smov (!%p568_p12, %s1832_s27), 3  ;;  %v754_v23 = vld [vmem:[%s607_s7] sm:$0x3]  ;;  %s2049_s7 = smov 48  }
  0x21   : > { %s586_s6 = scalar_lea.vmem %s2669_s2, %s1837_s24  ;;  %s2211_s24 = sadd.s32 %s1830_s25, %s2695_s27  ;;  %v759_v26 = vrot.slane %v754_v23, %v758_v21  ;;  %v763_v30 = vrot.slane %v754_v23, %v762_v14 }
  0x22   : > { %775 = vperm.xlu0 %1972, %v734_v1   ;;  %v623_v3 = vld [vmem:[%s586_s6] sm:$0xff]  ;;  %s1840_s6 = sshll.u32 %s2211_s24, 2  ;;  %s615_s30 = scalar_lea.vmem %s2648_s9, %s2695_s27 }
  0x23   : > { %783 = vperm.xlu1 %1973, %v744_v2   ;;  %v1844_v4 = vcombine.high %v623_v3, %v623_v3  ;;  %v1843_v5 = vcombine.low %v623_v3, %v623_v3  ;;  %v790_v15 = vld [vmem:[%s615_s30] sm:$0x3]  ;;  %s1834_s25 = sshll.u32 %s2211_s24, 3  ;;  %s2653_s2 = smov 127  }
  0x24   : > { %s599_s26 = scalar_lea.vmem %s2670_s3, %s1840_s6  ;;  %v799_v16 = vrot.slane %v790_v15, %v762_v14  ;;  %s1831_s6 = sshll.u32 %s2200_s19, 3  ;;  %v795_v44 = vrot.slane %v790_v15, %v758_v21  ;;  %v1980_v14 = vld [vmem:[%s2643_s4 + $0x24] ss:$8 sps:$4 sm:$0xff]   ;;  %v1415_v15 = vld [vmem:[%s2644_s5 + $0x10] sm:$0xff]  ;;  %v1416_v21 = vld [vmem:[%s2644_s5 + $0x18] sm:$0xff] }
  0x25   : > { %1845 = vmatprep.subr.msk.bf16.mxu0 %vm633_vm0, %v1844_v4  ;;  %v635_v6 = vsel %vm633_vm0, %v1843_v5, 0  ;;  %v681_v8 = vld [vmem:[%s599_s26] sm:$0xff]  ;;  %s560_s26 = scalar_lea.vmem %s2639_s0, %s1831_s6  ;;  %s573_s29 = scalar_lea.vmem %s2640_s1, %s1834_s25 }
  0x26   : > { %655 = vmatpush1.bf16.msra.mxu0 %v635_v6  ;;  %v1848_v9 = vcombine.high %v681_v8, %v681_v8  ;;  %v1847_v10 = vcombine.low %v681_v8, %v681_v8  ;;  %v735_v17 = vld [vmem:[%s560_s26] sm:$0xff]  ;;  %v736_v20 = vld [vmem:[%s560_s26 + $0x8] sm:$0xff]  ;;  %s2048_s3 = smov 54   ;;  %s2051_s24 = smov 56  }
  0x27   : > { %v771_v32 = vld [vmem:[%s573_s29] sm:$0xff]  ;;  %v772_v36 = vld [vmem:[%s573_s29 + $0x8] sm:$0xff]  ;;  %s2052_s30 = smov 62   ;;  %s2655_s6 = smov 64  }
  0x28   : > { %1849 = vmatprep.subr.msk.bf16.mxu1 %vm633_vm0, %v1848_v9  ;;  %v688_v11 = vsel %vm633_vm0, %v1847_v10, 0  ;;  %s2054_s16 = smov 63   ;;  %s2055_s15 = smov 111   ;;  %v1413_v10 = vld [vmem:[%s2644_s5] sm:$0xff] }
  0x29   : > { %1846 = vmatmul.mubr.msk.bf16.vlgmr.msra.gmra.mxu0 %vm629_vm1, %v622_v7  ;;  %708 = vmatpush1.bf16.msra.mxu1 %v688_v11  ;;  %s2056_s26 = smov 118   ;;  %s2057_s25 = smov 110  }
  0x2a   : > { %s2058_s27 = smov 120   ;;  %s2059_s19 = smov 112   ;;  %1860 = vmatprep.mubr.msk.bf16.mxu0 %vm2656_vm10, %v1978_v13 }
  0x2b   : > { %s2060_s29 = smov 119  }
  0x2c   : > { %1850 = vmatmul.mubr.msk.bf16.vlgmr.msra.gmra.mxu1 %vm629_vm1, %v622_v7  ;;  %vm1060_vm1 = vcmask 1048000  }
  0x2d   : > { %1862 = vmatprep.mubr.msk.bf16.mxu1 %vm2656_vm10, %v1980_v14  ;;  %vm850_vm10 = vcmask 1048560  }
  0x99   : > { %v740_v18 = vpop.permute.xlu0 %739 }
  0x9a   : > { %v742_v19 = vmul.f32 %v740_v18, %v735_v17  ;;  %v748_v22 = vpop.permute.xlu1 %747  ;;  %v743_v24 = vmul.f32 %v740_v18, %v736_v20  ;;  %v1417_v20 = vld [vmem:[%s2644_s5 + $0x20] sm:$0xff] }
  0x9c   : > { %v750_v25 = vadd.f32 %v748_v22, %v742_v19  ;;  %v751_v28 = vadd.f32 %v748_v22, %v743_v24  ;;  %v1419_v24 = vld [vmem:[%s2644_s5 + $0x30] sm:$0xff] }
  0x9d   : > { %v776_v31 = vpop.permute.xlu0 %775 }
  0x9e   : > { %v778_v38 = vmul.f32 %v776_v31, %v771_v32  ;;  %v784_v40 = vpop.permute.xlu1 %783  ;;  %v779_v42 = vmul.f32 %v776_v31, %v772_v36 }
  0xa0   : > { %v786_v43 = vadd.f32 %v784_v40, %v778_v38  ;;  %v787_v46 = vadd.f32 %v784_v40, %v779_v42 }
  0xe9   : > { %v674_v27 = vpop.f32.mrf.mxu0 }
  0xea   : > { %v752_v29 = vadd.f32 %v750_v25, %v674_v27  ;;  %v1418_v25 = vld [vmem:[%s2644_s5 + $0x28] sm:$0xff] }
  0xeb   : > { %v676_v33 = vpop.f32.mrf.mxu0 }
  0xec   : > { %v2234_v34 = vmul.f32 %v759_v26, %v752_v29  ;;  %v753_v35 = vadd.f32 %v751_v28, %v676_v33  ;;  %v727_v45 = vpop.f32.mrf.mxu1  ;;  %v1420_v29 = vld [vmem:[%s2644_s5 + $0x38] sm:$0xff] }
  0xed   : > { %v678_v37 = vpop.f32.mrf.mxu0  ;;  %v788_v47 = vadd.f32 %v786_v43, %v727_v45 }
  0xee   : > { %v2236_v39 = vmul.f32 %v763_v30, %v753_v35  ;;  %814 = vrot.lane.b32.xlu1 %v2234_v34, %s2653_s2  ;;  %1087 = vrot.lane.b32.xlu0 %v2234_v34, %s2048_s3  ;;  %v729_v48 = vpop.f32.mrf.mxu1  ;;  %s2061_s2 = smov 47  }
  0xef   : > { %v679_v41 = vpop.f32.mrf.mxu0  ;;  %v2246_v49 = vmul.f32 %v795_v44, %v788_v47  ;;  %v789_v50 = vadd.f32 %v787_v46, %v729_v48 }
  0xf0   : > { %v731_v51 = vpop.f32.mrf.mxu1 }
  0xf1   : > { %v2252_v52 = vmul.f32 %v799_v16, %v789_v50  ;;  %v1414_v16 = vld [vmem:[%s2644_s5 + $0x8] sm:$0xff] }
  0xf2   : > { %1110 = vrot.lane.b32.xlu1 %v2236_v39, %s2049_s7  ;;  %1108 = vrot.lane.b32.xlu0 %v2234_v34, %s2049_s7  ;;  %v732_v53 = vpop.f32.mrf.mxu1 }
  0xf6   : > { %1068 = vrot.lane.b32.xlu1 %v2236_v39, %s2050_s12  ;;  %1045 = vrot.lane.b32.xlu0 %v2234_v34, %s2051_s24 }
  0xfa   : > { %1026 = vrot.lane.b32.xlu1 %v2236_v39, %s2052_s30  ;;  %1066 = vrot.lane.b32.xlu0 %v2234_v34, %s2050_s12 }
  0xfe   : > { %984 = vrot.lane.b32.xlu1 %v2236_v39, %s2655_s6  ;;  %1003 = vrot.lane.b32.xlu0 %v2234_v34, %s2054_s16 }
 0x102   : > { %942 = vrot.lane.b32.xlu1 %v2236_v39, %s2055_s15  ;;  %1024 = vrot.lane.b32.xlu0 %v2234_v34, %s2052_s30 }
 0x106   : > { %900 = vrot.lane.b32.xlu1 %v2236_v39, %s2056_s26  ;;  %961 = vrot.lane.b32.xlu0 %v2234_v34, %s2057_s25 }
 0x10a   : > { %858 = vrot.lane.b32.xlu1 %v2236_v39, %s2058_s27  ;;  %982 = vrot.lane.b32.xlu0 %v2234_v34, %s2655_s6  ;;  %s2062_s6 = smov 126  }
 0x10e   : > { %1306 = vrot.lane.b32.xlu1 %v2236_v39, %s2057_s25  ;;  %919 = vrot.lane.b32.xlu0 %v2234_v34, %s2059_s19 }
 0x112   : > { %1287 = vrot.lane.b32.xlu1 %v2236_v39, %s2055_s15  ;;  %940 = vrot.lane.b32.xlu0 %v2234_v34, %s2055_s15 }
 0x116   : > { %1249 = vrot.lane.b32.xlu1 %v2236_v39, %s2056_s26  ;;  %877 = vrot.lane.b32.xlu0 %v2234_v34, %s2060_s29 }
 0x11a   : > { %1211 = vrot.lane.b32.xlu1 %v2236_v39, %s2058_s27  ;;  %898 = vrot.lane.b32.xlu0 %v2234_v34, %s2056_s26 }
 0x11e   : > { %1131 = vrot.lane.b32.xlu1 %v2236_v39, %s2061_s2  ;;  %835 = vrot.lane.b32.xlu0 %v2234_v34, %s2062_s6 }
 0x122   : > { %1099 = vrot.lane.b32.xlu1 %v2246_v49, %s2048_s3  ;;  %856 = vrot.lane.b32.xlu0 %v2234_v34, %s2058_s27 }
 0x126   : > { %1120 = vrot.lane.b32.xlu1 %v2246_v49, %s2049_s7  ;;  %1089 = vrot.lane.b32.xlu0 %v2236_v39, %s2048_s3  ;;  %s2671_s3 = smov 64   ;;  %s2672_s7 = smov 127  }
 0x12a   : > { %1057 = vrot.lane.b32.xlu1 %v2246_v49, %s2051_s24  ;;  %1047 = vrot.lane.b32.xlu0 %v2236_v39, %s2051_s24 }
 0x12e   : > { %1078 = vrot.lane.b32.xlu1 %v2246_v49, %s2050_s12  ;;  %1005 = vrot.lane.b32.xlu0 %v2236_v39, %s2054_s16  ;;  %s2063_s12 = smov 46  }
 0x132   : > { %1015 = vrot.lane.b32.xlu1 %v2246_v49, %s2054_s16  ;;  %963 = vrot.lane.b32.xlu0 %v2236_v39, %s2057_s25 }
 0x136   : > { %1036 = vrot.lane.b32.xlu1 %v2246_v49, %s2052_s30  ;;  %921 = vrot.lane.b32.xlu0 %v2236_v39, %s2059_s19 }
 0x13a   : > { %973 = vrot.lane.b32.xlu1 %v2246_v49, %s2057_s25  ;;  %879 = vrot.lane.b32.xlu0 %v2236_v39, %s2060_s29 }
 0x13e   : > { %994 = vrot.lane.b32.xlu1 %v2246_v49, %s2671_s3  ;;  %837 = vrot.lane.b32.xlu0 %v2236_v39, %s2062_s6 }
 0x142   : > { %931 = vrot.lane.b32.xlu1 %v2246_v49, %s2059_s19  ;;  %816 = vrot.lane.b32.xlu0 %v2236_v39, %s2672_s7 }
 0x146   : > { %952 = vrot.lane.b32.xlu1 %v2246_v49, %s2055_s15  ;;  %1268 = vrot.lane.b32.xlu0 %v2236_v39, %s2059_s19 }
 0x14a   : > { %889 = vrot.lane.b32.xlu1 %v2246_v49, %s2060_s29  ;;  %1230 = vrot.lane.b32.xlu0 %v2236_v39, %s2060_s29 }
 0x14e   : > { %910 = vrot.lane.b32.xlu1 %v2246_v49, %s2056_s26  ;;  %1192 = vrot.lane.b32.xlu0 %v2236_v39, %s2062_s6 }
 0x152   : > { %847 = vrot.lane.b32.xlu1 %v2246_v49, %s2062_s6  ;;  %1173 = vrot.lane.b32.xlu0 %v2236_v39, %s2672_s7 }
 0x156   : > { %868 = vrot.lane.b32.xlu1 %v2246_v49, %s2058_s27  ;;  %1152 = vrot.lane.b32.xlu0 %v2236_v39, %s2063_s12 }
 0x15a   : > { %1316 = vrot.lane.b32.xlu1 %v2252_v52, %s2057_s25  ;;  %826 = vrot.lane.b32.xlu0 %v2246_v49, %s2672_s7 }
 0x15e   : > { %1278 = vrot.lane.b32.xlu1 %v2252_v52, %s2059_s19  ;;  %1314 = vrot.lane.b32.xlu0 %v2246_v49, %s2057_s25 }
 0x160   : > { %v2358_v54 = vpop.permute.xlu1 %814  ;;  %v2360_v55 = vpop.permute.xlu0 %1087 }
 0x162   : > { %1297 = vrot.lane.b32.xlu1 %v2252_v52, %s2055_s15  ;;  %1276 = vrot.lane.b32.xlu0 %v2246_v49, %s2059_s19 }
 0x164   : > { %v1111_v56 = vpop.permute.xlu1 %1110  ;;  %v1109_v57 = vpop.permute.xlu0 %1108 }
 0x165   : > { %1117 = vst.msk [vmem:[#allocation2 + $0xf8] sm:$0xff] %vm1112_vm2, %v1111_v56  ;;  %v2366_v58 = vsel %vm1112_vm2, %v1109_v57, %v1111_v56  ;;  %vm1081_vm2 = vcmask 1047992  }
 0x166   : > { %1240 = vrot.lane.b32.xlu1 %v2252_v52, %s2060_s29  ;;  %1295 = vrot.lane.b32.xlu0 %v2246_v49, %s2055_s15  ;;  %s549_s15 = sand.u32 1, %s2020_s17   ;;  %s1866_s17 = sshll.u32 (%p2170_p5), %s2032_s20, 5 }
 0x167   : > { %s1630_s28 = sadd.s32 (%p2170_p5), %s1866_s17, %s2184_s14 }
 0x168   : > { %v1069_v59 = vpop.permute.xlu1 %1068  ;;  %v2372_v60 = vpop.permute.xlu0 %1045  ;;  %s1867_s25 = sshll.u32 (%p2170_p5), %s1630_s28, 3 }
 0x169   : > { %1075 = vst.msk [vmem:[#allocation2 + $0xd8] sm:$0xff] %vm1070_vm3, %v1069_v59 }
 0x16a   : > { %1259 = vrot.lane.b32.xlu1 %v2252_v52, %s2056_s26  ;;  %1238 = vrot.lane.b32.xlu0 %v2246_v49, %s2060_s29  ;;  %s1632_s29 = scalar_lea.vmem (%p2170_p5), %s2650_s11, %s1867_s25 }
 0x16c   : > { %v1027_v61 = vpop.permute.xlu1 %1026  ;;  %v1067_v62 = vpop.permute.xlu0 %1066 }
 0x16d   : > { %1033 = vst.msk [vmem:[#allocation2 + $0xb8] sm:$0xff] %vm1028_vm4, %v1027_v61  ;;  %v2379_v63 = vsel %vm1070_vm3, %v1067_v62, %v1069_v59  ;;  %vm1007_vm3 = vcmask 515072  }
 0x16e   : > { %1202 = vrot.lane.b32.xlu1 %v2252_v52, %s2062_s6  ;;  %1257 = vrot.lane.b32.xlu0 %v2246_v49, %s2056_s26  ;;  %s1828_s26 = sshll.u32 %s549_s15, 7 }
 0x170   : > { %v985_v0 = vpop.permute.xlu1 %984  ;;  %v2385_v1 = vpop.permute.xlu0 %1003 }
 0x171   : > { %991 = vst.msk [vmem:[#allocation2 + $0x98] sm:$0xff] %vm986_vm5, %v985_v0 }
 0x172   : > { %1221 = vrot.lane.b32.xlu1 %v2252_v52, %s2058_s27  ;;  %1200 = vrot.lane.b32.xlu0 %v2246_v49, %s2062_s6 }
 0x174   : > { %v943_v2 = vpop.permute.xlu1 %942  ;;  %v1025_v3 = vpop.permute.xlu0 %1024 }
 0x175   : > { %949 = vst.msk [vmem:[#allocation2 + $0x78] sm:$0xff] %vm944_vm6, %v943_v2  ;;  %v2394_v4 = vsel %vm1028_vm4, %v1025_v3, %v1027_v61  ;;  %vm1018_vm4 = vcmask 1048056  }
 0x176   : > { %1183 = vrot.lane.b32.xlu1 %v2252_v52, %s2672_s7  ;;  %1219 = vrot.lane.b32.xlu0 %v2246_v49, %s2058_s27 }
 0x178   : > { %v901_v5 = vpop.permute.xlu1 %900  ;;  %v2400_v6 = vpop.permute.xlu0 %961 }
 0x179   : > { %907 = vst.msk [vmem:[#allocation2 + $0x58] sm:$0xff] %vm902_vm7, %v901_v5 }
 0x17a   : > { %1129 = vrot.lane.b32.xlu1 %v2234_v34, %s2061_s2  ;;  %1181 = vrot.lane.b32.xlu0 %v2246_v49, %s2672_s7 }
 0x17c   : > { %v859_v7 = vpop.permute.xlu1 %858  ;;  %v983_v8 = vpop.permute.xlu0 %982 }
 0x17d   : > { %865 = vst.msk [vmem:[#allocation2 + $0x38] sm:$0xff] %vm2658_vm8, %v859_v7  ;;  %v2409_v9 = vsel %vm986_vm5, %v983_v8, %v985_v0  ;;  %vm1039_vm5 = vcmask 1048048  }
 0x17e   : > { %1150 = vrot.lane.b32.xlu1 %v2234_v34, %s2063_s12  ;;  %1141 = vrot.lane.b32.xlu0 %v2246_v49, %s2061_s2  ;;  %s2575_s2 = scalar_lea.vmem [#allocation5], %s1828_s26 }
 0x180   : > { %v1307_v11 = vpop.permute.xlu1 %1306  ;;  %v2418_v12 = vpop.permute.xlu0 %919 }
 0x181   : > { %1309 = vst.msk [vmem:[#allocation2 + $0x1a0] sm:$0xff] %vm965_vm9, %v1307_v11 }
 0x182   : > { %1423 = vperm.xlu1 %1973, %v1413_v10   ;;  %1162 = vrot.lane.b32.xlu0 %v2246_v49, %s2063_s12 }
 0x184   : > { %v1288_v17 = vpop.permute.xlu1 %1287  ;;  %v941_v18 = vpop.permute.xlu0 %940 }
 0x185   : > { %1290 = vst.msk [vmem:[#allocation2 + $0x190] sm:$0xff] %vm944_vm6, %v1288_v17  ;;  %v2439_v19 = vsel %vm944_vm6, %v941_v18, %v943_v2 }
 0x186   : > { %1433 = vperm.xlu1 %1973, %v1415_v15   ;;  %1428 = vperm.xlu0 %1972, %v1414_v16  }
 0x188   : > { %v1250_v22 = vpop.permute.xlu1 %1249  ;;  %v2447_v23 = vpop.permute.xlu0 %877 }
 0x189   : > { %1252 = vst.msk [vmem:[#allocation2 + $0x170] sm:$0xff] %vm902_vm7, %v1250_v22 }
 0x18a   : > { %1443 = vperm.xlu1 %1973, %v1417_v20   ;;  %1438 = vperm.xlu0 %1972, %v1416_v21  }
 0x18c   : > { %v1212_v26 = vpop.permute.xlu1 %1211  ;;  %v899_v27 = vpop.permute.xlu0 %898 }
 0x18d   : > { %1214 = vst.msk [vmem:[#allocation2 + $0x150] sm:$0xff] %vm2658_vm8, %v1212_v26  ;;  %v2458_v28 = vsel %vm902_vm7, %v899_v27, %v901_v5 }
 0x18e   : > { %1453 = vperm.xlu1 %1973, %v1419_v24   ;;  %1448 = vperm.xlu0 %1972, %v1418_v25  }
 0x190   : > { %v2463_v30 = vpop.permute.xlu1 %1131  ;;  %v2465_v31 = vpop.permute.xlu0 %835 }
 0x191   : > { %1138 = vst.msk [vmem:[#allocation2 + $0x108] sm:$0xff] %vm2657_vm11, %v2463_v30  ;;  %vm871_vm11 = vcmask 1048512  }
 0x192   : > { %1458 = vperm.xlu0 %1972, %v1420_v29  }
 0x194   : > { %v1100_v32 = vpop.permute.xlu1 %1099  ;;  %v857_v33 = vpop.permute.xlu0 %856 }
 0x195   : > { %v2470_v35 = vsel %vm2658_vm8, %v857_v33, %v859_v7  ;;  %vm1154_vm8 = vcmask 375808  }
 0x198   : > { %v1121_v36 = vpop.permute.xlu1 %1120  ;;  %v1090_v37 = vpop.permute.xlu0 %1089 }
 0x199   : > { %1124 = vst.msk [vmem:[#allocation2 + $0xf8] sm:$0xff] %vm1123_vm12, %v1121_v36  ;;  %v1092_v38 = vsel %vm1091_vm13, %v2360_v55, %v1090_v37  ;;  %vm923_vm12 = vcmask 916480  }
 0x19a   : > { %1096 = vst.msk [vmem:[#allocation2 + $0xe8] sm:$0xff] %vm1091_vm13, %v1090_v37  ;;  %v1399_v50 = vpack.c.bf16 %v2366_v58, %v1092_v38  ;;  %vm976_vm13 = vcmask 1048432  }
 0x19b   : > { %1103 = vst.msk [vmem:[#allocation2 + $0xe8] sm:$0xff] %vm1102_vm14, %v1100_v32  ;;  %vm881_vm14 = vcmask 973824  }
 0x19c   : > { %v1058_v40 = vpop.permute.xlu1 %1057  ;;  %v1048_v41 = vpop.permute.xlu0 %1047 }
 0x19d   : > { %v1050_v42 = vsel %vm1049_vm15, %v2372_v60, %v1048_v41  ;;  %1054 = vst.msk [vmem:[#allocation2 + $0xc8] sm:$0xff] %vm1049_vm15, %v1048_v41  ;;  %vm997_vm15 = vcmask 1048064  }
 0x19e   : > { %1061 = vst.msk [vmem:[#allocation2 + $0xc8] sm:$0xff] %vm1060_vm1, %v1058_v40  ;;  %v1397_v61 = vpack.c.bf16 %v2379_v63, %v1050_v42  ;;  %vm2659_vm1 = vcmask 1031168  }
 0x1a0   : > { %v1079_v43 = vpop.permute.xlu1 %1078  ;;  %v1006_v44 = vpop.permute.xlu0 %1005  ;;  %v1362_v45 = vld [vmem:[#allocation2 + $0xf8] sm:$0xff] }
 0x1a1   : > { %1082 = vst.msk [vmem:[#allocation2 + $0xd8] sm:$0xff] %vm1081_vm2, %v1079_v43  ;;  %v1008_v46 = vsel %vm1007_vm3, %v2385_v1, %v1006_v44  ;;  %vm934_vm2 = vcmask 1048448  }
 0x1a2   : > { %1012 = vst.msk [vmem:[#allocation2 + $0xa8] sm:$0xff] %vm1007_vm3, %v1006_v44  ;;  %v1360_v47 = vld [vmem:[#allocation2 + $0xe8] sm:$0xff]  ;;  %v1395_v8 = vpack.c.bf16 %v2394_v4, %v1008_v46  ;;  %vm818_vm3 = vcmask 1039360  }
 0x1a3   : > { %v1400_v48 = vpack.c.bf16 %v1362_v45, %v1360_v47 }
 0x1a4   : > { %v1016_v51 = vpop.permute.xlu1 %1015  ;;  %v964_v52 = vpop.permute.xlu0 %963 }
 0x1a5   : > { %1516 = vmatprep.subr.bf16.mxu0 %v1400_v48  ;;  %1870 = vmatprep.subr.bf16.mxu1 %v1400_v48  ;;  %1019 = vst.msk [vmem:[#allocation2 + $0xa8] sm:$0xff] %vm1018_vm4, %v1016_v51  ;;  %v966_v53 = vsel %vm965_vm9, %v2400_v6, %v964_v52  ;;  %v1356_v57 = vld [vmem:[#allocation2 + $0xc8] sm:$0xff]  ;;  %vm955_vm4 = vcmask 1048440  }
 0x1a6   : > { %970 = vst.msk [vmem:[#allocation2 + $0x88] sm:$0xff] %vm965_vm9, %v964_v52  ;;  %1517 = vmatpush1.bf16.msra.mxu0 %v1399_v50  ;;  %1884 = vmatpush1.bf16.msra.mxu1 %v1399_v50  ;;  %v1393_v17 = vpack.c.bf16 %v2409_v9, %v966_v53 }
 0x1a8   : > { %v1037_v55 = vpop.permute.xlu1 %1036  ;;  %v922_v56 = vpop.permute.xlu0 %921  ;;  %v1358_v59 = vld [vmem:[#allocation2 + $0xd8] sm:$0xff] }
 0x1a9   : > { %1040 = vst.msk [vmem:[#allocation2 + $0xb8] sm:$0xff] %vm1039_vm5, %v1037_v55  ;;  %v2481_v58 = vsel %vm923_vm12, %v2418_v12, %v922_v56  ;;  %v1398_v60 = vpack.c.bf16 %v1358_v59, %v1356_v57  ;;  %vm892_vm5 = vcmask 1048504  }
 0x1aa   : > { %928 = vst.msk [vmem:[#allocation2 + $0x68] sm:$0xff] %vm923_vm12, %v922_v56  ;;  %v1391_v24 = vpack.c.bf16 %v2439_v19, %v2481_v58 }
 0x1ab   : > { %1518 = vmatprep.subr.bf16.mxu0 %v1398_v60  ;;  %1871 = vmatprep.subr.bf16.mxu1 %v1398_v60 }
 0x1ac   : > { %v974_v62 = vpop.permute.xlu1 %973  ;;  %1519 = vmatpush1.bf16.msra.mxu0 %v1397_v61  ;;  %1885 = vmatpush1.bf16.msra.mxu1 %v1397_v61  ;;  %v880_v0 = vpop.permute.xlu0 %879  ;;  %v1352_v63 = vld [vmem:[#allocation2 + $0xa8] sm:$0xff] }
 0x1ad   : > { %977 = vst.msk [vmem:[#allocation2 + $0x88] sm:$0xff] %vm976_vm13, %v974_v62  ;;  %v2488_v1 = vsel %vm881_vm14, %v2447_v23, %v880_v0 }
 0x1ae   : > { %886 = vst.msk [vmem:[#allocation2 + $0x48] sm:$0xff] %vm881_vm14, %v880_v0  ;;  %v1389_v33 = vpack.c.bf16 %v2458_v28, %v2488_v1 }
 0x1b0   : > { %v995_v2 = vpop.permute.xlu1 %994  ;;  %v838_v3 = vpop.permute.xlu0 %837  ;;  %v1354_v5 = vld [vmem:[#allocation2 + $0xb8] sm:$0xff] }
 0x1b1   : > { %998 = vst.msk [vmem:[#allocation2 + $0x98] sm:$0xff] %vm997_vm15, %v995_v2  ;;  %v2493_v6 = vsel %vm2659_vm1, %v2465_v31, %v838_v3  ;;  %v1396_v7 = vpack.c.bf16 %v1354_v5, %v1352_v63  ;;  %vm913_vm15 = vcmask 1048496  }
 0x1b2   : > { %844 = vst.msk [vmem:[#allocation2 + $0x28] sm:$0xff] %vm2659_vm1, %v838_v3  ;;  %v1387_v28 = vpack.c.bf16 %v2470_v35, %v2493_v6 }
 0x1b3   : > { %1520 = vmatprep.subr.bf16.mxu0 %v1396_v7  ;;  %1872 = vmatprep.subr.bf16.mxu1 %v1396_v7 }
 0x1b4   : > { %v932_v10 = vpop.permute.xlu1 %931  ;;  %1521 = vmatpush1.bf16.msra.mxu0 %v1395_v8  ;;  %1886 = vmatpush1.bf16.msra.mxu1 %v1395_v8  ;;  %v817_v11 = vpop.permute.xlu0 %816  ;;  %v1348_v15 = vld [vmem:[#allocation2 + $0x88] sm:$0xff] }
 0x1b5   : > { %935 = vst.msk [vmem:[#allocation2 + $0x68] sm:$0xff] %vm934_vm2, %v932_v10  ;;  %v2500_v12 = vsel %vm818_vm3, %v2358_v54, %v817_v11 }
 0x1b6   : > { %823 = vst.msk [vmem:[#allocation2 + $0x18] sm:$0xff] %vm818_vm3, %v817_v11  ;;  %v1385_v51 = vpack.c.bf16 %v2500_v12, %v2234_v34 }
 0x1b8   : > { %v953_v13 = vpop.permute.xlu1 %952  ;;  %v1269_v14 = vpop.permute.xlu0 %1268  ;;  %v1350_v4 = vld [vmem:[#allocation2 + $0x98] sm:$0xff] }
 0x1b9   : > { %956 = vst.msk [vmem:[#allocation2 + $0x78] sm:$0xff] %vm955_vm4, %v953_v13  ;;  %v1394_v16 = vpack.c.bf16 %v1350_v4, %v1348_v15 }
 0x1ba   : > { %1271 = vst.msk [vmem:[#allocation2 + $0x180] sm:$0xff] %vm923_vm12, %v1269_v14 }
 0x1bb   : > { %1522 = vmatprep.subr.bf16.mxu0 %v1394_v16  ;;  %1873 = vmatprep.subr.bf16.mxu1 %v1394_v16 }
 0x1bc   : > { %v890_v18 = vpop.permute.xlu1 %889  ;;  %1523 = vmatpush1.bf16.msra.mxu0 %v1393_v17  ;;  %1887 = vmatpush1.bf16.msra.mxu1 %v1393_v17  ;;  %v1231_v54 = vpop.permute.xlu0 %1230  ;;  %v1344_v22 = vld [vmem:[#allocation2 + $0x68] sm:$0xff] }
 0x1bd   : > { %893 = vst.msk [vmem:[#allocation2 + $0x48] sm:$0xff] %vm892_vm5, %v890_v18 }
 0x1be   : > { %1233 = vst.msk [vmem:[#allocation2 + $0x160] sm:$0xff] %vm881_vm14, %v1231_v54 }
 0x1c0   : > { %v911_v20 = vpop.permute.xlu1 %910  ;;  %v1193_v21 = vpop.permute.xlu0 %1192  ;;  %v1346_v23 = vld [vmem:[#allocation2 + $0x78] sm:$0xff] }
 0x1c1   : > { %914 = vst.msk [vmem:[#allocation2 + $0x58] sm:$0xff] %vm913_vm15, %v911_v20  ;;  %v1392_v9 = vpack.c.bf16 %v1346_v23, %v1344_v22 }
 0x1c2   : > { %1195 = vst.msk [vmem:[#allocation2 + $0x140] sm:$0xff] %vm2659_vm1, %v1193_v21  ;;  %vm829_vm1 = vcmask 1048568  }
 0x1c3   : > { %1524 = vmatprep.subr.bf16.mxu0 %v1392_v9  ;;  %1874 = vmatprep.subr.bf16.mxu1 %v1392_v9 }
 0x1c4   : > { %v848_v25 = vpop.permute.xlu1 %847  ;;  %1525 = vmatpush1.bf16.msra.mxu0 %v1391_v24  ;;  %1888 = vmatpush1.bf16.msra.mxu1 %v1391_v24  ;;  %v1174_v26 = vpop.permute.xlu0 %1173  ;;  %v1340_v31 = vld [vmem:[#allocation2 + $0x48] sm:$0xff] }
 0x1c5   : > { %851 = vst.msk [vmem:[#allocation2 + $0x28] sm:$0xff] %vm850_vm10, %v848_v25 }
 0x1c6   : > { %1176 = vst.msk [vmem:[#allocation2 + $0x130] sm:$0xff] %vm818_vm3, %v1174_v26 }
 0x1c8   : > { %v869_v27 = vpop.permute.xlu1 %868  ;;  %v2514_v29 = vpop.permute.xlu0 %1152  ;;  %v1342_v32 = vld [vmem:[#allocation2 + $0x58] sm:$0xff] }
 0x1c9   : > { %872 = vst.msk [vmem:[#allocation2 + $0x38] sm:$0xff] %vm871_vm11, %v869_v27  ;;  %v1390_v19 = vpack.c.bf16 %v1342_v32, %v1340_v31 }
 0x1ca   : > { %1159 = vst.msk [vmem:[#allocation2 + $0x118] sm:$0xff] %vm1154_vm8, %v2514_v29 }
 0x1cb   : > { %1526 = vmatprep.subr.bf16.mxu0 %v1390_v19  ;;  %1875 = vmatprep.subr.bf16.mxu1 %v1390_v19 }
 0x1cc   : > { %v1317_v36 = vpop.permute.xlu1 %1316  ;;  %1527 = vmatpush1.bf16.msra.mxu0 %v1389_v33  ;;  %1889 = vmatpush1.bf16.msra.mxu1 %v1389_v33  ;;  %v827_v37 = vpop.permute.xlu0 %826  ;;  %v1336_v41 = vld [vmem:[#allocation2 + $0x28] sm:$0xff] }
 0x1cd   : > { %830 = vst.msk [vmem:[#allocation2 + $0x18] sm:$0xff] %vm829_vm1, %v827_v37  ;;  %v1983_v33 = vld [vmem:[%s2643_s4 + $0x20] ss:$8 sps:$4 sm:$0xff]   ;;  %v1988_v37 = vld [vmem:[%s2643_s4 + $0x10] ss:$8 sps:$4 sm:$0xff]  }
 0x1d0   : > { %v1279_v38 = vpop.permute.xlu1 %1278  ;;  %v1315_v40 = vpop.permute.xlu0 %1314  ;;  %v1338_v42 = vld [vmem:[#allocation2 + $0x38] sm:$0xff] }
 0x1d1   : > { %v1318_v43 = vsel %vm965_vm9, %v1315_v40, %v1317_v36  ;;  %1321 = vst.msk [vmem:[#allocation2 + $0x1a0] sm:$0xff] %vm976_vm13, %v1315_v40  ;;  %v1388_v44 = vpack.c.bf16 %v1338_v42, %v1336_v41  ;;  %vm1144_vm9 = vcmask 1047928   ;;  %v1986_v36 = vld [vmem:[%s2643_s4 + $0x34] ss:$8 sps:$4 sm:$0xff]  }
 0x1d2   : > { %v1412_v52 = vpack.c.bf16 %v1318_v43, %v1318_v43 }
 0x1d3   : > { %1528 = vmatprep.subr.bf16.mxu0 %v1388_v44  ;;  %1876 = vmatprep.subr.bf16.mxu1 %v1388_v44 }
 0x1d4   : > { %v1298_v45 = vpop.permute.xlu1 %1297  ;;  %1529 = vmatpush1.bf16.msra.mxu0 %v1387_v28  ;;  %1890 = vmatpush1.bf16.msra.mxu1 %v1387_v28  ;;  %v1277_v46 = vpop.permute.xlu0 %1276  ;;  %v1334_v47 = vld [vmem:[#allocation2 + $0x18] sm:$0xff] }
 0x1d5   : > { %v1280_v48 = vsel %vm923_vm12, %v1277_v46, %v1279_v38  ;;  %1283 = vst.msk [vmem:[#allocation2 + $0x180] sm:$0xff] %vm934_vm2, %v1277_v46  ;;  %v1386_v50 = vpack.c.bf16 %v1334_v47, %v2236_v39  ;;  %v1989_v38 = vld [vmem:[%s2643_s4 + $0x30] ss:$8 sps:$4 sm:$0xff]  }
 0x1d7   : > { %1530 = vmatprep.subr.bf16.mxu0 %v1386_v50  ;;  %1877 = vmatprep.subr.bf16.mxu1 %v1386_v50 }
 0x1d8   : > { %v1241_v35 = vpop.permute.xlu1 %1240  ;;  %v1296_v53 = vpop.permute.xlu0 %1295  ;;  %1531 = vmatpush1.bf16.msra.mxu0 %v1385_v51  ;;  %1891 = vmatpush1.bf16.msra.mxu1 %v1385_v51  ;;  %v1383_v55 = vld [vmem:[#allocation2 + $0x1a0] sm:$0xff] }
 0x1d9   : > { %v1299_v56 = vsel %vm944_vm6, %v1296_v53, %v1298_v45  ;;  %1302 = vst.msk [vmem:[#allocation2 + $0x190] sm:$0xff] %vm955_vm4, %v1296_v53  ;;  %1859 = vmatprep.subr.msk.bf16.mxu0 %vm633_vm0, %v1412_v52  ;;  %1878 = vmatprep.subr.msk.bf16.mxu1 %vm633_vm0, %v1412_v52  ;;  %v1411_v57 = vpack.c.bf16 %v1383_v55, %v1383_v55  ;;  %vm2674_vm6 = vcmask 982016  }
 0x1da   : > { %v1410_v59 = vpack.c.bf16 %v1299_v56, %v1280_v48 }
 0x1db   : > { %v1511_v34 = vsel %vm633_vm0, %v1411_v57, 0  ;;  %vm2673_vm0 = vcmask 1031168  }
 0x1dc   : > { %v1260_v58 = vpop.permute.xlu1 %1259  ;;  %v1239_v60 = vpop.permute.xlu0 %1238  ;;  %1537 = vmatpush2.bf16.msra.mxu0 %v1511_v34  ;;  %1892 = vmatpush2.bf16.msra.mxu1 %v1511_v34  ;;  %v1379_v1 = vld [vmem:[#allocation2 + $0x180] sm:$0xff] }
 0x1dd   : > { %v1242_v61 = vsel %vm881_vm14, %v1239_v60, %v1241_v35  ;;  %1245 = vst.msk [vmem:[#allocation2 + $0x160] sm:$0xff] %vm892_vm5, %v1239_v60  ;;  %1538 = vmatprep.subr.bf16.mxu0 %v1410_v59  ;;  %1879 = vmatprep.subr.bf16.mxu1 %v1410_v59 }
 0x1e0   : > { %v1203_v62 = vpop.permute.xlu1 %1202  ;;  %v1258_v0 = vpop.permute.xlu0 %1257  ;;  %v1381_v2 = vld [vmem:[#allocation2 + $0x190] sm:$0xff] }
 0x1e1   : > { %v1261_v3 = vsel %vm902_vm7, %v1258_v0, %v1260_v58  ;;  %1264 = vst.msk [vmem:[#allocation2 + $0x170] sm:$0xff] %vm913_vm15, %v1258_v0  ;;  %v1409_v63 = vpack.c.bf16 %v1381_v2, %v1379_v1  ;;  %vm2675_vm7 = vcmask 384000  }
 0x1e2   : > { %v1408_v5 = vpack.c.bf16 %v1261_v3, %v1242_v61 }
 0x1e3   : > { %1539 = vmatpush2.bf16.msra.mxu0 %v1409_v63  ;;  %1893 = vmatpush2.bf16.msra.mxu1 %v1409_v63 }
 0x1e4   : > { %v1222_v6 = vpop.permute.xlu1 %1221  ;;  %v1201_v7 = vpop.permute.xlu0 %1200  ;;  %1540 = vmatprep.subr.bf16.mxu0 %v1408_v5  ;;  %1880 = vmatprep.subr.bf16.mxu1 %v1408_v5  ;;  %v1375_v12 = vld [vmem:[#allocation2 + $0x160] sm:$0xff] }
 0x1e5   : > { %v1204_v8 = vsel %vm2673_vm0, %v1201_v7, %v1203_v62  ;;  %1207 = vst.msk [vmem:[#allocation2 + $0x140] sm:$0xff] %vm850_vm10, %v1201_v7  ;;  %vm1165_vm10 = vcmask 1047920  }
 0x1e8   : > { %v1184_v10 = vpop.permute.xlu1 %1183  ;;  %v1220_v11 = vpop.permute.xlu0 %1219  ;;  %v1377_v13 = vld [vmem:[#allocation2 + $0x170] sm:$0xff] }
 0x1e9   : > { %v1223_v14 = vsel %vm2674_vm6, %v1220_v11, %v1222_v6  ;;  %1226 = vst.msk [vmem:[#allocation2 + $0x150] sm:$0xff] %vm871_vm11, %v1220_v11  ;;  %v1407_v15 = vpack.c.bf16 %v1377_v13, %v1375_v12 }
 0x1ea   : > { %v1406_v4 = vpack.c.bf16 %v1223_v14, %v1204_v8 }
 0x1eb   : > { %1541 = vmatpush2.bf16.msra.mxu0 %v1407_v15  ;;  %1894 = vmatpush2.bf16.msra.mxu1 %v1407_v15 }
 0x1ec   : > { %v1130_v16 = vpop.permute.xlu1 %1129  ;;  %v1182_v17 = vpop.permute.xlu0 %1181  ;;  %1542 = vmatprep.subr.bf16.mxu0 %v1406_v4  ;;  %1881 = vmatprep.subr.bf16.mxu1 %v1406_v4  ;;  %v1371_v22 = vld [vmem:[#allocation2 + $0x140] sm:$0xff] }
 0x1ed   : > { %v1134_v18 = vsel %vm2675_vm7, %v1130_v16, %v2463_v30  ;;  %v1185_v54 = vsel %vm818_vm3, %v1182_v17, %v1184_v10  ;;  %1188 = vst.msk [vmem:[#allocation2 + $0x130] sm:$0xff] %vm829_vm1, %v1182_v17 }
 0x1ee   : > { %v1404_v25 = vpack.c.bf16 %v1185_v54, %v2246_v49  ;;  %v1982_v49 = vld [vmem:[%s2643_s4] ss:$8 sps:$4 sm:$0xff]  }
 0x1f0   : > { %v1151_v20 = vpop.permute.xlu1 %1150  ;;  %v1142_v21 = vpop.permute.xlu0 %1141  ;;  %v1373_v23 = vld [vmem:[#allocation2 + $0x150] sm:$0xff] }
 0x1f1   : > { %v1155_v9 = vsel %vm1154_vm8, %v1151_v20, %v2514_v29  ;;  %1145 = vst.msk [vmem:[#allocation2 + $0x108] sm:$0xff] %vm1144_vm9, %v1142_v21  ;;  %v1405_v24 = vpack.c.bf16 %v1373_v23, %v1371_v22  ;;  %vm2676_vm8 = vcmask 719872  }
 0x1f2   : > { %v1401_v29 = vpack.c.bf16 %v1155_v9, %v1134_v18  ;;  %vm2677_vm11 = vmmov %vm2676_vm8 }
 0x1f3   : > { %1543 = vmatpush2.bf16.msra.mxu0 %v1405_v24  ;;  %1895 = vmatpush2.bf16.msra.mxu1 %v1405_v24 }
 0x1f4   : > { %v1163_v30 = vpop.permute.xlu0 %1162  ;;  %1544 = vmatprep.subr.bf16.mxu0 %v1404_v25  ;;  %1882 = vmatprep.subr.bf16.mxu1 %v1404_v25  ;;  %v1369_v26 = vld [vmem:[#allocation2 + $0x130] sm:$0xff] }
 0x1f5   : > { %1166 = vst.msk [vmem:[#allocation2 + $0x118] sm:$0xff] %vm1165_vm10, %v1163_v30  ;;  %v1403_v27 = vpack.c.bf16 %v1369_v26, %v2236_v39  ;;  %v1984_v39 = vld [vmem:[%s2643_s4 + $0x14] ss:$8 sps:$4 sm:$0xff]  }
 0x1f7   : > { %1545 = vmatpush2.bf16.msra.mxu0 %v1403_v27  ;;  %1896 = vmatpush2.bf16.msra.mxu1 %v1403_v27 }
 0x1f8   : > { %v1364_v31 = vld [vmem:[#allocation2 + $0x108] sm:$0xff] }
 0x1fc   : > { %v1366_v32 = vld [vmem:[#allocation2 + $0x118] sm:$0xff] }
 0x1fd   : > { %v1402_v19 = vpack.c.bf16 %v1366_v32, %v1364_v31  ;;  %v1424_v40 = vpop.permute.xlu1 %1423 }
 0x1ff   : > { %1546 = vmatprep.subr.bf16.mxu0 %v1402_v19  ;;  %1883 = vmatprep.subr.bf16.mxu1 %v1402_v19 }
 0x200   : > { %1547 = vmatpush2.bf16.msra.mxu0 %v1401_v29  ;;  %1897 = vmatpush2.bf16.msra.mxu1 %v1401_v29 }
 0x201   : > { %v1429_v41 = vpop.permute.xlu0 %1428  ;;  %v1434_v42 = vpop.permute.xlu1 %1433 }
 0x203   : > { %1549 = vmatmul.mubr.bf16.vlgmr.msra.gmra.mxu0 %v1982_v49  ;;  %1569 = vmatmul.mubr.bf16.vlgmr.msra.gmra.mxu1 %v1983_v33 }
 0x204   : > { %1861 = vmatprep.mubr.msk.bf16.mxu0 %vm2676_vm8, %v1984_v39  ;;  %1863 = vmatprep.mubr.msk.bf16.mxu1 %vm2677_vm11, %v1986_v36 }
 0x205   : > { %v2573_v43 = vpop.permute.xlu0 %1438  ;;  %v1444_v44 = vpop.permute.xlu1 %1443 }
 0x209   : > { %v1449_v51 = vpop.permute.xlu0 %1448  ;;  %v1454_v0 = vpop.permute.xlu1 %1453 }
 0x20b   : > { %1559 = vmatmul.mubr.bf16.gmra.mxu0 %v1988_v37  ;;  %1579 = vmatmul.mubr.bf16.gmra.mxu1 %v1989_v38 }
 0x20d   : > { %v1459_v14 = vpop.permute.xlu0 %1458 }
 0x2c3   : > { %v1550_v28 = vpop.f32.mrf.mxu0  ;;  %v1570_v45 = vpop.f32.mrf.mxu1 }
 0x2c4   : > { %v1551_v46 = vadd.f32 %v1550_v28, %v1424_v40  ;;  %v1571_v47 = vadd.f32 %v1570_v45, %v1444_v44 }
 0x2c5   : > { %v1552_v48 = vpop.f32.mrf.mxu0  ;;  %v1572_v50 = vpop.f32.mrf.mxu1 }
 0x2c6   : > { %v1589_v52 = vmax.f32 %v1551_v46, 0.0  ;;  %v1597_v35 = vmax.f32 %v1571_v47, 0.0  ;;  %v1553_v53 = vadd.f32 %v1552_v48, %v1424_v40  ;;  %v1573_v55 = vadd.f32 %v1572_v50, %v1444_v44 }
 0x2c7   : > { %v1554_v56 = vpop.f32.mrf.mxu0  ;;  %v1574_v57 = vpop.f32.mrf.mxu1 }
 0x2c8   : > { %1605 = vst [vmem:[%s2575_s2] sm:$0xff] %v1589_v52  ;;  %1613 = vst [vmem:[%s2575_s2 + $0x40] sm:$0xff] %v1597_v35  ;;  %v1590_v59 = vmax.f32 %v1553_v53, 0.0  ;;  %v1598_v34 = vmax.f32 %v1573_v55, 0.0  ;;  %v1555_v58 = vadd.f32 %v1554_v56, %v1429_v41  ;;  %v1575_v60 = vadd.f32 %v1574_v57, %v1449_v51 }
 0x2c9   : > { %v1556_v61 = vpop.f32.mrf.mxu0  ;;  %v1576_v62 = vpop.f32.mrf.mxu1 }
 0x2ca   : > { %1606 = vst [vmem:[%s2575_s2 + $0x8] sm:$0xff] %v1590_v59  ;;  %1614 = vst [vmem:[%s2575_s2 + $0x48] sm:$0xff] %v1598_v34  ;;  %v1591_v1 = vmax.f32 %v1555_v58, 0.0  ;;  %v1599_v2 = vmax.f32 %v1575_v60, 0.0  ;;  %v1557_v3 = vadd.f32 %v1556_v61, %v1429_v41  ;;  %v1577_v63 = vadd.f32 %v1576_v62, %v1449_v51 }
 0x2cb   : > { %v1560_v5 = vpop.f32.mrf.mxu0  ;;  %v1580_v6 = vpop.f32.mrf.mxu1 }
 0x2cc   : > { %1607 = vst [vmem:[%s2575_s2 + $0x10] sm:$0xff] %v1591_v1  ;;  %1615 = vst [vmem:[%s2575_s2 + $0x50] sm:$0xff] %v1599_v2  ;;  %v1592_v7 = vmax.f32 %v1557_v3, 0.0  ;;  %v1600_v8 = vmax.f32 %v1577_v63, 0.0  ;;  %v1561_v10 = vadd.f32 %v1560_v5, %v1434_v42  ;;  %v1581_v11 = vadd.f32 %v1580_v6, %v1454_v0 }
 0x2cd   : > { %v1562_v12 = vpop.f32.mrf.mxu0  ;;  %v1582_v13 = vpop.f32.mrf.mxu1 }
 0x2ce   : > { %1608 = vst [vmem:[%s2575_s2 + $0x18] sm:$0xff] %v1592_v7  ;;  %1616 = vst [vmem:[%s2575_s2 + $0x58] sm:$0xff] %v1600_v8  ;;  %v1593_v15 = vmax.f32 %v1561_v10, 0.0  ;;  %v1601_v4 = vmax.f32 %v1581_v11, 0.0  ;;  %v1563_v16 = vadd.f32 %v1562_v12, %v1434_v42  ;;  %v1583_v17 = vadd.f32 %v1582_v13, %v1454_v0 }
 0x2cf   : > { %v1564_v18 = vpop.f32.mrf.mxu0  ;;  %v1584_v54 = vpop.f32.mrf.mxu1  ;;  %v1645_v19 = vld [vmem:[%s2575_s2] sm:$0xff] (%p2170_p5) }
 0x2d0   : > { %1609 = vst [vmem:[%s2575_s2 + $0x20] sm:$0xff] %v1593_v15  ;;  %1617 = vst [vmem:[%s2575_s2 + $0x60] sm:$0xff] %v1601_v4  ;;  %v1594_v20 = vmax.f32 %v1563_v16, 0.0  ;;  %v1602_v21 = vmax.f32 %v1583_v17, 0.0  ;;  %v1565_v22 = vadd.f32 %v1564_v18, %v2573_v43  ;;  %v1585_v23 = vadd.f32 %v1584_v54, %v1459_v14  ;;  %v1661_v40 = vld [vmem:[%s2575_s2 + $0x40] sm:$0xff] (%p2170_p5) }
 0x2d1   : > { %v1566_v9 = vpop.f32.mrf.mxu0  ;;  %v1586_v24 = vpop.f32.mrf.mxu1  ;;  %v1647_v29 = vld [vmem:[%s2575_s2 + $0x8] sm:$0xff] (%p2170_p5)  ;;  %1646 = vst [vmem:[%s1632_s29] sm:$0xff] (%p2170_p5), %v1645_v19  ;;  %1662 = vst [vmem:[%s1632_s29 + $0x80] sm:$0xff] (%p2170_p5), %v1661_v40 }
 0x2d2   : > { %1610 = vst [vmem:[%s2575_s2 + $0x28] sm:$0xff] %v1594_v20  ;;  %1618 = vst [vmem:[%s2575_s2 + $0x68] sm:$0xff] %v1602_v21  ;;  %v1595_v25 = vmax.f32 %v1565_v22, 0.0  ;;  %v1603_v30 = vmax.f32 %v1585_v23, 0.0  ;;  %v1567_v26 = vadd.f32 %v1566_v9, %v2573_v43  ;;  %v1587_v27 = vadd.f32 %v1586_v24, %v1459_v14  ;;  %1627 = sbr.rel (!%p2170_p5) target bundleno = 736 (0x2e0), region = 68  ;;  %v1663_v41 = vld [vmem:[%s2575_s2 + $0x48] sm:$0xff] (%p2170_p5) }
 0x2d3   : > { %v1649_v49 = vld [vmem:[%s2575_s2 + $0x10] sm:$0xff] (%p2170_p5)  ;;  %1648 = vst [vmem:[%s1632_s29 + $0x8] sm:$0xff] (%p2170_p5), %v1647_v29  ;;  %1664 = vst [vmem:[%s1632_s29 + $0x88] sm:$0xff] (%p2170_p5), %v1663_v41 }
 0x2d4   : > { %1611 = vst [vmem:[%s2575_s2 + $0x30] sm:$0xff] %v1595_v25  ;;  %1619 = vst [vmem:[%s2575_s2 + $0x70] sm:$0xff] %v1603_v30  ;;  %v1596_v31 = vmax.f32 %v1567_v26, 0.0  ;;  %v1604_v32 = vmax.f32 %v1587_v27, 0.0  ;;  %v1665_v42 = vld [vmem:[%s2575_s2 + $0x50] sm:$0xff] (%p2170_p5) }
 0x2d5   : > { %v1651_v33 = vld [vmem:[%s2575_s2 + $0x18] sm:$0xff] (%p2170_p5)  ;;  %1650 = vst [vmem:[%s1632_s29 + $0x20] sm:$0xff] (%p2170_p5), %v1649_v49  ;;  %1666 = vst [vmem:[%s1632_s29 + $0xa0] sm:$0xff] (%p2170_p5), %v1665_v42 }
 0x2d6   : > { %1612 = vst [vmem:[%s2575_s2 + $0x38] sm:$0xff] %v1596_v31  ;;  %1620 = vst [vmem:[%s2575_s2 + $0x78] sm:$0xff] %v1604_v32  ;;  %v1667_v43 = vld [vmem:[%s2575_s2 + $0x58] sm:$0xff] (%p2170_p5) }
 0x2d7   : > { %v1653_v39 = vld [vmem:[%s2575_s2 + $0x20] sm:$0xff]  ;;  %1652 = vst [vmem:[%s1632_s29 + $0x28] sm:$0xff] %v1651_v33  ;;  %1668 = vst [vmem:[%s1632_s29 + $0xa8] sm:$0xff] %v1667_v43 }
 0x2d8   : > { %1654 = vst [vmem:[%s1632_s29 + $0x40] sm:$0xff] %v1653_v39  ;;  %v1669_v44 = vld [vmem:[%s2575_s2 + $0x60] sm:$0xff] }
 0x2d9   : > { %v1655_v36 = vld [vmem:[%s2575_s2 + $0x28] sm:$0xff]  ;;  %1670 = vst [vmem:[%s1632_s29 + $0xc0] sm:$0xff] %v1669_v44 }
 0x2da   : > { %1656 = vst [vmem:[%s1632_s29 + $0x48] sm:$0xff] %v1655_v36  ;;  %v1671_v28 = vld [vmem:[%s2575_s2 + $0x68] sm:$0xff] }
 0x2db   : > { %v1657_v37 = vld [vmem:[%s2575_s2 + $0x30] sm:$0xff]  ;;  %1672 = vst [vmem:[%s1632_s29 + $0xc8] sm:$0xff] %v1671_v28 }
 0x2dc   : > { %1658 = vst [vmem:[%s1632_s29 + $0x60] sm:$0xff] %v1657_v37  ;;  %v1673_v45 = vld [vmem:[%s2575_s2 + $0x70] sm:$0xff] }
 0x2dd   : > { %v1659_v38 = vld [vmem:[%s2575_s2 + $0x38] sm:$0xff]  ;;  %1674 = vst [vmem:[%s1632_s29 + $0xe0] sm:$0xff] %v1673_v45 }
 0x2de   : > { %1660 = vst [vmem:[%s1632_s29 + $0x68] sm:$0xff] %v1659_v38  ;;  %v1675_v46 = vld [vmem:[%s2575_s2 + $0x78] sm:$0xff] }
 0x2df   : > { %1676 = vst [vmem:[%s1632_s29 + $0xe8] sm:$0xff] %v1675_v46 }
 0x2e0 PF: > { %s21_s23 = sadd.s32 1, %s2044_s23   ;;  %s2678_s14 = sld [smem:[#allocation6_spill]] }
 0x2e1   : > { %p18_p13 = scmp.ge.s32.totalorder %s21_s23, 6   ;;  %s2679_s3 = sld [smem:[#allocation7_spill]] }
 0x2e2   : > { %s2680_s17 = smov %s2024_s18  ;;  %s2681_s18 = smov %s2181_s13 }
 0x2e3   : > { %s2682_s19 = smov %s2036_s21  ;;  %s2683_s20 = smov %s2040_s22 }
 0x2e4   :  { %20 = sbr.rel (!%p18_p13) target bundleno = 9 (0x9), region = 132 }
 0x2e6   : > { %s2684_s21 = smov %s2678_s14 }
 0x2e7   : > { %s2685_s22 = smov %s2679_s3 }

</bundles_post_ra>
